<compile_context>
chip_gen: v7x
topology: tpu7x:2x2x1
jax: 0.10.0
libtpu: 0.0.40
codegen_flags: <defaults>
</compile_context>

<pallas_src>
import math

import jax
import jax.numpy as jnp
from jax import lax
from jax.experimental import pallas as pl
from jax.experimental.pallas import tpu as pltpu


BT = 32                # LSTM batch tile (review: 8 -> 32)
PAIRS_PER_STEP = 16    # (batch, link) pairs per attention grid step (8 -> 16)


def _ceil_to(x, m):
    return ((x + m - 1) // m) * m


# --------------------------------------------------------------------------
# Bidirectional LSTM over segments; hidden carried across links (grid axis 1).
# Input projection is done in-kernel; only h @ W_hh stays in the serial loop.
# --------------------------------------------------------------------------
def lstm_kernel(x_ref, lens_ref, wih_ref, bias_ref, whh_f_ref, whh_b_ref,
                out_ref, xgf_s, xgb_s, out_s, h_f_s, c_f_s, h_b_s, c_b_s):
    link = pl.program_id(1)
    S, Bt, E = x_ref.shape
    H = h_f_s.shape[-1]
    H4 = 4 * H

    # ---- Fused fwd+bwd input projection: one MXU matmul per (b, l) block ----
    x2 = x_ref[...].reshape(S * Bt, E)
    g2 = jnp.dot(x2, wih_ref[...], preferred_element_type=jnp.float32)  # (S*Bt, 8H)
    xgf_s[...] = g2[:, :H4] + bias_ref[:, :H4]
    xgb_s[...] = g2[:, H4:] + bias_ref[:, H4:]

    @pl.when(link == 0)
    def _():
        z = jnp.zeros_like(h_f_s)
        h_f_s[...] = z
        c_f_s[...] = z
        h_b_s[...] = z
        c_b_s[...] = z

    h_f0 = h_f_s[...]
    c_f0 = c_f_s[...]
    h_b0 = h_b_s[...]
    c_b0 = c_b_s[...]
    whh_f = whh_f_ref[...]          # bf16 recurrent weights (MXU-native)
    whh_b = whh_b_ref[...]

    # Masks computed in-register from the per-block lengths.
    len_v = lens_ref[...]           # (Bt, 1) int32
    clamped = jnp.maximum(len_v, 1)

    def cell(gates, c):
        i_g = jax.nn.sigmoid(gates[:, 0:H])
        f_g = jax.nn.sigmoid(gates[:, H:2 * H])
        g_g = jnp.tanh(gates[:, 2 * H:3 * H])
        o_g = jax.nn.sigmoid(gates[:, 3 * H:4 * H])
        c_new = f_g * c + i_g * g_g
        return o_g * jnp.tanh(c_new), c_new

    # Interleaved forward (t) / backward (S-1-t) chains: two independent
    # dependence chains per iteration.  No unroll (per review).
    # Packed-sequence semantics: state only advances while t < clamped_len.
    def body(t, carry):
        h_f, c_f, h_b, c_b = carry
        tb = S - 1 - t
        m_f = t < clamped                       # (Bt, 1) bool
        m_b = tb < clamped
        rf = pl.multiple_of(t * Bt, Bt)
        rb = pl.multiple_of(tb * Bt, Bt)
        g_f = xgf_s[pl.ds(rf, Bt), :] + jnp.dot(
            h_f.astype(jnp.bfloat16), whh_f, preferred_element_type=jnp.float32)
        g_b = xgb_s[pl.ds(rb, Bt), :] + jnp.dot(
            h_b.astype(jnp.bfloat16), whh_b, preferred_element_type=jnp.float32)
        hf_n, cf_n = cell(g_f, c_f)
        hb_n, cb_n = cell(g_b, c_b)
        out_s[t, :, 0:H] = jnp.where(m_f, hf_n, 0.0)
        out_s[tb, :, H:2 * H] = jnp.where(m_b, hb_n, 0.0)
        return (jnp.where(m_f, hf_n, h_f),
                jnp.where(m_f, cf_n, c_f),
                jnp.where(m_b, hb_n, h_b),
                jnp.where(m_b, cb_n, c_b))

    h_f, c_f, h_b, c_b = lax.fori_loop(0, S, body, (h_f0, c_f0, h_b0, c_b0))

    @pl.when(link == 0)
    def _():
        # Link 0: carry the real (h, c) of each direction (matches nn.LSTM).
        h_f_s[...] = h_f
        c_f_s[...] = c_f
        h_b_s[...] = h_b
        c_b_s[...] = c_b

    @pl.when(link > 0)
    def _():
        # Mirrors the original module's carry (including its h->c mixing).
        real = len_v > 0                         # (Bt, 1) bool
        hf_m = jnp.where(real, h_f, h_f0)
        hb_m = jnp.where(real, h_b, h_b0)
        h_f_s[...] = hf_m
        c_f_s[...] = jnp.where(real, hf_m, h_f0)
        h_b_s[...] = hb_m
        c_b_s[...] = jnp.where(real, hb_m, h_b0)

    # Fused (Bt, S, 2H) output block: static relayout of the (S, Bt, 2H)
    # scratch (no dynamic-sublane stores, no wrapper transpose).
    # TODO(synk): fold these stores into the recurrence loop once dynamic
    # second-minor-dim stores are verified to lower on all target chips.
    for s in range(S):
        out_ref[:, s, :] = out_s[s].astype(out_ref.dtype)


def run_lstm(x, lens, wih, bias, whh_f, whh_b, Bt):
    # x: (L,S,Bp,E) f32   lens: (L,Bp,1) i32   wih: (E,8H) f32   bias: (1,8H)
    # whh_*: (H,4H) bf16  ->  out: (Bp, L, S, 2H) bf16
    L, S, Bp, E = x.shape
    H = whh_f.shape[0]
    nb = Bp // Bt
    in_specs = [
        pl.BlockSpec((None, S, Bt, E), lambda b, l: (l, 0, b, 0)),
        pl.BlockSpec((None, Bt, 1), lambda b, l: (l, b, 0)),
        pl.BlockSpec((E, 8 * H), lambda b, l: (0, 0)),
        pl.BlockSpec((1, 8 * H), lambda b, l: (0, 0)),
        pl.BlockSpec((H, 4 * H), lambda b, l: (0, 0)),
        pl.BlockSpec((H, 4 * H), lambda b, l: (0, 0)),
    ]
    out_specs = pl.BlockSpec((Bt, None, S, 2 * H), lambda b, l: (b, l, 0, 0))
    out_shape = jax.ShapeDtypeStruct((Bp, L, S, 2 * H), jnp.bfloat16)
    f = pl.pallas_call(
        lstm_kernel,
        grid=(nb, L),
        in_specs=in_specs,
        out_specs=out_specs,
        out_shape=out_shape,
        scratch_shapes=[
            pltpu.VMEM((S * Bt, 4 * H), jnp.float32),   # fwd gate pre-activations
            pltpu.VMEM((S * Bt, 4 * H), jnp.float32),   # bwd gate pre-activations
            pltpu.VMEM((S, Bt, 2 * H), jnp.float32),    # fused per-block output
            pltpu.VMEM((Bt, H), jnp.float32),           # h_f carry
            pltpu.VMEM((Bt, H), jnp.float32),           # c_f carry
            pltpu.VMEM((Bt, H), jnp.float32),           # h_b carry
            pltpu.VMEM((Bt, H), jnp.float32),           # c_b carry
        ],
        compiler_params=pltpu.CompilerParams(
            dimension_semantics=("parallel", "arbitrary"),
            vmem_limit_bytes=48 * 1024 * 1024),
    )
    return f(x, lens, wih, bias, whh_f, whh_b)


# --------------------------------------------------------------------------
# Seg_Self_Att: global + windowed masked attention, gated fusion, LayerNorm.
# T (batch, link) pairs per grid step; Hs / Q / K / V arrive as bf16 streams.
# --------------------------------------------------------------------------
def att_kernel(hs_ref, q_ref, k_ref, v_ref, hwh_ref, segm_ref, simi_ref,
               wg_ref, wl_ref, bh_ref, gamma_ref, beta_ref, o_ref):
    Hs = hs_ref[...].astype(jnp.float32)           # (T, S, D)
    D = Hs.shape[-1]
    neg = jnp.float32(-1e10)
    inv_scale = jnp.float32(1.0 / (float(D) ** 0.5))

    q = q_ref[...]                                 # (T, S, D) bf16
    k = k_ref[...]
    v = v_ref[...]

    gp = jnp.einsum('tqd,tkd->tqk', q, k,
                    preferred_element_type=jnp.float32) * inv_scale
    gpg = jnp.where(segm_ref[...] > 0.0, gp, neg)  # segm (T,1,S) broadcasts over q

    # global softmax
    m_g = jnp.max(gpg, axis=-1, keepdims=True)
    e_g = jnp.exp(gpg - m_g)
    p_g = e_g * pl.reciprocal(jnp.sum(e_g, axis=-1, keepdims=True), approx=True)
    g_att = jnp.einsum('tqk,tkd->tqd', p_g.astype(v.dtype), v,
                       preferred_element_type=jnp.float32)

    # local (windowed) softmax -- same degenerate-row semantics as the module
    lp = jnp.where(simi_ref[...] > 0.0, gpg, neg)  # simi (1,S,S) broadcasts over t
    m_l = jnp.max(lp, axis=-1, keepdims=True)
    e_l = jnp.exp(lp - m_l)
    p_l = e_l * pl.reciprocal(jnp.sum(e_l, axis=-1, keepdims=True), approx=True)
    l_att = jnp.einsum('tqk,tkd->tqd', p_l.astype(v.dtype), v,
                       preferred_element_type=jnp.float32)

    # Gate via VPU multiply + row-sum (no N=1 MXU matmuls); Hs @ W_h was folded
    # into the fused projection and arrives as hwh.
    gate = jax.nn.sigmoid(
        hwh_ref[...] + bh_ref[...]
        + jnp.sum(g_att * wg_ref[...], axis=-1, keepdims=True)
        + jnp.sum(l_att * wl_ref[...], axis=-1, keepdims=True))   # (T, S, 1)

    x = gate * l_att + (1.0 - gate) * g_att + Hs
    mu = jnp.mean(x, axis=-1, keepdims=True)
    var = jnp.mean(jnp.square(x - mu), axis=-1, keepdims=True)
    y = (x - mu) * lax.rsqrt(var + 1e-6)
    o_ref[...] = (y * gamma_ref[...] + beta_ref[...]).astype(o_ref.dtype)


def run_att(Hs, q, k, v, hwh, segm, simi3, wg3, wl3, bh3, gamma3, beta3, T):
    Np, S, D = Hs.shape
    bcast = lambda i: (0, 0, 0)
    blk = lambda i: (i, 0, 0)
    f = pl.pallas_call(
        att_kernel,
        grid=(Np // T,),
        in_specs=[
            pl.BlockSpec((T, S, D), blk),      # Hs (bf16)
            pl.BlockSpec((T, S, D), blk),      # Q  (bf16)
            pl.BlockSpec((T, S, D), blk),      # K  (bf16)
            pl.BlockSpec((T, S, D), blk),      # V  (bf16)
            pl.BlockSpec((T, S, 1), blk),      # Hs @ W_h (f32)
            pl.BlockSpec((T, 1, S), blk),      # segment key mask
            pl.BlockSpec((1, S, S), bcast),    # window mask
            pl.BlockSpec((1, 1, D), bcast),    # W_g row
            pl.BlockSpec((1, 1, D), bcast),    # W_l row
            pl.BlockSpec((1, 1, 1), bcast),    # b_h
            pl.BlockSpec((1, 1, D), bcast),    # LN gamma
            pl.BlockSpec((1, 1, D), bcast),    # LN beta
        ],
        out_specs=pl.BlockSpec((T, S, D), blk),
        out_shape=jax.ShapeDtypeStruct((Np, S, D), jnp.float32),
        compiler_params=pltpu.CompilerParams(
            dimension_semantics=("parallel",),
            vmem_limit_bytes=32 * 1024 * 1024),
    )
    return f(Hs, q, k, v, hwh, segm, simi3, wg3, wl3, bh3, gamma3, beta3)


# --------------------------------------------------------------------------
# Segment_Encoder forward (glue in JAX, recurrence + attention in Pallas).
# --------------------------------------------------------------------------
def segment_encoder_forward(params, route, ext, seg, simi, B, L, S, H):
    ext_dim = ext.shape[-1]
    E = seg.shape[-1] + ext_dim
    D = 2 * H
    Bt = BT
    Bp = _ceil_to(B, Bt)
    T = PAIRS_PER_STEP

    expand_ext = jnp.broadcast_to(ext[:, None, :], (B, seg.shape[1], ext_dim))
    segment_input = jnp.concatenate([seg, expand_ext], axis=2).reshape(B, L, S, E)

    lens = route['link_seg_lens']                            # (B, L) int32

    # (L, S, B, E) layout, batch padded to the tile size.
    x = jnp.transpose(segment_input, (1, 2, 0, 3))           # (L, S, B, E)
    x = jnp.pad(x, ((0, 0), (0, 0), (0, Bp - B), (0, 0)))

    lens_arr = jnp.transpose(lens, (1, 0))[..., None]        # (L, B, 1) int32
    lens_arr = jnp.pad(lens_arr, ((0, 0), (0, Bp - B), (0, 0)))

    # Fused fwd+bwd LSTM input weights/bias (projection happens in-kernel).
    wih = jnp.concatenate([params['wih_f'], params['wih_b']], axis=1)   # (E, 8H)
    bias = jnp.concatenate([params['b_f'], params['b_b']], axis=1)      # (1, 8H)

    lstm_out = run_lstm(x, lens_arr, wih, bias,
                        params['whh_f'].astype(jnp.bfloat16),
                        params['whh_b'].astype(jnp.bfloat16), Bt)       # (Bp,L,S,2H) bf16

    # Attention over flattened (B, L) pairs, padded to a multiple of T.
    N = B * L
    Np = _ceil_to(N, T)
    Hs = lstm_out[:B].reshape(N, S, D)                                  # bf16
    Hs = jnp.pad(Hs, ((0, Np - N), (0, 0), (0, 0)))
    segm = route['road_segment_mask'].reshape(N, S).astype(jnp.float32)
    segm = jnp.pad(segm, ((0, Np - N), (0, 0)))[:, None, :]             # (Np,1,S)

    # Fused Q|K|V|W_h projection: one bf16 (Np*S, D) x (D, 3D+1) matmul.
    w_big = jnp.concatenate(
        [params['wq'], params['wk'], params['wv'], params['wh']],
        axis=1).astype(jnp.bfloat16)
    proj = jnp.dot(Hs.reshape(Np * S, D), w_big,
                   preferred_element_type=jnp.float32)                  # (Np*S,3D+1)
    q = proj[:, 0 * D:1 * D].reshape(Np, S, D).astype(jnp.bfloat16)
    k = proj[:, 1 * D:2 * D].reshape(Np, S, D).astype(jnp.bfloat16)
    v = proj[:, 2 * D:3 * D].reshape(Np, S, D).astype(jnp.bfloat16)
    hwh = proj[:, 3 * D:].reshape(Np, S, 1)

    att = run_att(
        Hs, q, k, v, hwh, segm, simi[None],
        params['wg'].T[None], params['wl'].T[None],
        params['bh'].reshape(1, 1, 1),
        params['gamma'][None], params['beta'][None], T)
    return att[:N].reshape(B, L, S, D)


# --------------------------------------------------------------------------
# Pure-JAX f32 reference (mirrors the PyTorch forward) for the parity check.
# --------------------------------------------------------------------------
def _cell_ref(x_t, h, c, wih, whh, b, H):
    g = x_t @ wih + h @ whh + b
    i = jax.nn.sigmoid(g[:, :H])
    f = jax.nn.sigmoid(g[:, H:2 * H])
    gg = jnp.tanh(g[:, 2 * H:3 * H])
    o = jax.nn.sigmoid(g[:, 3 * H:4 * H])
    c2 = f * c + i * gg
    return o * jnp.tanh(c2), c2


def segment_encoder_ref(p, route, ext, seg, simi, B, L, S, H):
    ext_dim = ext.shape[-1]
    E = seg.shape[-1] + ext_dim
    D = 2 * H
    x = jnp.concatenate(
        [seg, jnp.broadcast_to(ext[:, None, :], (B, seg.shape[1], ext_dim))],
        axis=2).reshape(B, L, S, E)
    lens = route['link_seg_lens']
    clamped = jnp.maximum(lens, 1)

    hf = jnp.zeros((B, H)); cf = jnp.zeros((B, H))
    hb = jnp.zeros((B, H)); cb = jnp.zeros((B, H))
    outs = []
    for i in range(L):
        xi = x[:, i]
        m = (jnp.arange(S)[None, :] < clamped[:, i:i + 1]).astype(jnp.float32)[..., None]
        hf_pre, cf_pre, hb_pre, cb_pre = hf, cf, hb, cb

        h, c = hf_pre, cf_pre
        out_f = []
        for t in range(S):
            h2, c2 = _cell_ref(xi[:, t], h, c, p['wih_f'], p['whh_f'], p['b_f'], H)
            out_f.append(jnp.where(m[:, t] > 0, h2, 0.0))
            h = jnp.where(m[:, t] > 0, h2, h); c = jnp.where(m[:, t] > 0, c2, c)
        hf_new, cf_new = h, c

        h, c = hb_pre, cb_pre
        out_b = [None] * S
        for t in range(S - 1, -1, -1):
            h2, c2 = _cell_ref(xi[:, t], h, c, p['wih_b'], p['whh_b'], p['b_b'], H)
            out_b[t] = jnp.where(m[:, t] > 0, h2, 0.0)
            h = jnp.where(m[:, t] > 0, h2, h); c = jnp.where(m[:, t] > 0, c2, c)
        hb_new, cb_new = h, c

        if i == 0:
            hf, cf, hb, cb = hf_new, cf_new, hb_new, cb_new
        else:
            r = (lens[:, i:i + 1] != 0).astype(jnp.float32)
            hf_m = r * hf_new + (1 - r) * hf_pre
            hb_m = r * hb_new + (1 - r) * hb_pre
            cf = r * hf_m + (1 - r) * hf_pre      # reproduces the module's h/c mixing
            cb = r * hb_m + (1 - r) * hb_pre
            hf, hb = hf_m, hb_m
        outs.append(jnp.concatenate([jnp.stack(out_f, axis=1),
                                     jnp.stack(out_b, axis=1)], axis=-1))
    Hs = jnp.stack(outs, axis=1)                                   # (B,L,S,2H)

    segm = route['road_segment_mask'].reshape(B, L, 1, S) > 0
    Q = Hs @ p['wq']; K = Hs @ p['wk']; V = Hs @ p['wv']
    GP = jnp.einsum('blqd,blkd->blqk', Q / (float(D) ** 0.5), K)
    GP = jnp.where(segm, GP, -1e10)
    G_att = jax.nn.softmax(GP, axis=-1) @ V
    LP = jnp.where(simi[None, None] > 0, GP, -1e10)
    L_att = jax.nn.softmax(LP, axis=-1) @ V
    gate = jax.nn.sigmoid(Hs @ p['wh'] + p['bh'][0, 0]
                          + G_att @ p['wg'] + L_att @ p['wl'])
    fusion = gate * L_att + (1 - gate) * G_att
    xf = fusion + Hs
    mu = jnp.mean(xf, axis=-1, keepdims=True)
    var = jnp.mean((xf - mu) ** 2, axis=-1, keepdims=True)
    y = (xf - mu) / jnp.sqrt(var + 1e-6)
    return y * p['gamma'][0] + p['beta'][0]


# --------------------------------------------------------------------------
# Deterministic synthetic parameters / masks.
# --------------------------------------------------------------------------
def init_params(key, E, H, D):
    ks = jax.random.split(key, 13)
    sc = 0.1
    return {
        'wih_f': jax.random.normal(ks[0], (E, 4 * H), jnp.float32) * sc,
        'whh_f': jax.random.normal(ks[1], (H, 4 * H), jnp.float32) * sc,
        'b_f':   jax.random.normal(ks[2], (1, 4 * H), jnp.float32) * sc,
        'wih_b': jax.random.normal(ks[3], (E, 4 * H), jnp.float32) * sc,
        'whh_b': jax.random.normal(ks[4], (H, 4 * H), jnp.float32) * sc,
        'b_b':   jax.random.normal(ks[5], (1, 4 * H), jnp.float32) * sc,
        'wq': jax.random.normal(ks[6], (D, D), jnp.float32) * sc,
        'wk': jax.random.normal(ks[7], (D, D), jnp.float32) * sc,
        'wv': jax.random.normal(ks[8], (D, D), jnp.float32) * sc,
        'wh': jax.random.normal(ks[9], (D, 1), jnp.float32) * sc,
        'bh': jax.random.normal(ks[10], (1, 1), jnp.float32) * sc,
        'wg': jax.random.normal(ks[11], (D, 1), jnp.float32) * sc,
        'wl': jax.random.normal(ks[12], (D, 1), jnp.float32) * sc,
        'gamma': jnp.ones((1, D), jnp.float32),
        'beta': jnp.zeros((1, D), jnp.float32),
    }


def build_feat_simi(S, win_size):
    half = math.floor(win_size / 2)
    idx = jnp.arange(S)
    return (jnp.abs(idx[:, None] - idx[None, :]) <= half).astype(jnp.float32)


if __name__ == "__main__":
    # Small shapes (real module: hidden=128, d_s=256, segment_num=50).
    B, L, S = 2, 3, 8          # batch, link_num, segment_num
    seg_dim, ext_dim = 6, 4
    E = seg_dim + ext_dim
    H = 32                     # LSTM hidden -> d_s = 2H = 64
    D = 2 * H
    win_size = 3

    key = jax.random.PRNGKey(0)
    k1, k2, k3, k4 = jax.random.split(key, 4)
    seg = jax.random.normal(k1, (B, L * S, seg_dim), jnp.float32)
    ext = jax.random.normal(k2, (B, ext_dim), jnp.float32)
    lens = jax.random.randint(k3, (B, L), 0, S + 1).astype(jnp.int32)
    road_segment_mask = (jnp.arange(S)[None, None, :] < lens[:, :, None]
                         ).reshape(B, L * S).astype(jnp.float32)
    route = {'link_seg_lens': lens, 'road_segment_mask': road_segment_mask}

    params = init_params(k4, E, H, D)
    feat_simi = build_feat_simi(S, win_size)

    out = segment_encoder_forward(params, route, ext, seg, feat_simi, B, L, S, H)
    out = jax.block_until_ready(out)

    ref = segment_encoder_ref(params, route, ext, seg, feat_simi, B, L, S, H)
    assert out.shape == (B, L, S, D)
    assert bool(jnp.all(jnp.isfinite(out))), "non-finite values in Pallas output"
    # Tolerance accounts for bf16 MXU operands in the recurrence, bf16 LSTM
    # output / Q / K / V streams and approx reciprocals vs the pure-f32
    # reference (outputs are O(1) post-LayerNorm).
    err = float(jnp.max(jnp.abs(out - ref)))
    assert err < 5e-2, f"Pallas output mismatch vs reference (max abs err {err:.3e})"

    print("KERNEL_OK")
</pallas_src>

<mosaic_0001>
module attributes {stable_mosaic.version = 11 : i64} {
  func.func @lstm_kernel(%arg0: i32, %arg1: i32, %arg2: memref<1x8x32x10xf32, #tpu.memory_space<vmem>>, %arg3: memref<1x32x1xi32, #tpu.memory_space<vmem>>, %arg4: memref<10x256xf32, #tpu.memory_space<vmem>>, %arg5: memref<1x256xf32, #tpu.memory_space<vmem>>, %arg6: memref<32x128xbf16, #tpu.memory_space<vmem>>, %arg7: memref<32x128xbf16, #tpu.memory_space<vmem>>, %arg8: memref<32x1x8x64xbf16, #tpu.memory_space<vmem>>, %arg9: memref<256x128xf32, #tpu.memory_space<vmem>>, %arg10: memref<256x128xf32, #tpu.memory_space<vmem>>, %arg11: memref<8x32x64xf32, #tpu.memory_space<vmem>>, %arg12: memref<32x32xf32, #tpu.memory_space<vmem>>, %arg13: memref<32x32xf32, #tpu.memory_space<vmem>>, %arg14: memref<32x32xf32, #tpu.memory_space<vmem>>, %arg15: memref<32x32xf32, #tpu.memory_space<vmem>>) attributes {dimension_semantics = [#tpu.dimension_semantics<parallel>, #tpu.dimension_semantics<arbitrary>], iteration_bounds = array<i64: 1, 3>, scalar_prefetch = 0 : i64, scratch_operands = 7 : i64, tpu.core_type = #tpu.core_type<tc>, window_params = [{transform_indices = @transform_0, window_bounds = array<i64: 1, 8, 32, 10>}, {transform_indices = @transform_1, window_bounds = array<i64: 1, 32, 1>}, {pipeline_mode = #tpu.pipeline_mode<synchronous>, transform_indices = @transform_2, window_bounds = array<i64: 10, 256>}, {pipeline_mode = #tpu.pipeline_mode<synchronous>, transform_indices = @transform_3, window_bounds = array<i64: 1, 256>}, {pipeline_mode = #tpu.pipeline_mode<synchronous>, transform_indices = @transform_4, window_bounds = array<i64: 32, 128>}, {pipeline_mode = #tpu.pipeline_mode<synchronous>, transform_indices = @transform_5, window_bounds = array<i64: 32, 128>}, {transform_indices = @transform_6, window_bounds = array<i64: 32, 1, 8, 64>}]} {
    %c0 = arith.constant 0 : index
    %c0_0 = arith.constant 0 : index
    %c0_1 = arith.constant 0 : index
    %c0_2 = arith.constant 0 : index
    %0 = vector.load %arg2[%c0, %c0_0, %c0_1, %c0_2] : memref<1x8x32x10xf32, #tpu.memory_space<vmem>>, vector<1x8x32x10xf32>
    %1 = vector.shape_cast %0 : vector<1x8x32x10xf32> to vector<8x32x10xf32>
    %2 = vector.shape_cast %1 : vector<8x32x10xf32> to vector<256x10xf32>
    %c0_3 = arith.constant 0 : index
    %c0_4 = arith.constant 0 : index
    %3 = vector.load %arg4[%c0_3, %c0_4] : memref<10x256xf32, #tpu.memory_space<vmem>>, vector<10x256xf32>
    %cst = arith.constant dense<0.000000e+00> : vector<256x256xf32>
    %4 = tpu.matmul %2, %3, %cst {dimension_numbers = #tpu.dot_dimension_numbers<[1], [0], [0], [1], [0, 0, 1, 1], [], []>} : vector<256x10xf32>, vector<10x256xf32>, vector<256x256xf32> -> vector<256x256xf32>
    %5 = vector.extract_strided_slice %4 {offsets = [0, 0], sizes = [256, 128], strides = [1, 1]} : vector<256x256xf32> to vector<256x128xf32>
    %c0_5 = arith.constant 0 : index
    %c0_6 = arith.constant 0 : index
    %6 = vector.load %arg5[%c0_5, %c0_6] : memref<1x256xf32, #tpu.memory_space<vmem>>, vector<1x128xf32>
    %7 = vector.broadcast %6 : vector<1x128xf32> to vector<256x128xf32>
    %8 = arith.addf %5, %7 : vector<256x128xf32>
    %c0_7 = arith.constant 0 : index
    %c0_8 = arith.constant 0 : index
    %9 = vector.load %arg9[%c0_7, %c0_8] : memref<256x128xf32, #tpu.memory_space<vmem>>, vector<256x128xf32>
    tpu.vector_store %arg9[%c0_7, %c0_8], %8 {strides = array<i32>} : memref<256x128xf32, #tpu.memory_space<vmem>>, vector<256x128xf32>,
    %10 = vector.extract_strided_slice %4 {offsets = [0, 128], sizes = [256, 128], strides = [1, 1]} : vector<256x256xf32> to vector<256x128xf32>
    %c0_9 = arith.constant 0 : index
    %c128 = arith.constant 128 : index
    %11 = vector.load %arg5[%c0_9, %c128] : memref<1x256xf32, #tpu.memory_space<vmem>>, vector<1x128xf32>
    %12 = vector.broadcast %11 : vector<1x128xf32> to vector<256x128xf32>
    %13 = arith.addf %10, %12 : vector<256x128xf32>
    %c0_10 = arith.constant 0 : index
    %c0_11 = arith.constant 0 : index
    %14 = vector.load %arg10[%c0_10, %c0_11] : memref<256x128xf32, #tpu.memory_space<vmem>>, vector<256x128xf32>
    tpu.vector_store %arg10[%c0_10, %c0_11], %13 {strides = array<i32>} : memref<256x128xf32, #tpu.memory_space<vmem>>, vector<256x128xf32>,
    %c0_i32 = arith.constant 0 : i32
    %15 = arith.cmpi eq, %arg1, %c0_i32 : i32
    %16 = arith.extui %15 : i1 to i32
    %c0_i32_12 = arith.constant 0 : i32
    %17 = arith.cmpi ne, %16, %c0_i32_12 : i32
    scf.if %17 {
      %cst_84 = arith.constant 0.000000e+00 : f32
      %84 = vector.broadcast %cst_84 : f32 to vector<32x32xf32>
      %c0_85 = arith.constant 0 : index
      %c0_86 = arith.constant 0 : index
      %85 = vector.load %arg12[%c0_85, %c0_86] : memref<32x32xf32, #tpu.memory_space<vmem>>, vector<32x32xf32>
      tpu.vector_store %arg12[%c0_85, %c0_86], %84 {strides = array<i32>} : memref<32x32xf32, #tpu.memory_space<vmem>>, vector<32x32xf32>,
      %c0_87 = arith.constant 0 : index
      %c0_88 = arith.constant 0 : index
      %86 = vector.load %arg13[%c0_87, %c0_88] : memref<32x32xf32, #tpu.memory_space<vmem>>, vector<32x32xf32>
      tpu.vector_store %arg13[%c0_87, %c0_88], %84 {strides = array<i32>} : memref<32x32xf32, #tpu.memory_space<vmem>>, vector<32x32xf32>,
      %c0_89 = arith.constant 0 : index
      %c0_90 = arith.constant 0 : index
      %87 = vector.load %arg14[%c0_89, %c0_90] : memref<32x32xf32, #tpu.memory_space<vmem>>, vector<32x32xf32>
      tpu.vector_store %arg14[%c0_89, %c0_90], %84 {strides = array<i32>} : memref<32x32xf32, #tpu.memory_space<vmem>>, vector<32x32xf32>,
      %c0_91 = arith.constant 0 : index
      %c0_92 = arith.constant 0 : index
      %88 = vector.load %arg15[%c0_91, %c0_92] : memref<32x32xf32, #tpu.memory_space<vmem>>, vector<32x32xf32>
      tpu.vector_store %arg15[%c0_91, %c0_92], %84 {strides = array<i32>} : memref<32x32xf32, #tpu.memory_space<vmem>>, vector<32x32xf32>,
    } else {
    }
    %c0_13 = arith.constant 0 : index
    %c0_14 = arith.constant 0 : index
    %18 = vector.load %arg12[%c0_13, %c0_14] : memref<32x32xf32, #tpu.memory_space<vmem>>, vector<32x32xf32>
    %c0_15 = arith.constant 0 : index
    %c0_16 = arith.constant 0 : index
    %19 = vector.load %arg13[%c0_15, %c0_16] : memref<32x32xf32, #tpu.memory_space<vmem>>, vector<32x32xf32>
    %c0_17 = arith.constant 0 : index
    %c0_18 = arith.constant 0 : index
    %20 = vector.load %arg14[%c0_17, %c0_18] : memref<32x32xf32, #tpu.memory_space<vmem>>, vector<32x32xf32>
    %c0_19 = arith.constant 0 : index
    %c0_20 = arith.constant 0 : index
    %21 = vector.load %arg15[%c0_19, %c0_20] : memref<32x32xf32, #tpu.memory_space<vmem>>, vector<32x32xf32>
    %c0_21 = arith.constant 0 : index
    %c0_22 = arith.constant 0 : index
    %22 = vector.load %arg6[%c0_21, %c0_22] : memref<32x128xbf16, #tpu.memory_space<vmem>>, vector<32x128xbf16>
    %c0_23 = arith.constant 0 : index
    %c0_24 = arith.constant 0 : index
    %23 = vector.load %arg7[%c0_23, %c0_24] : memref<32x128xbf16, #tpu.memory_space<vmem>>, vector<32x128xbf16>
    %c0_25 = arith.constant 0 : index
    %c0_26 = arith.constant 0 : index
    %c0_27 = arith.constant 0 : index
    %24 = vector.load %arg3[%c0_25, %c0_26, %c0_27] : memref<1x32x1xi32, #tpu.memory_space<vmem>>, vector<1x32x1xi32>
    %25 = vector.shape_cast %24 : vector<1x32x1xi32> to vector<32x1xi32>
    %c1_i32 = arith.constant 1 : i32
    %26 = vector.broadcast %c1_i32 : i32 to vector<32x1xi32>
    %27 = arith.maxsi %25, %26 : vector<32x1xi32>
    %c0_i32_28 = arith.constant 0 : i32
    %c8_i32 = arith.constant 8 : i32
    %28 = arith.addi %c0_i32_28, %c8_i32 : i32
    %c1_i32_29 = arith.constant 1 : i32
    %29:4 = scf.for %arg16 = %c0_i32_28 to %28 step %c1_i32_29 iter_args(%arg17 = %18, %arg18 = %19, %arg19 = %20, %arg20 = %21) -> (vector<32x32xf32>, vector<32x32xf32>, vector<32x32xf32>, vector<32x32xf32>)  : i32 {
      %c7_i32 = arith.constant 7 : i32
      %84 = arith.subi %c7_i32, %arg16 : i32
      %85 = vector.broadcast %arg16 : i32 to vector<32x1xi32>
      %86 = arith.cmpi slt, %85, %27 : vector<32x1xi32>
      %87 = vector.broadcast %84 : i32 to vector<32x1xi32>
      %88 = arith.cmpi slt, %87, %27 : vector<32x1xi32>
      %c32_i32 = arith.constant 32 : i32
      %89 = arith.muli %arg16, %c32_i32 : i32
      %90 = tpu.assume_multiple %89, 32 : i32
      %c32_i32_84 = arith.constant 32 : i32
      %91 = arith.muli %84, %c32_i32_84 : i32
      %92 = tpu.assume_multiple %91, 32 : i32
      %93 = arith.index_cast %90 : i32 to index
      %c0_85 = arith.constant 0 : index
      %94 = vector.load %arg9[%93, %c0_85] : memref<256x128xf32, #tpu.memory_space<vmem>>, vector<32x128xf32>
      %95 = arith.truncf %arg17 : vector<32x32xf32> to vector<32x32xbf16>
      %cst_86 = arith.constant dense<0.000000e+00> : vector<32x128xf32>
      %96 = tpu.matmul %95, %22, %cst_86 {dimension_numbers = #tpu.dot_dimension_numbers<[1], [0], [0], [1], [0, 0, 1, 1], [], []>} : vector<32x32xbf16>, vector<32x128xbf16>, vector<32x128xf32> -> vector<32x128xf32>
      %97 = arith.addf %94, %96 : vector<32x128xf32>
      %98 = arith.index_cast %92 : i32 to index
      %c0_87 = arith.constant 0 : index
      %99 = vector.load %arg10[%98, %c0_87] : memref<256x128xf32, #tpu.memory_space<vmem>>, vector<32x128xf32>
      %100 = arith.truncf %arg19 : vector<32x32xf32> to vector<32x32xbf16>
      %cst_88 = arith.constant dense<0.000000e+00> : vector<32x128xf32>
      %101 = tpu.matmul %100, %23, %cst_88 {dimension_numbers = #tpu.dot_dimension_numbers<[1], [0], [0], [1], [0, 0, 1, 1], [], []>} : vector<32x32xbf16>, vector<32x128xbf16>, vector<32x128xf32> -> vector<32x128xf32>
      %102 = arith.addf %99, %101 : vector<32x128xf32>
      %103 = vector.extract_strided_slice %97 {offsets = [0, 0], sizes = [32, 32], strides = [1, 1]} : vector<32x128xf32> to vector<32x32xf32>
      %104 = arith.negf %103 : vector<32x32xf32>
      %105 = math.exp %104 : vector<32x32xf32>
      %cst_89 = arith.constant 1.000000e+00 : f32
      %106 = vector.broadcast %cst_89 : f32 to vector<32x32xf32>
      %107 = arith.addf %106, %105 : vector<32x32xf32>
      %108 = arith.divf %106, %107 : vector<32x32xf32>
      %109 = vector.extract_strided_slice %97 {offsets = [0, 32], sizes = [32, 32], strides = [1, 1]} : vector<32x128xf32> to vector<32x32xf32>
      %110 = arith.negf %109 : vector<32x32xf32>
      %111 = math.exp %110 : vector<32x32xf32>
      %cst_90 = arith.constant 1.000000e+00 : f32
      %112 = vector.broadcast %cst_90 : f32 to vector<32x32xf32>
      %113 = arith.addf %112, %111 : vector<32x32xf32>
      %114 = arith.divf %112, %113 : vector<32x32xf32>
      %115 = vector.extract_strided_slice %97 {offsets = [0, 64], sizes = [32, 32], strides = [1, 1]} : vector<32x128xf32> to vector<32x32xf32>
      %116 = math.tanh %115 : vector<32x32xf32>
      %117 = vector.extract_strided_slice %97 {offsets = [0, 96], sizes = [32, 32], strides = [1, 1]} : vector<32x128xf32> to vector<32x32xf32>
      %118 = arith.negf %117 : vector<32x32xf32>
      %119 = math.exp %118 : vector<32x32xf32>
      %cst_91 = arith.constant 1.000000e+00 : f32
      %120 = vector.broadcast %cst_91 : f32 to vector<32x32xf32>
      %121 = arith.addf %120, %119 : vector<32x32xf32>
      %122 = arith.divf %120, %121 : vector<32x32xf32>
      %123 = arith.mulf %114, %arg18 : vector<32x32xf32>
      %124 = arith.mulf %108, %116 : vector<32x32xf32>
      %125 = arith.addf %123, %124 : vector<32x32xf32>
      %126 = math.tanh %125 : vector<32x32xf32>
      %127 = arith.mulf %122, %126 : vector<32x32xf32>
      %128 = vector.extract_strided_slice %102 {offsets = [0, 0], sizes = [32, 32], strides = [1, 1]} : vector<32x128xf32> to vector<32x32xf32>
      %129 = arith.negf %128 : vector<32x32xf32>
      %130 = math.exp %129 : vector<32x32xf32>
      %cst_92 = arith.constant 1.000000e+00 : f32
      %131 = vector.broadcast %cst_92 : f32 to vector<32x32xf32>
      %132 = arith.addf %131, %130 : vector<32x32xf32>
      %133 = arith.divf %131, %132 : vector<32x32xf32>
      %134 = vector.extract_strided_slice %102 {offsets = [0, 32], sizes = [32, 32], strides = [1, 1]} : vector<32x128xf32> to vector<32x32xf32>
      %135 = arith.negf %134 : vector<32x32xf32>
      %136 = math.exp %135 : vector<32x32xf32>
      %cst_93 = arith.constant 1.000000e+00 : f32
      %137 = vector.broadcast %cst_93 : f32 to vector<32x32xf32>
      %138 = arith.addf %137, %136 : vector<32x32xf32>
      %139 = arith.divf %137, %138 : vector<32x32xf32>
      %140 = vector.extract_strided_slice %102 {offsets = [0, 64], sizes = [32, 32], strides = [1, 1]} : vector<32x128xf32> to vector<32x32xf32>
      %141 = math.tanh %140 : vector<32x32xf32>
      %142 = vector.extract_strided_slice %102 {offsets = [0, 96], sizes = [32, 32], strides = [1, 1]} : vector<32x128xf32> to vector<32x32xf32>
      %143 = arith.negf %142 : vector<32x32xf32>
      %144 = math.exp %143 : vector<32x32xf32>
      %cst_94 = arith.constant 1.000000e+00 : f32
      %145 = vector.broadcast %cst_94 : f32 to vector<32x32xf32>
      %146 = arith.addf %145, %144 : vector<32x32xf32>
      %147 = arith.divf %145, %146 : vector<32x32xf32>
      %148 = arith.mulf %139, %arg20 : vector<32x32xf32>
      %149 = arith.mulf %133, %141 : vector<32x32xf32>
      %150 = arith.addf %148, %149 : vector<32x32xf32>
      %151 = math.tanh %150 : vector<32x32xf32>
      %152 = arith.mulf %147, %151 : vector<32x32xf32>
      %cst_95 = arith.constant 0.000000e+00 : f32
      %153 = vector.shape_cast %86 : vector<32x1xi1> to vector<32x1xi1>
      %154 = vector.broadcast %153 : vector<32x1xi1> to vector<32x32xi1>
      %155 = vector.broadcast %cst_95 : f32 to vector<32x32xf32>
      %156 = arith.select %154, %127, %155 : vector<32x32xi1>, vector<32x32xf32>
      %157 = arith.index_cast %arg16 : i32 to index
      %c0_96 = arith.constant 0 : index
      %c0_97 = arith.constant 0 : index
      %158 = vector.load %arg11[%157, %c0_96, %c0_97] : memref<8x32x64xf32, #tpu.memory_space<vmem>>, vector<1x32x32xf32>
      %159 = vector.shape_cast %158 : vector<1x32x32xf32> to vector<32x32xf32>
      %160 = vector.shape_cast %156 : vector<32x32xf32> to vector<1x32x32xf32>
      tpu.vector_store %arg11[%157, %c0_96, %c0_97], %160 {strides = array<i32>} : memref<8x32x64xf32, #tpu.memory_space<vmem>>, vector<1x32x32xf32>,
      %cst_98 = arith.constant 0.000000e+00 : f32
      %161 = vector.shape_cast %88 : vector<32x1xi1> to vector<32x1xi1>
      %162 = vector.broadcast %161 : vector<32x1xi1> to vector<32x32xi1>
      %163 = vector.broadcast %cst_98 : f32 to vector<32x32xf32>
      %164 = arith.select %162, %152, %163 : vector<32x32xi1>, vector<32x32xf32>
      %165 = arith.index_cast %84 : i32 to index
      %c0_99 = arith.constant 0 : index
      %c32 = arith.constant 32 : index
      %166 = vector.load %arg11[%165, %c0_99, %c32] : memref<8x32x64xf32, #tpu.memory_space<vmem>>, vector<1x32x32xf32>
      %167 = vector.shape_cast %166 : vector<1x32x32xf32> to vector<32x32xf32>
      %168 = vector.shape_cast %164 : vector<32x32xf32> to vector<1x32x32xf32>
      tpu.vector_store %arg11[%165, %c0_99, %c32], %168 {strides = array<i32>} : memref<8x32x64xf32, #tpu.memory_space<vmem>>, vector<1x32x32xf32>,
      %169 = vector.shape_cast %86 : vector<32x1xi1> to vector<32x1xi1>
      %170 = vector.broadcast %169 : vector<32x1xi1> to vector<32x32xi1>
      %171 = arith.select %170, %127, %arg17 : vector<32x32xi1>, vector<32x32xf32>
      %172 = vector.shape_cast %86 : vector<32x1xi1> to vector<32x1xi1>
      %173 = vector.broadcast %172 : vector<32x1xi1> to vector<32x32xi1>
      %174 = arith.select %173, %125, %arg18 : vector<32x32xi1>, vector<32x32xf32>
      %175 = vector.shape_cast %88 : vector<32x1xi1> to vector<32x1xi1>
      %176 = vector.broadcast %175 : vector<32x1xi1> to vector<32x32xi1>
      %177 = arith.select %176, %152, %arg19 : vector<32x32xi1>, vector<32x32xf32>
      %178 = vector.shape_cast %88 : vector<32x1xi1> to vector<32x1xi1>
      %179 = vector.broadcast %178 : vector<32x1xi1> to vector<32x32xi1>
      %180 = arith.select %179, %150, %arg20 : vector<32x32xi1>, vector<32x32xf32>
      scf.yield %171, %174, %177, %180 : vector<32x32xf32>, vector<32x32xf32>, vector<32x32xf32>, vector<32x32xf32>
    }
    %c8_i32_30 = arith.constant 8 : i32
    %c0_i32_31 = arith.constant 0 : i32
    %30 = arith.cmpi eq, %arg1, %c0_i32_31 : i32
    %31 = arith.extui %30 : i1 to i32
    %c0_i32_32 = arith.constant 0 : i32
    %32 = arith.cmpi ne, %31, %c0_i32_32 : i32
    scf.if %32 {
      %c0_84 = arith.constant 0 : index
      %c0_85 = arith.constant 0 : index
      %84 = vector.load %arg12[%c0_84, %c0_85] : memref<32x32xf32, #tpu.memory_space<vmem>>, vector<32x32xf32>
      tpu.vector_store %arg12[%c0_84, %c0_85], %29#0 {strides = array<i32>} : memref<32x32xf32, #tpu.memory_space<vmem>>, vector<32x32xf32>,
      %c0_86 = arith.constant 0 : index
      %c0_87 = arith.constant 0 : index
      %85 = vector.load %arg13[%c0_86, %c0_87] : memref<32x32xf32, #tpu.memory_space<vmem>>, vector<32x32xf32>
      tpu.vector_store %arg13[%c0_86, %c0_87], %29#1 {strides = array<i32>} : memref<32x32xf32, #tpu.memory_space<vmem>>, vector<32x32xf32>,
      %c0_88 = arith.constant 0 : index
      %c0_89 = arith.constant 0 : index
      %86 = vector.load %arg14[%c0_88, %c0_89] : memref<32x32xf32, #tpu.memory_space<vmem>>, vector<32x32xf32>
      tpu.vector_store %arg14[%c0_88, %c0_89], %29#2 {strides = array<i32>} : memref<32x32xf32, #tpu.memory_space<vmem>>, vector<32x32xf32>,
      %c0_90 = arith.constant 0 : index
      %c0_91 = arith.constant 0 : index
      %87 = vector.load %arg15[%c0_90, %c0_91] : memref<32x32xf32, #tpu.memory_space<vmem>>, vector<32x32xf32>
      tpu.vector_store %arg15[%c0_90, %c0_91], %29#3 {strides = array<i32>} : memref<32x32xf32, #tpu.memory_space<vmem>>, vector<32x32xf32>,
    } else {
    }
    %c0_i32_33 = arith.constant 0 : i32
    %33 = arith.cmpi sgt, %arg1, %c0_i32_33 : i32
    %34 = arith.extui %33 : i1 to i32
    %c0_i32_34 = arith.constant 0 : i32
    %35 = arith.cmpi ne, %34, %c0_i32_34 : i32
    scf.if %35 {
      %c0_i32_84 = arith.constant 0 : i32
      %84 = vector.broadcast %c0_i32_84 : i32 to vector<32x1xi32>
      %85 = arith.cmpi sgt, %25, %84 : vector<32x1xi32>
      %86 = vector.shape_cast %85 : vector<32x1xi1> to vector<32x1xi1>
      %87 = vector.broadcast %86 : vector<32x1xi1> to vector<32x32xi1>
      %88 = arith.select %87, %29#0, %18 : vector<32x32xi1>, vector<32x32xf32>
      %89 = vector.shape_cast %85 : vector<32x1xi1> to vector<32x1xi1>
      %90 = vector.broadcast %89 : vector<32x1xi1> to vector<32x32xi1>
      %91 = arith.select %90, %29#2, %20 : vector<32x32xi1>, vector<32x32xf32>
      %c0_85 = arith.constant 0 : index
      %c0_86 = arith.constant 0 : index
      %92 = vector.load %arg12[%c0_85, %c0_86] : memref<32x32xf32, #tpu.memory_space<vmem>>, vector<32x32xf32>
      tpu.vector_store %arg12[%c0_85, %c0_86], %88 {strides = array<i32>} : memref<32x32xf32, #tpu.memory_space<vmem>>, vector<32x32xf32>,
      %93 = vector.shape_cast %85 : vector<32x1xi1> to vector<32x1xi1>
      %94 = vector.broadcast %93 : vector<32x1xi1> to vector<32x32xi1>
      %95 = arith.select %94, %88, %18 : vector<32x32xi1>, vector<32x32xf32>
      %c0_87 = arith.constant 0 : index
      %c0_88 = arith.constant 0 : index
      %96 = vector.load %arg13[%c0_87, %c0_88] : memref<32x32xf32, #tpu.memory_space<vmem>>, vector<32x32xf32>
      tpu.vector_store %arg13[%c0_87, %c0_88], %95 {strides = array<i32>} : memref<32x32xf32, #tpu.memory_space<vmem>>, vector<32x32xf32>,
      %c0_89 = arith.constant 0 : index
      %c0_90 = arith.constant 0 : index
      %97 = vector.load %arg14[%c0_89, %c0_90] : memref<32x32xf32, #tpu.memory_space<vmem>>, vector<32x32xf32>
      tpu.vector_store %arg14[%c0_89, %c0_90], %91 {strides = array<i32>} : memref<32x32xf32, #tpu.memory_space<vmem>>, vector<32x32xf32>,
      %98 = vector.shape_cast %85 : vector<32x1xi1> to vector<32x1xi1>
      %99 = vector.broadcast %98 : vector<32x1xi1> to vector<32x32xi1>
      %100 = arith.select %99, %91, %20 : vector<32x32xi1>, vector<32x32xf32>
      %c0_91 = arith.constant 0 : index
      %c0_92 = arith.constant 0 : index
      %101 = vector.load %arg15[%c0_91, %c0_92] : memref<32x32xf32, #tpu.memory_space<vmem>>, vector<32x32xf32>
      tpu.vector_store %arg15[%c0_91, %c0_92], %100 {strides = array<i32>} : memref<32x32xf32, #tpu.memory_space<vmem>>, vector<32x32xf32>,
    } else {
    }
    %c0_35 = arith.constant 0 : index
    %c0_36 = arith.constant 0 : index
    %c0_37 = arith.constant 0 : index
    %36 = vector.load %arg11[%c0_35, %c0_36, %c0_37] : memref<8x32x64xf32, #tpu.memory_space<vmem>>, vector<1x32x64xf32>
    %37 = vector.shape_cast %36 : vector<1x32x64xf32> to vector<32x64xf32>
    %38 = arith.truncf %37 : vector<32x64xf32> to vector<32x64xbf16>
    %c0_38 = arith.constant 0 : index
    %c0_39 = arith.constant 0 : index
    %c0_40 = arith.constant 0 : index
    %c0_41 = arith.constant 0 : index
    %39 = vector.load %arg8[%c0_38, %c0_39, %c0_40, %c0_41] : memref<32x1x8x64xbf16, #tpu.memory_space<vmem>>, vector<32x1x1x64xbf16>
    %40 = vector.shape_cast %39 : vector<32x1x1x64xbf16> to vector<32x64xbf16>
    %41 = vector.shape_cast %38 : vector<32x64xbf16> to vector<32x1x1x64xbf16>
    tpu.vector_store %arg8[%c0_38, %c0_39, %c0_40, %c0_41], %41 {strides = array<i32>} : memref<32x1x8x64xbf16, #tpu.memory_space<vmem>>, vector<32x1x1x64xbf16>,
    %c1 = arith.constant 1 : index
    %c0_42 = arith.constant 0 : index
    %c0_43 = arith.constant 0 : index
    %42 = vector.load %arg11[%c1, %c0_42, %c0_43] : memref<8x32x64xf32, #tpu.memory_space<vmem>>, vector<1x32x64xf32>
    %43 = vector.shape_cast %42 : vector<1x32x64xf32> to vector<32x64xf32>
    %44 = arith.truncf %43 : vector<32x64xf32> to vector<32x64xbf16>
    %c0_44 = arith.constant 0 : index
    %c0_45 = arith.constant 0 : index
    %c1_46 = arith.constant 1 : index
    %c0_47 = arith.constant 0 : index
    %45 = vector.load %arg8[%c0_44, %c0_45, %c1_46, %c0_47] : memref<32x1x8x64xbf16, #tpu.memory_space<vmem>>, vector<32x1x1x64xbf16>
    %46 = vector.shape_cast %45 : vector<32x1x1x64xbf16> to vector<32x64xbf16>
    %47 = vector.shape_cast %44 : vector<32x64xbf16> to vector<32x1x1x64xbf16>
    tpu.vector_store %arg8[%c0_44, %c0_45, %c1_46, %c0_47], %47 {strides = array<i32>} : memref<32x1x8x64xbf16, #tpu.memory_space<vmem>>, vector<32x1x1x64xbf16>,
    %c2 = arith.constant 2 : index
    %c0_48 = arith.constant 0 : index
    %c0_49 = arith.constant 0 : index
    %48 = vector.load %arg11[%c2, %c0_48, %c0_49] : memref<8x32x64xf32, #tpu.memory_space<vmem>>, vector<1x32x64xf32>
    %49 = vector.shape_cast %48 : vector<1x32x64xf32> to vector<32x64xf32>
    %50 = arith.truncf %49 : vector<32x64xf32> to vector<32x64xbf16>
    %c0_50 = arith.constant 0 : index
    %c0_51 = arith.constant 0 : index
    %c2_52 = arith.constant 2 : index
    %c0_53 = arith.constant 0 : index
    %51 = vector.load %arg8[%c0_50, %c0_51, %c2_52, %c0_53] : memref<32x1x8x64xbf16, #tpu.memory_space<vmem>>, vector<32x1x1x64xbf16>
    %52 = vector.shape_cast %51 : vector<32x1x1x64xbf16> to vector<32x64xbf16>
    %53 = vector.shape_cast %50 : vector<32x64xbf16> to vector<32x1x1x64xbf16>
    tpu.vector_store %arg8[%c0_50, %c0_51, %c2_52, %c0_53], %53 {strides = array<i32>} : memref<32x1x8x64xbf16, #tpu.memory_space<vmem>>, vector<32x1x1x64xbf16>,
    %c3 = arith.constant 3 : index
    %c0_54 = arith.constant 0 : index
    %c0_55 = arith.constant 0 : index
    %54 = vector.load %arg11[%c3, %c0_54, %c0_55] : memref<8x32x64xf32, #tpu.memory_space<vmem>>, vector<1x32x64xf32>
    %55 = vector.shape_cast %54 : vector<1x32x64xf32> to vector<32x64xf32>
    %56 = arith.truncf %55 : vector<32x64xf32> to vector<32x64xbf16>
    %c0_56 = arith.constant 0 : index
    %c0_57 = arith.constant 0 : index
    %c3_58 = arith.constant 3 : index
    %c0_59 = arith.constant 0 : index
    %57 = vector.load %arg8[%c0_56, %c0_57, %c3_58, %c0_59] : memref<32x1x8x64xbf16, #tpu.memory_space<vmem>>, vector<32x1x1x64xbf16>
    %58 = vector.shape_cast %57 : vector<32x1x1x64xbf16> to vector<32x64xbf16>
    %59 = vector.shape_cast %56 : vector<32x64xbf16> to vector<32x1x1x64xbf16>
    tpu.vector_store %arg8[%c0_56, %c0_57, %c3_58, %c0_59], %59 {strides = array<i32>} : memref<32x1x8x64xbf16, #tpu.memory_space<vmem>>, vector<32x1x1x64xbf16>,
    %c4 = arith.constant 4 : index
    %c0_60 = arith.constant 0 : index
    %c0_61 = arith.constant 0 : index
    %60 = vector.load %arg11[%c4, %c0_60, %c0_61] : memref<8x32x64xf32, #tpu.memory_space<vmem>>, vector<1x32x64xf32>
    %61 = vector.shape_cast %60 : vector<1x32x64xf32> to vector<32x64xf32>
    %62 = arith.truncf %61 : vector<32x64xf32> to vector<32x64xbf16>
    %c0_62 = arith.constant 0 : index
    %c0_63 = arith.constant 0 : index
    %c4_64 = arith.constant 4 : index
    %c0_65 = arith.constant 0 : index
    %63 = vector.load %arg8[%c0_62, %c0_63, %c4_64, %c0_65] : memref<32x1x8x64xbf16, #tpu.memory_space<vmem>>, vector<32x1x1x64xbf16>
    %64 = vector.shape_cast %63 : vector<32x1x1x64xbf16> to vector<32x64xbf16>
    %65 = vector.shape_cast %62 : vector<32x64xbf16> to vector<32x1x1x64xbf16>
    tpu.vector_store %arg8[%c0_62, %c0_63, %c4_64, %c0_65], %65 {strides = array<i32>} : memref<32x1x8x64xbf16, #tpu.memory_space<vmem>>, vector<32x1x1x64xbf16>,
    %c5 = arith.constant 5 : index
    %c0_66 = arith.constant 0 : index
    %c0_67 = arith.constant 0 : index
    %66 = vector.load %arg11[%c5, %c0_66, %c0_67] : memref<8x32x64xf32, #tpu.memory_space<vmem>>, vector<1x32x64xf32>
    %67 = vector.shape_cast %66 : vector<1x32x64xf32> to vector<32x64xf32>
    %68 = arith.truncf %67 : vector<32x64xf32> to vector<32x64xbf16>
    %c0_68 = arith.constant 0 : index
    %c0_69 = arith.constant 0 : index
    %c5_70 = arith.constant 5 : index
    %c0_71 = arith.constant 0 : index
    %69 = vector.load %arg8[%c0_68, %c0_69, %c5_70, %c0_71] : memref<32x1x8x64xbf16, #tpu.memory_space<vmem>>, vector<32x1x1x64xbf16>
    %70 = vector.shape_cast %69 : vector<32x1x1x64xbf16> to vector<32x64xbf16>
    %71 = vector.shape_cast %68 : vector<32x64xbf16> to vector<32x1x1x64xbf16>
    tpu.vector_store %arg8[%c0_68, %c0_69, %c5_70, %c0_71], %71 {strides = array<i32>} : memref<32x1x8x64xbf16, #tpu.memory_space<vmem>>, vector<32x1x1x64xbf16>,
    %c6 = arith.constant 6 : index
    %c0_72 = arith.constant 0 : index
    %c0_73 = arith.constant 0 : index
    %72 = vector.load %arg11[%c6, %c0_72, %c0_73] : memref<8x32x64xf32, #tpu.memory_space<vmem>>, vector<1x32x64xf32>
    %73 = vector.shape_cast %72 : vector<1x32x64xf32> to vector<32x64xf32>
    %74 = arith.truncf %73 : vector<32x64xf32> to vector<32x64xbf16>
    %c0_74 = arith.constant 0 : index
    %c0_75 = arith.constant 0 : index
    %c6_76 = arith.constant 6 : index
    %c0_77 = arith.constant 0 : index
    %75 = vector.load %arg8[%c0_74, %c0_75, %c6_76, %c0_77] : memref<32x1x8x64xbf16, #tpu.memory_space<vmem>>, vector<32x1x1x64xbf16>
    %76 = vector.shape_cast %75 : vector<32x1x1x64xbf16> to vector<32x64xbf16>
    %77 = vector.shape_cast %74 : vector<32x64xbf16> to vector<32x1x1x64xbf16>
    tpu.vector_store %arg8[%c0_74, %c0_75, %c6_76, %c0_77], %77 {strides = array<i32>} : memref<32x1x8x64xbf16, #tpu.memory_space<vmem>>, vector<32x1x1x64xbf16>,
    %c7 = arith.constant 7 : index
    %c0_78 = arith.constant 0 : index
    %c0_79 = arith.constant 0 : index
    %78 = vector.load %arg11[%c7, %c0_78, %c0_79] : memref<8x32x64xf32, #tpu.memory_space<vmem>>, vector<1x32x64xf32>
    %79 = vector.shape_cast %78 : vector<1x32x64xf32> to vector<32x64xf32>
    %80 = arith.truncf %79 : vector<32x64xf32> to vector<32x64xbf16>
    %c0_80 = arith.constant 0 : index
    %c0_81 = arith.constant 0 : index
    %c7_82 = arith.constant 7 : index
    %c0_83 = arith.constant 0 : index
    %81 = vector.load %arg8[%c0_80, %c0_81, %c7_82, %c0_83] : memref<32x1x8x64xbf16, #tpu.memory_space<vmem>>, vector<32x1x1x64xbf16>
    %82 = vector.shape_cast %81 : vector<32x1x1x64xbf16> to vector<32x64xbf16>
    %83 = vector.shape_cast %80 : vector<32x64xbf16> to vector<32x1x1x64xbf16>
    tpu.vector_store %arg8[%c0_80, %c0_81, %c7_82, %c0_83], %83 {strides = array<i32>} : memref<32x1x8x64xbf16, #tpu.memory_space<vmem>>, vector<32x1x1x64xbf16>,
    return
  }
  func.func @transform_0(%arg0: i32, %arg1: i32) -> (i32, i32, i32, i32) {
    %c0_i32 = arith.constant 0 : i32
    %c0_i32_0 = arith.constant 0 : i32
    %c0_i32_1 = arith.constant 0 : i32
    return %arg1, %c0_i32, %arg0, %c0_i32_0 : i32, i32, i32, i32
  }
  func.func @transform_1(%arg0: i32, %arg1: i32) -> (i32, i32, i32) {
    %c0_i32 = arith.constant 0 : i32
    %c0_i32_0 = arith.constant 0 : i32
    return %arg1, %arg0, %c0_i32 : i32, i32, i32
  }
  func.func @transform_2(%arg0: i32, %arg1: i32) -> (i32, i32) {
    %c0_i32 = arith.constant 0 : i32
    %c0_i32_0 = arith.constant 0 : i32
    %c0_i32_1 = arith.constant 0 : i32
    return %c0_i32, %c0_i32_0 : i32, i32
  }
  func.func @transform_3(%arg0: i32, %arg1: i32) -> (i32, i32) {
    %c0_i32 = arith.constant 0 : i32
    %c0_i32_0 = arith.constant 0 : i32
    %c0_i32_1 = arith.constant 0 : i32
    return %c0_i32, %c0_i32_0 : i32, i32
  }
  func.func @transform_4(%arg0: i32, %arg1: i32) -> (i32, i32) {
    %c0_i32 = arith.constant 0 : i32
    %c0_i32_0 = arith.constant 0 : i32
    %c0_i32_1 = arith.constant 0 : i32
    return %c0_i32, %c0_i32_0 : i32, i32
  }
  func.func @transform_5(%arg0: i32, %arg1: i32) -> (i32, i32) {
    %c0_i32 = arith.constant 0 : i32
    %c0_i32_0 = arith.constant 0 : i32
    %c0_i32_1 = arith.constant 0 : i32
    return %c0_i32, %c0_i32_0 : i32, i32
  }
  func.func @transform_6(%arg0: i32, %arg1: i32) -> (i32, i32, i32, i32) {
    %c0_i32 = arith.constant 0 : i32
    %c0_i32_0 = arith.constant 0 : i32
    %c0_i32_1 = arith.constant 0 : i32
    return %arg0, %arg1, %c0_i32, %c0_i32_0 : i32, i32, i32, i32
  }
}

</mosaic_0001>

<bundles_post_ra>
// kernel: tpu_custom_call.1
= control target key start
LH: loop header
LB: loop body
LE: loop exit
PB: predicated region body
PF: predicated region fallthrough
CT: control target
= control target key end

     0   :  { %11 = vsyncpa [#allocation10], 0  ;;  %s9308_s0 = inlined_call_operand.vmem [shape: f32[3,8,32,10], index: 0, kind: input, shape index: {}]   ;;  %s9309_s1 = inlined_call_operand.vmem [shape: s32[3,32,1], index: 1, kind: input, shape index: {}]   ;;  %s9310_s2 = inlined_call_operand.vmem [shape: f32[10,256], index: 2, kind: input, shape index: {}]   ;;  %s9311_s3 = inlined_call_operand.vmem [shape: f32[1,256], index: 3, kind: input, shape index: {}]   ;;  %s9312_s4 = inlined_call_operand.vmem [shape: bf16[32,128], index: 4, kind: input, shape index: {}]   ;;  %s9313_s5 = inlined_call_operand.vmem [shape: bf16[32,128], index: 5, kind: input, shape index: {}]   ;;  %s9314_s6 = inlined_call_operand.hbm [shape: bf16[32,3,8,64], index: 6, kind: output, shape index: {}]  }
   0x1   :  { %13 = vsyncpa [#allocation10 + $0x1], 0  ;;  %s6768_s21 = smov 0   ;;  %s6770_s22 = smov 0  }
   0x2   :  { %s6772_s23 = smov 0   ;;  %s6774_s24 = smov 0  }
   0x3   :  { %s6776_s25 = smov 0   ;;  %s6778_s26 = smov 0  }
   0x4 LB: > { %s5982_s27 = sadd.s32 4294967295, %s6649_s26   ;;  %s5983_s28 = sadd.s32 4294967294, %s6649_s26   ;;  %s6649_s26 = sphi %s6778_s26, %s19_s26   ;;  %s6645_s25 = sphi %s6776_s25, %s9374_s25   ;;  %s6641_s24 = sphi %s6774_s24, %s9373_s24   ;;  %s6637_s23 = sphi %s6772_s23, %s9372_s23   ;;  %s6633_s22 = sphi %s6770_s22, %s9371_s22   ;;  %s6629_s21 = sphi %s6768_s21, %s9370_s21  }
   0x5   : > { %s28_s29 = sadd.s32 1, %s6645_s25  ;;  %s180_s30 = sadd.s32 1, %s6637_s23 }
   0x6   : > { %p29_p0 = scmp.ge.s32.totalorder %s28_s29, 3  ;;  %p190_p1 = scmp.ne.s32.totalorder %s6637_s23, %s6633_s22 }
   0x7   : > { %p191_p2 = scmp.eq.s32.totalorder %s5982_s27, 2  ;;  %p196_p3 = scmp.ne.s32.totalorder %s6633_s22, %s6629_s21 }
   0x8   : > { %s9376_s29 = smov (%p29_p0, %s28_s29), 0  ;;  %p197_p5 = scmp.eq.s32.totalorder %s5983_s28, 2 }
   0x9   : > { %p6808_p4 = por %p191_p2, %p190_p1  ;;  %s176_s8 = ssub.s32 %s6645_s25, %s9376_s29 }
   0xa   : > { %p5986_p6 = scmp.ge.s32.totalorder %s6649_s26, 1  ;;  %p178_p7 = scmp.eq.s32.totalorder %s176_s8, 0 }
   0xb   : > { %p6815_p8 = por %p197_p5, %p196_p3  ;;  %p253_p9 = scmp.lt.s32.totalorder %s6649_s26, 4 }
   0xc   : > { %s6821_s10 = scalar_select %p178_p7, %s6637_s23, %s180_s30  }
   0xd   : > { %p254_p10 = pnand %p5986_p6, %p253_p9 }
   0xe   : > { %s293_s11 = sand.u32 (!%p254_p10), 1, %s6633_s22   ;;  %v351_v0 = vld [vmem:[%s9310_s2 + $0x8] sm:$0xff] (!%p254_p10)  ;;  %v353_v1 = vld [vmem:[%s9310_s2 + $0x18] sm:$0x3] (!%p254_p10)  ;;  %vm451_vm0 = vcmask (!%p254_p10), 1041408   ;;  %vm6719_vm1 = vmmov (!%p254_p10), 1  }
   0xf   : > { %257 = sbr.rel (%p254_p10) target bundleno = 1541 (0x605), region = 44  ;;  %s6832_s16 = sshll.u32 (!%p254_p10), %s293_s11, 7  ;;  %v6223_v2 = vpack.c.bf16 (!%p254_p10), %v353_v1, %v351_v0  ;;  %vm6224_vm2 = vmpackc.low (!%p254_p10), %vm451_vm0, %vm6719_vm1  ;;  %v350_v3 = vld [vmem:[%s9310_s2] sm:$0xff] (!%p254_p10)  ;;  %v352_v4 = vld [vmem:[%s9310_s2 + $0x10] sm:$0x3] (!%p254_p10)  ;;  %v6720_v6 = vmov (!%p254_p10), 0.0  }
  0x10   : > { %p297_p11 = scmp.lt.s32.totalorder (!%p254_p10), %s6641_s24, 2  ;;  %v6226_v5 = vpack.c.bf16 (!%p254_p10), %v352_v4, %v350_v3  ;;  %522 = vmatprep.mubr.f32.mxu0 (!%p254_p10), %v6720_v6  ;;  %618 = vmatprep.mubr.f32.mxu1 (!%p254_p10), %v6720_v6  ;;  %vm354_vm3 = vcmask (!%p254_p10), 80896   ;;  %v6951_v39 = vld [vmem:[%s9311_s3] ss:$0 sm:$0xff] (!%p254_p10)  ;;  %v6956_v40 = vld [vmem:[%s9311_s3 + $0x1] ss:$0 sm:$0xff] (!%p254_p10) }
  0x11   : > { %6225 = vmatprep.subr.msk.bf16.mxu0 (!%p254_p10), %vm6224_vm2, %v6223_v2  ;;  %6229 = vmatprep.subr.msk.bf16.mxu1 (!%p254_p10), %vm6224_vm2, %v6223_v2  ;;  %p6028_p12 = scmp.ne.s32.totalorder (!%p254_p10), %s6641_s24, 0 }
  0x12   : > { %6228 = vmatpush1.bf16.msk.msra.mxu0 (!%p254_p10), %vm6224_vm2, %v6226_v5  ;;  %6230 = vmatpush1.bf16.msk.msra.mxu1 (!%p254_p10), %vm6224_vm2, %v6226_v5 }
  0x16   : > { %s298_s27 = scalar_select %p297_p11, %s6641_s24, 2 }
  0x17   : > { %vm861_vm4 = vcmask (!%p6028_p12), 261120  }
  0x18   : > { %s6197_s28 = sshll.u32 %s298_s27, 8  ;;  %s6198_s30 = sshll.u32 %s298_s27, 5 }
  0x19   : > { %s6847_s13 = scalar_lea.vmem %s9308_s0, %s6197_s28  ;;  %s6852_s17 = scalar_lea.vmem %s9309_s1, %s6198_s30 }
  0x1a   : > { %v318_v7 = vld [vmem:[%s6847_s13] sm:$0xff]  ;;  %v319_v9 = vld [vmem:[%s6847_s13 + $0x8] sm:$0xff]  ;;  %v320_v11 = vld [vmem:[%s6847_s13 + $0x10] sm:$0xff]  ;;  %s7023_s28 = scalar_lea.vmem [#allocation9], %s6832_s16 }
  0x1b   : > { %v334_v8 = vld [vmem:[%s6847_s13 + $0x80] sm:$0xff]  ;;  %5994 = vmatmul.mubr.msk.f32.vlgmr.msra.gmra.mrb[0].mxu0 %vm354_vm3, %v318_v7  ;;  %v335_v10 = vld [vmem:[%s6847_s13 + $0x88] sm:$0xff]  ;;  %v336_v12 = vld [vmem:[%s6847_s13 + $0x90] sm:$0xff] }
  0x1c   : > { %6010 = vmatmul.mubr.msk.f32.vlgmr.msra.gmra.mrb[0].mxu1 %vm354_vm3, %v334_v8  ;;  %528 = vmatprep.mubr.f32.mxu0 %v6720_v6  ;;  %v321_v13 = vld [vmem:[%s6847_s13 + $0x18] sm:$0xff]  ;;  %v322_v15 = vld [vmem:[%s6847_s13 + $0x20] sm:$0xff]  ;;  %v323_v17 = vld [vmem:[%s6847_s13 + $0x28] sm:$0xff] }
  0x1d   : > { %624 = vmatprep.mubr.f32.mxu1 %v6720_v6  ;;  %v337_v14 = vld [vmem:[%s6847_s13 + $0x98] sm:$0xff]  ;;  %v338_v16 = vld [vmem:[%s6847_s13 + $0xa0] sm:$0xff]  ;;  %v339_v18 = vld [vmem:[%s6847_s13 + $0xa8] sm:$0xff] }
  0x1e   : > { %v324_v19 = vld [vmem:[%s6847_s13 + $0x30] sm:$0xff]  ;;  %v325_v21 = vld [vmem:[%s6847_s13 + $0x38] sm:$0xff]  ;;  %v326_v23 = vld [vmem:[%s6847_s13 + $0x40] sm:$0xff] }
  0x1f   : > { %5995 = vmatmul.mubr.msk.f32.gmra.mrb[2].mxu0 %vm354_vm3, %v319_v9  ;;  %v340_v20 = vld [vmem:[%s6847_s13 + $0xb0] sm:$0xff]  ;;  %v341_v22 = vld [vmem:[%s6847_s13 + $0xb8] sm:$0xff]  ;;  %v342_v24 = vld [vmem:[%s6847_s13 + $0xc0] sm:$0xff] }
  0x20   : > { %6011 = vmatmul.mubr.msk.f32.gmra.mrb[2].mxu1 %vm354_vm3, %v335_v10  ;;  %534 = vmatprep.mubr.f32.mxu0 %v6720_v6  ;;  %v327_v25 = vld [vmem:[%s6847_s13 + $0x48] sm:$0xff]  ;;  %v328_v27 = vld [vmem:[%s6847_s13 + $0x50] sm:$0xff]  ;;  %v329_v29 = vld [vmem:[%s6847_s13 + $0x58] sm:$0xff] }
  0x21   : > { %630 = vmatprep.mubr.f32.mxu1 %v6720_v6  ;;  %v343_v26 = vld [vmem:[%s6847_s13 + $0xc8] sm:$0xff]  ;;  %v344_v28 = vld [vmem:[%s6847_s13 + $0xd0] sm:$0xff]  ;;  %v345_v30 = vld [vmem:[%s6847_s13 + $0xd8] sm:$0xff] }
  0x22   : > { %v330_v31 = vld [vmem:[%s6847_s13 + $0x60] sm:$0xff]  ;;  %v331_v33 = vld [vmem:[%s6847_s13 + $0x68] sm:$0xff]  ;;  %v332_v35 = vld [vmem:[%s6847_s13 + $0x70] sm:$0xff] }
  0x23   : > { %5996 = vmatmul.mubr.msk.f32.gmra.mrb[4].mxu0 %vm354_vm3, %v320_v11  ;;  %v346_v32 = vld [vmem:[%s6847_s13 + $0xe0] sm:$0xff]  ;;  %v347_v34 = vld [vmem:[%s6847_s13 + $0xe8] sm:$0xff]  ;;  %v348_v36 = vld [vmem:[%s6847_s13 + $0xf0] sm:$0xff] }
  0x24   : > { %6012 = vmatmul.mubr.msk.f32.gmra.mrb[4].mxu1 %vm354_vm3, %v336_v12  ;;  %540 = vmatprep.mubr.f32.mxu0 %v6720_v6  ;;  %v333_v37 = vld [vmem:[%s6847_s13 + $0x78] sm:$0xff] }
  0x25   : > { %636 = vmatprep.mubr.f32.mxu1 %v6720_v6  ;;  %v349_v38 = vld [vmem:[%s6847_s13 + $0xf8] sm:$0xff] }
  0x27   : > { %5997 = vmatmul.mubr.msk.f32.gmra.mrb[6].mxu0 %vm354_vm3, %v321_v13 }
  0x28   : > { %6013 = vmatmul.mubr.msk.f32.gmra.mrb[6].mxu1 %vm354_vm3, %v337_v14  ;;  %546 = vmatprep.mubr.f32.mxu0 %v6720_v6 }
  0x29   : > { %642 = vmatprep.mubr.f32.mxu1 %v6720_v6 }
  0x2b   : > { %5998 = vmatmul.mubr.msk.f32.gmra.mrb[8].mxu0 %vm354_vm3, %v322_v15 }
  0x2c   : > { %6014 = vmatmul.mubr.msk.f32.gmra.mrb[8].mxu1 %vm354_vm3, %v338_v16  ;;  %552 = vmatprep.mubr.f32.mxu0 %v6720_v6 }
  0x2d   : > { %648 = vmatprep.mubr.f32.mxu1 %v6720_v6 }
  0x2f   : > { %5999 = vmatmul.mubr.msk.f32.gmra.mrb[10].mxu0 %vm354_vm3, %v323_v17 }
  0x30   : > { %6015 = vmatmul.mubr.msk.f32.gmra.mrb[10].mxu1 %vm354_vm3, %v339_v18  ;;  %558 = vmatprep.mubr.f32.mxu0 %v6720_v6 }
  0x31   : > { %654 = vmatprep.mubr.f32.mxu1 %v6720_v6 }
  0x33   : > { %6000 = vmatmul.mubr.msk.f32.gmra.mrb[12].mxu0 %vm354_vm3, %v324_v19 }
  0x34   : > { %6016 = vmatmul.mubr.msk.f32.gmra.mrb[12].mxu1 %vm354_vm3, %v340_v20  ;;  %564 = vmatprep.mubr.f32.mxu0 %v6720_v6 }
  0x35   : > { %660 = vmatprep.mubr.f32.mxu1 %v6720_v6 }
  0x37   : > { %6001 = vmatmul.mubr.msk.f32.gmra.mrb[14].mxu0 %vm354_vm3, %v325_v21 }
  0x38   : > { %6017 = vmatmul.mubr.msk.f32.gmra.mrb[14].mxu1 %vm354_vm3, %v341_v22  ;;  %570 = vmatprep.mubr.f32.mxu0 %v6720_v6 }
  0x39   : > { %666 = vmatprep.mubr.f32.mxu1 %v6720_v6 }
  0x3b   : > { %6002 = vmatmul.mubr.msk.f32.gmra.mrb[16].mxu0 %vm354_vm3, %v326_v23 }
  0x3c   : > { %6018 = vmatmul.mubr.msk.f32.gmra.mrb[16].mxu1 %vm354_vm3, %v342_v24  ;;  %576 = vmatprep.mubr.f32.mxu0 %v6720_v6 }
  0x3d   : > { %672 = vmatprep.mubr.f32.mxu1 %v6720_v6 }
  0x3f   : > { %6003 = vmatmul.mubr.msk.f32.gmra.mrb[18].mxu0 %vm354_vm3, %v327_v25 }
  0x40   : > { %6019 = vmatmul.mubr.msk.f32.gmra.mrb[18].mxu1 %vm354_vm3, %v343_v26  ;;  %582 = vmatprep.mubr.f32.mxu0 %v6720_v6 }
  0x41   : > { %678 = vmatprep.mubr.f32.mxu1 %v6720_v6 }
  0x43   : > { %6004 = vmatmul.mubr.msk.f32.gmra.mrb[20].mxu0 %vm354_vm3, %v328_v27 }
  0x44   : > { %6020 = vmatmul.mubr.msk.f32.gmra.mrb[20].mxu1 %vm354_vm3, %v344_v28  ;;  %588 = vmatprep.mubr.f32.mxu0 %v6720_v6 }
  0x45   : > { %684 = vmatprep.mubr.f32.mxu1 %v6720_v6 }
  0x47   : > { %6005 = vmatmul.mubr.msk.f32.gmra.mrb[22].mxu0 %vm354_vm3, %v329_v29 }
  0x48   : > { %6021 = vmatmul.mubr.msk.f32.gmra.mrb[22].mxu1 %vm354_vm3, %v345_v30  ;;  %594 = vmatprep.mubr.f32.mxu0 %v6720_v6 }
  0x49   : > { %690 = vmatprep.mubr.f32.mxu1 %v6720_v6 }
  0x4b   : > { %6006 = vmatmul.mubr.msk.f32.gmra.mrb[24].mxu0 %vm354_vm3, %v330_v31 }
  0x4c   : > { %6022 = vmatmul.mubr.msk.f32.gmra.mrb[24].mxu1 %vm354_vm3, %v346_v32  ;;  %600 = vmatprep.mubr.f32.mxu0 %v6720_v6 }
  0x4d   : > { %696 = vmatprep.mubr.f32.mxu1 %v6720_v6 }
  0x4f   : > { %6007 = vmatmul.mubr.msk.f32.gmra.mrb[26].mxu0 %vm354_vm3, %v331_v33 }
  0x50   : > { %6023 = vmatmul.mubr.msk.f32.gmra.mrb[26].mxu1 %vm354_vm3, %v347_v34  ;;  %606 = vmatprep.mubr.f32.mxu0 %v6720_v6 }
  0x51   : > { %702 = vmatprep.mubr.f32.mxu1 %v6720_v6 }
  0x53   : > { %6008 = vmatmul.mubr.msk.f32.gmra.mrb[28].mxu0 %vm354_vm3, %v332_v35 }
  0x54   : > { %6024 = vmatmul.mubr.msk.f32.gmra.mrb[28].mxu1 %vm354_vm3, %v348_v36  ;;  %612 = vmatprep.mubr.f32.mxu0 %v6720_v6 }
  0x55   : > { %708 = vmatprep.mubr.f32.mxu1 %v6720_v6 }
  0x57   : > { %6009 = vmatmul.mubr.msk.f32.gmra.mrb[30].mxu0 %vm354_vm3, %v333_v37 }
  0x58   : > { %6025 = vmatmul.mubr.msk.f32.gmra.mrb[30].mxu1 %vm354_vm3, %v349_v38 }
  0xee   : > { %v524_v41 = vpop.f32.mrb[0].mxu0 }
  0xef   : > { %v620_v42 = vpop.f32.mrb[0].mxu1  ;;  %v722_v43 = vadd.f32 %v6951_v39, %v524_v41  ;;  %v526_v45 = vpop.f32.mrb[1].mxu0 }
  0xf0   : > { %v738_v44 = vadd.f32 %v6951_v39, %v620_v42  ;;  %v622_v46 = vpop.f32.mrb[1].mxu1  ;;  %v793_v47 = vadd.f32 %v6956_v40, %v526_v45 }
  0xf1   : > { %v809_v48 = vadd.f32 %v6956_v40, %v622_v46  ;;  %754 = vst [vmem:[#allocation2] sm:$0xff] %v722_v43 }
  0xf2   : > { %770 = vst [vmem:[#allocation2 + $0x80] sm:$0xff] %v738_v44  ;;  %825 = vst [vmem:[#allocation3] sm:$0xff] %v793_v47  ;;  %v530_v49 = vpop.f32.mrb[2].mxu0 }
  0xf3   : > { %841 = vst [vmem:[#allocation3 + $0x80] sm:$0xff] %v809_v48  ;;  %v626_v50 = vpop.f32.mrb[2].mxu1  ;;  %v723_v51 = vadd.f32 %v6951_v39, %v530_v49  ;;  %v532_v53 = vpop.f32.mrb[3].mxu0 }
  0xf4   : > { %v739_v52 = vadd.f32 %v6951_v39, %v626_v50  ;;  %v628_v54 = vpop.f32.mrb[3].mxu1  ;;  %v794_v55 = vadd.f32 %v6956_v40, %v532_v53 }
  0xf5   : > { %v810_v56 = vadd.f32 %v6956_v40, %v628_v54  ;;  %755 = vst [vmem:[#allocation2 + $0x8] sm:$0xff] %v723_v51 }
  0xf6   : > { %771 = vst [vmem:[#allocation2 + $0x88] sm:$0xff] %v739_v52  ;;  %826 = vst [vmem:[#allocation3 + $0x8] sm:$0xff] %v794_v55  ;;  %v536_v57 = vpop.f32.mrb[4].mxu0 }
  0xf7   : > { %842 = vst [vmem:[#allocation3 + $0x88] sm:$0xff] %v810_v56  ;;  %v632_v58 = vpop.f32.mrb[4].mxu1  ;;  %v724_v59 = vadd.f32 %v6951_v39, %v536_v57  ;;  %v538_v61 = vpop.f32.mrb[5].mxu0 }
  0xf8   : > { %v740_v60 = vadd.f32 %v6951_v39, %v632_v58  ;;  %v634_v62 = vpop.f32.mrb[5].mxu1  ;;  %v795_v63 = vadd.f32 %v6956_v40, %v538_v61 }
  0xf9   : > { %v811_v0 = vadd.f32 %v6956_v40, %v634_v62  ;;  %756 = vst [vmem:[#allocation2 + $0x10] sm:$0xff] %v724_v59 }
  0xfa   : > { %772 = vst [vmem:[#allocation2 + $0x90] sm:$0xff] %v740_v60  ;;  %827 = vst [vmem:[#allocation3 + $0x10] sm:$0xff] %v795_v63  ;;  %v542_v1 = vpop.f32.mrb[6].mxu0 }
  0xfb   : > { %843 = vst [vmem:[#allocation3 + $0x90] sm:$0xff] %v811_v0  ;;  %v638_v2 = vpop.f32.mrb[6].mxu1  ;;  %v725_v3 = vadd.f32 %v6951_v39, %v542_v1  ;;  %v544_v5 = vpop.f32.mrb[7].mxu0 }
  0xfc   : > { %v741_v4 = vadd.f32 %v6951_v39, %v638_v2  ;;  %v640_v6 = vpop.f32.mrb[7].mxu1  ;;  %v796_v7 = vadd.f32 %v6956_v40, %v544_v5 }
  0xfd   : > { %v812_v8 = vadd.f32 %v6956_v40, %v640_v6  ;;  %757 = vst [vmem:[#allocation2 + $0x18] sm:$0xff] %v725_v3 }
  0xfe   : > { %773 = vst [vmem:[#allocation2 + $0x98] sm:$0xff] %v741_v4  ;;  %828 = vst [vmem:[#allocation3 + $0x18] sm:$0xff] %v796_v7  ;;  %v548_v9 = vpop.f32.mrb[8].mxu0 }
  0xff   : > { %844 = vst [vmem:[#allocation3 + $0x98] sm:$0xff] %v812_v8  ;;  %v644_v10 = vpop.f32.mrb[8].mxu1  ;;  %v726_v11 = vadd.f32 %v6951_v39, %v548_v9  ;;  %v550_v13 = vpop.f32.mrb[9].mxu0 }
 0x100   : > { %v742_v12 = vadd.f32 %v6951_v39, %v644_v10  ;;  %v646_v14 = vpop.f32.mrb[9].mxu1  ;;  %v797_v15 = vadd.f32 %v6956_v40, %v550_v13 }
 0x101   : > { %v813_v16 = vadd.f32 %v6956_v40, %v646_v14  ;;  %758 = vst [vmem:[#allocation2 + $0x20] sm:$0xff] %v726_v11 }
 0x102   : > { %774 = vst [vmem:[#allocation2 + $0xa0] sm:$0xff] %v742_v12  ;;  %829 = vst [vmem:[#allocation3 + $0x20] sm:$0xff] %v797_v15  ;;  %v554_v17 = vpop.f32.mrb[10].mxu0 }
 0x103   : > { %845 = vst [vmem:[#allocation3 + $0xa0] sm:$0xff] %v813_v16  ;;  %v650_v18 = vpop.f32.mrb[10].mxu1  ;;  %v727_v19 = vadd.f32 %v6951_v39, %v554_v17  ;;  %v556_v21 = vpop.f32.mrb[11].mxu0 }
 0x104   : > { %v743_v20 = vadd.f32 %v6951_v39, %v650_v18  ;;  %v652_v22 = vpop.f32.mrb[11].mxu1  ;;  %v798_v23 = vadd.f32 %v6956_v40, %v556_v21 }
 0x105   : > { %v814_v24 = vadd.f32 %v6956_v40, %v652_v22  ;;  %759 = vst [vmem:[#allocation2 + $0x28] sm:$0xff] %v727_v19 }
 0x106   : > { %775 = vst [vmem:[#allocation2 + $0xa8] sm:$0xff] %v743_v20  ;;  %830 = vst [vmem:[#allocation3 + $0x28] sm:$0xff] %v798_v23  ;;  %v560_v25 = vpop.f32.mrb[12].mxu0 }
 0x107   : > { %846 = vst [vmem:[#allocation3 + $0xa8] sm:$0xff] %v814_v24  ;;  %v656_v26 = vpop.f32.mrb[12].mxu1  ;;  %v728_v27 = vadd.f32 %v6951_v39, %v560_v25  ;;  %v562_v29 = vpop.f32.mrb[13].mxu0 }
 0x108   : > { %v744_v28 = vadd.f32 %v6951_v39, %v656_v26  ;;  %v658_v30 = vpop.f32.mrb[13].mxu1  ;;  %v799_v31 = vadd.f32 %v6956_v40, %v562_v29 }
 0x109   : > { %v815_v32 = vadd.f32 %v6956_v40, %v658_v30  ;;  %760 = vst [vmem:[#allocation2 + $0x30] sm:$0xff] %v728_v27 }
 0x10a   : > { %776 = vst [vmem:[#allocation2 + $0xb0] sm:$0xff] %v744_v28  ;;  %831 = vst [vmem:[#allocation3 + $0x30] sm:$0xff] %v799_v31  ;;  %v566_v33 = vpop.f32.mrb[14].mxu0 }
 0x10b   : > { %847 = vst [vmem:[#allocation3 + $0xb0] sm:$0xff] %v815_v32  ;;  %v662_v34 = vpop.f32.mrb[14].mxu1  ;;  %v729_v35 = vadd.f32 %v6951_v39, %v566_v33  ;;  %v568_v37 = vpop.f32.mrb[15].mxu0 }
 0x10c   : > { %v745_v36 = vadd.f32 %v6951_v39, %v662_v34  ;;  %v664_v38 = vpop.f32.mrb[15].mxu1  ;;  %v800_v41 = vadd.f32 %v6956_v40, %v568_v37 }
 0x10d   : > { %v816_v42 = vadd.f32 %v6956_v40, %v664_v38  ;;  %761 = vst [vmem:[#allocation2 + $0x38] sm:$0xff] %v729_v35 }
 0x10e   : > { %777 = vst [vmem:[#allocation2 + $0xb8] sm:$0xff] %v745_v36  ;;  %832 = vst [vmem:[#allocation3 + $0x38] sm:$0xff] %v800_v41  ;;  %v572_v43 = vpop.f32.mrb[16].mxu0 }
 0x10f   : > { %848 = vst [vmem:[#allocation3 + $0xb8] sm:$0xff] %v816_v42  ;;  %v668_v44 = vpop.f32.mrb[16].mxu1  ;;  %v730_v45 = vadd.f32 %v6951_v39, %v572_v43  ;;  %v574_v47 = vpop.f32.mrb[17].mxu0 }
 0x110   : > { %v746_v46 = vadd.f32 %v6951_v39, %v668_v44  ;;  %v670_v48 = vpop.f32.mrb[17].mxu1  ;;  %v801_v49 = vadd.f32 %v6956_v40, %v574_v47 }
 0x111   : > { %v817_v50 = vadd.f32 %v6956_v40, %v670_v48  ;;  %762 = vst [vmem:[#allocation2 + $0x40] sm:$0xff] %v730_v45  ;;  %v6721_v45 = vmov (!%p6028_p12), 0.0  }
 0x112   : > { %778 = vst [vmem:[#allocation2 + $0xc0] sm:$0xff] %v746_v46  ;;  %833 = vst [vmem:[#allocation3 + $0x40] sm:$0xff] %v801_v49  ;;  %v578_v51 = vpop.f32.mrb[18].mxu0 }
 0x113   : > { %849 = vst [vmem:[#allocation3 + $0xc0] sm:$0xff] %v817_v50  ;;  %v674_v52 = vpop.f32.mrb[18].mxu1  ;;  %v731_v53 = vadd.f32 %v6951_v39, %v578_v51  ;;  %v580_v55 = vpop.f32.mrb[19].mxu0  ;;  %862 = vst.msk [vmem:[#allocation5] sm:$0xff] (!%p6028_p12), %vm861_vm4, %v6721_v45 }
 0x114   : > { %v747_v54 = vadd.f32 %v6951_v39, %v674_v52  ;;  %v676_v56 = vpop.f32.mrb[19].mxu1  ;;  %v802_v57 = vadd.f32 %v6956_v40, %v580_v55  ;;  %863 = vst.msk [vmem:[#allocation5 + $0x8] sm:$0xff] (!%p6028_p12), %vm861_vm4, %v6721_v45  ;;  %864 = vst.msk [vmem:[#allocation5 + $0x10] sm:$0xff] (!%p6028_p12), %vm861_vm4, %v6721_v45 }
 0x115   : > { %v818_v58 = vadd.f32 %v6956_v40, %v676_v56  ;;  %763 = vst [vmem:[#allocation2 + $0x48] sm:$0xff] %v731_v53  ;;  %865 = vst.msk [vmem:[#allocation5 + $0x18] sm:$0xff] (!%p6028_p12), %vm861_vm4, %v6721_v45 }
 0x116   : > { %779 = vst [vmem:[#allocation2 + $0xc8] sm:$0xff] %v747_v54  ;;  %834 = vst [vmem:[#allocation3 + $0x48] sm:$0xff] %v802_v57  ;;  %v584_v59 = vpop.f32.mrb[20].mxu0 }
 0x117   : > { %850 = vst [vmem:[#allocation3 + $0xc8] sm:$0xff] %v818_v58  ;;  %v680_v60 = vpop.f32.mrb[20].mxu1  ;;  %v732_v61 = vadd.f32 %v6951_v39, %v584_v59  ;;  %v586_v63 = vpop.f32.mrb[21].mxu0  ;;  %866 = vst.msk [vmem:[#allocation6] sm:$0xff] (!%p6028_p12), %vm861_vm4, %v6721_v45 }
 0x118   : > { %v748_v62 = vadd.f32 %v6951_v39, %v680_v60  ;;  %v682_v0 = vpop.f32.mrb[21].mxu1  ;;  %v803_v1 = vadd.f32 %v6956_v40, %v586_v63  ;;  %867 = vst.msk [vmem:[#allocation6 + $0x8] sm:$0xff] (!%p6028_p12), %vm861_vm4, %v6721_v45  ;;  %868 = vst.msk [vmem:[#allocation6 + $0x10] sm:$0xff] (!%p6028_p12), %vm861_vm4, %v6721_v45 }
 0x119   : > { %v819_v2 = vadd.f32 %v6956_v40, %v682_v0  ;;  %764 = vst [vmem:[#allocation2 + $0x50] sm:$0xff] %v732_v61  ;;  %869 = vst.msk [vmem:[#allocation6 + $0x18] sm:$0xff] (!%p6028_p12), %vm861_vm4, %v6721_v45 }
 0x11a   : > { %780 = vst [vmem:[#allocation2 + $0xd0] sm:$0xff] %v748_v62  ;;  %835 = vst [vmem:[#allocation3 + $0x50] sm:$0xff] %v803_v1  ;;  %v590_v3 = vpop.f32.mrb[22].mxu0 }
 0x11b   : > { %851 = vst [vmem:[#allocation3 + $0xd0] sm:$0xff] %v819_v2  ;;  %v686_v4 = vpop.f32.mrb[22].mxu1  ;;  %v733_v5 = vadd.f32 %v6951_v39, %v590_v3  ;;  %v592_v7 = vpop.f32.mrb[23].mxu0  ;;  %870 = vst.msk [vmem:[#allocation7] sm:$0xff] (!%p6028_p12), %vm861_vm4, %v6721_v45 }
 0x11c   : > { %v749_v6 = vadd.f32 %v6951_v39, %v686_v4  ;;  %v688_v8 = vpop.f32.mrb[23].mxu1  ;;  %v804_v9 = vadd.f32 %v6956_v40, %v592_v7  ;;  %871 = vst.msk [vmem:[#allocation7 + $0x8] sm:$0xff] (!%p6028_p12), %vm861_vm4, %v6721_v45  ;;  %872 = vst.msk [vmem:[#allocation7 + $0x10] sm:$0xff] (!%p6028_p12), %vm861_vm4, %v6721_v45 }
 0x11d   : > { %v820_v10 = vadd.f32 %v6956_v40, %v688_v8  ;;  %765 = vst [vmem:[#allocation2 + $0x58] sm:$0xff] %v733_v5  ;;  %873 = vst.msk [vmem:[#allocation7 + $0x18] sm:$0xff] (!%p6028_p12), %vm861_vm4, %v6721_v45 }
 0x11e   : > { %781 = vst [vmem:[#allocation2 + $0xd8] sm:$0xff] %v749_v6  ;;  %836 = vst [vmem:[#allocation3 + $0x58] sm:$0xff] %v804_v9  ;;  %v596_v11 = vpop.f32.mrb[24].mxu0 }
 0x11f   : > { %852 = vst [vmem:[#allocation3 + $0xd8] sm:$0xff] %v820_v10  ;;  %v692_v12 = vpop.f32.mrb[24].mxu1  ;;  %v734_v13 = vadd.f32 %v6951_v39, %v596_v11  ;;  %v598_v15 = vpop.f32.mrb[25].mxu0  ;;  %874 = vst.msk [vmem:[#allocation8] sm:$0xff] (!%p6028_p12), %vm861_vm4, %v6721_v45 }
 0x120   : > { %v750_v14 = vadd.f32 %v6951_v39, %v692_v12  ;;  %v694_v16 = vpop.f32.mrb[25].mxu1  ;;  %v805_v17 = vadd.f32 %v6956_v40, %v598_v15  ;;  %875 = vst.msk [vmem:[#allocation8 + $0x8] sm:$0xff] (!%p6028_p12), %vm861_vm4, %v6721_v45  ;;  %876 = vst.msk [vmem:[#allocation8 + $0x10] sm:$0xff] (!%p6028_p12), %vm861_vm4, %v6721_v45 }
 0x121   : > { %v821_v18 = vadd.f32 %v6956_v40, %v694_v16  ;;  %766 = vst [vmem:[#allocation2 + $0x60] sm:$0xff] %v734_v13  ;;  %877 = vst.msk [vmem:[#allocation8 + $0x18] sm:$0xff] (!%p6028_p12), %vm861_vm4, %v6721_v45 }
 0x122   : > { %782 = vst [vmem:[#allocation2 + $0xe0] sm:$0xff] %v750_v14  ;;  %837 = vst [vmem:[#allocation3 + $0x60] sm:$0xff] %v805_v17  ;;  %v602_v19 = vpop.f32.mrb[26].mxu0 }
 0x123   : > { %853 = vst [vmem:[#allocation3 + $0xe0] sm:$0xff] %v821_v18  ;;  %v698_v20 = vpop.f32.mrb[26].mxu1  ;;  %v735_v21 = vadd.f32 %v6951_v39, %v602_v19  ;;  %v604_v23 = vpop.f32.mrb[27].mxu0 }
 0x124   : > { %v751_v22 = vadd.f32 %v6951_v39, %v698_v20  ;;  %v700_v24 = vpop.f32.mrb[27].mxu1  ;;  %v806_v25 = vadd.f32 %v6956_v40, %v604_v23 }
 0x125   : > { %v822_v26 = vadd.f32 %v6956_v40, %v700_v24  ;;  %767 = vst [vmem:[#allocation2 + $0x68] sm:$0xff] %v735_v21 }
 0x126   : > { %783 = vst [vmem:[#allocation2 + $0xe8] sm:$0xff] %v751_v22  ;;  %838 = vst [vmem:[#allocation3 + $0x68] sm:$0xff] %v806_v25  ;;  %v608_v27 = vpop.f32.mrb[28].mxu0 }
 0x127   : > { %854 = vst [vmem:[#allocation3 + $0xe8] sm:$0xff] %v822_v26  ;;  %v704_v28 = vpop.f32.mrb[28].mxu1  ;;  %v736_v29 = vadd.f32 %v6951_v39, %v608_v27  ;;  %v610_v31 = vpop.f32.mrb[29].mxu0 }
 0x128   : > { %v752_v30 = vadd.f32 %v6951_v39, %v704_v28  ;;  %v706_v32 = vpop.f32.mrb[29].mxu1  ;;  %v807_v33 = vadd.f32 %v6956_v40, %v610_v31 }
 0x129   : > { %v823_v34 = vadd.f32 %v6956_v40, %v706_v32  ;;  %768 = vst [vmem:[#allocation2 + $0x70] sm:$0xff] %v736_v29  ;;  %860 = sbr.rel (%p6028_p12) target bundleno = 304 (0x130), region = 48 }
 0x12a   : > { %784 = vst [vmem:[#allocation2 + $0xf0] sm:$0xff] %v752_v30  ;;  %839 = vst [vmem:[#allocation3 + $0x70] sm:$0xff] %v807_v33  ;;  %v614_v35 = vpop.f32.mrb[30].mxu0 }
 0x12b   : > { %855 = vst [vmem:[#allocation3 + $0xf0] sm:$0xff] %v823_v34  ;;  %v710_v36 = vpop.f32.mrb[30].mxu1  ;;  %v737_v37 = vadd.f32 %v6951_v39, %v614_v35  ;;  %v616_v41 = vpop.f32.mrb[31].mxu0 }
 0x12c   : > { %v753_v38 = vadd.f32 %v6951_v39, %v710_v36  ;;  %v712_v42 = vpop.f32.mrb[31].mxu1  ;;  %v808_v43 = vadd.f32 %v6956_v40, %v616_v41 }
 0x12d   : > { %v824_v44 = vadd.f32 %v6956_v40, %v712_v42  ;;  %769 = vst [vmem:[#allocation2 + $0x78] sm:$0xff] %v737_v37 }
 0x12e   : > { %785 = vst [vmem:[#allocation2 + $0xf8] sm:$0xff] %v753_v38  ;;  %840 = vst [vmem:[#allocation3 + $0x78] sm:$0xff] %v808_v43 }
 0x12f   : > { %856 = vst [vmem:[#allocation3 + $0xf8] sm:$0xff] %v824_v44 }
 0x130 PF: > { %v7044_v39 = vld [vmem:[#allocation5] sm:$0xff]   ;;  %v7046_v40 = vld [vmem:[#allocation5 + $0x8] sm:$0xff]   ;;  %v7048_v46 = vld [vmem:[#allocation5 + $0x10] sm:$0xff]  }
 0x131   : > { %v7050_v47 = vld [vmem:[#allocation5 + $0x18] sm:$0xff]   ;;  %v882_v48 = vld [vmem:[#allocation6] sm:$0xff]   ;;  %v883_v49 = vld [vmem:[#allocation6 + $0x8] sm:$0xff]   ;;  %v9322_v17 = vmov %v7048_v46  ;;  %v9323_v18 = vmov %v7046_v40  ;;  %v9324_v19 = vmov %v7044_v39 }
 0x132   : > { %v884_v50 = vld [vmem:[#allocation6 + $0x10] sm:$0xff]   ;;  %v885_v51 = vld [vmem:[#allocation6 + $0x18] sm:$0xff]   ;;  %v7052_v52 = vld [vmem:[#allocation7] sm:$0xff]   ;;  %v9321_v16 = vmov %v7050_v47 }
 0x133   : > { %v7054_v53 = vld [vmem:[#allocation7 + $0x8] sm:$0xff]   ;;  %v7056_v54 = vld [vmem:[#allocation7 + $0x10] sm:$0xff]   ;;  %v7058_v55 = vld [vmem:[#allocation7 + $0x18] sm:$0xff]   ;;  %v9320_v15 = vmov %v7052_v52 }
 0x134   : > { %v890_v56 = vld [vmem:[#allocation8] sm:$0xff]   ;;  %v891_v57 = vld [vmem:[#allocation8 + $0x8] sm:$0xff]   ;;  %v892_v58 = vld [vmem:[#allocation8 + $0x10] sm:$0xff]   ;;  %v9317_v12 = vmov %v7058_v55  ;;  %v9318_v13 = vmov %v7056_v54  ;;  %v9319_v14 = vmov %v7054_v53 }
 0x135   : > { %v893_v59 = vld [vmem:[#allocation8 + $0x18] sm:$0xff]   ;;  %v7063_v60 = vld [vmem:[%s9312_s4] sm:$0xf]  ;;  %v7068_v61 = vld [vmem:[%s9312_s4 + $0x4] sm:$0xf] }
 0x136   : > { %v7073_v62 = vld [vmem:[%s9312_s4 + $0x8] sm:$0xf]  ;;  %v7078_v63 = vld [vmem:[%s9312_s4 + $0xc] sm:$0xf]  ;;  %v7083_v0 = vld [vmem:[%s9313_s5] sm:$0xf] }
 0x137   : > { %v7088_v1 = vld [vmem:[%s9313_s5 + $0x4] sm:$0xf]  ;;  %v7093_v2 = vld [vmem:[%s9313_s5 + $0x8] sm:$0xf]  ;;  %v7098_v3 = vld [vmem:[%s9313_s5 + $0xc] sm:$0xf] }
 0x138   : > { %v7101_v4 = vld [vmem:[%s6852_s17] sm:$0xff]  ;;  %v7104_v5 = vld [vmem:[%s6852_s17 + $0x8] sm:$0xff]  ;;  %v7107_v6 = vld [vmem:[%s6852_s17 + $0x10] sm:$0xff] }
 0x139   : > { %v7110_v7 = vld [vmem:[%s6852_s17 + $0x18] sm:$0xff]  ;;  %vm906_vm5 = vcmp.gt.s32.totalorder %v7101_v4, 1  ;;  %vm908_vm6 = vcmp.gt.s32.totalorder %v7104_v5, 1  ;;  %vm910_vm7 = vcmp.gt.s32.totalorder %v7107_v6, 1  ;;  %s7168_s17 = smov 0  }
 0x13a   : > { %v7116_v8 = vsel %vm906_vm5, %v7101_v4, 1  ;;  %v7119_v9 = vsel %vm908_vm6, %v7104_v5, 1  ;;  %v7122_v10 = vsel %vm910_vm7, %v7107_v6, 1  ;;  %vm912_vm8 = vcmp.gt.s32.totalorder %v7110_v7, 1 }
 0x13b   : > { %v7126_v11 = vsel %vm912_vm8, %v7110_v7, 1 }
 0x13c LB: >> { %v6031_v20 = vcombine.low %v7063_v60, %v7068_v61  ;;  %v6035_v21 = vcombine.low %v7083_v0, %v7088_v1  ;;  %v6032_v22 = vcombine.low %v7073_v62, %v7078_v63  ;;  %v6036_v23 = vcombine.low %v7093_v2, %v7098_v3  ;;  %s6029_s14 = sshll.u32 %s6717_s17, 5  ;;  %s936_s15 = ssub.s32 7, %s6717_s17  ;;  %s6717_s17 = sphi %s7168_s17, %s919_s17   ;;  %v6713_v19 = vphi %v9324_v19, %v9353_v19   ;;  %v6709_v18 = vphi %v9323_v18, %v9352_v18   ;;  %v6705_v17 = vphi %v9322_v17, %v9351_v17   ;;  %v6701_v16 = vphi %v9321_v16, %v9350_v16   ;;  %v6697_v48 = vphi %v882_v48, %v9349_v48   ;;  %v6693_v49 = vphi %v883_v49, %v9348_v49   ;;  %v6689_v50 = vphi %v884_v50, %v9347_v50   ;;  %v6685_v51 = vphi %v885_v51, %v9346_v51   ;;  %v6681_v15 = vphi %v9320_v15, %v9345_v15   ;;  %v6677_v14 = vphi %v9319_v14, %v9344_v14   ;;  %v6673_v13 = vphi %v9318_v13, %v9343_v13   ;;  %v6669_v12 = vphi %v9317_v12, %v9342_v12   ;;  %v6665_v56 = vphi %v890_v56, %v9341_v56   ;;  %v6661_v57 = vphi %v891_v57, %v9340_v57   ;;  %v6657_v58 = vphi %v892_v58, %v9339_v58   ;;  %v6653_v59 = vphi %v893_v59, %v9338_v59  }
 0x13d   : >> { %vm968_vm9 = vcmask 261120   ;;  %v954_v24 = vpack.c.bf16 %v6709_v18, %v6713_v19  ;;  %v1033_v25 = vpack.c.bf16 %v6677_v14, %v6681_v15  ;;  %v955_v26 = vpack.c.bf16 %v6701_v16, %v6705_v17  ;;  %s949_s18 = scalar_lea.vmem [#allocation2], %s6029_s14  ;;  %s7247_s19 = sshll.u32 %s936_s15, 5 }
 0x13e   : >> { %6207 = vmatprep.subr.bf16.mxu0 %v6031_v20  ;;  %6215 = vmatprep.subr.bf16.mxu1 %v6035_v21  ;;  %v1034_v27 = vpack.c.bf16 %v6669_v12, %v6673_v13  ;;  %v952_v28 = vld [vmem:[%s949_s18 + $0x10] sm:$0xff]  ;;  %v950_v29 = vld [vmem:[%s949_s18] sm:$0xff]  ;;  %v953_v38 = vld [vmem:[%s949_s18 + $0x18] sm:$0xff]  ;;  %s1028_s20 = scalar_lea.vmem [#allocation3], %s7247_s19  ;;  %s6722_s27 = smov 64  }
 0x13f   : >> { %6208 = vmatpush3.bf16.msra.mxu0 %v6031_v20  ;;  %6216 = vmatpush3.bf16.msra.mxu1 %v6035_v21  ;;  %v1029_v43 = vld [vmem:[%s1028_s20] sm:$0xff]  ;;  %v951_v20 = vld [vmem:[%s949_s18 + $0x8] sm:$0xff]  ;;  %s6724_s16 = smov 32   ;;  %s6725_s30 = smov 96  }
 0x140   : >> { %6209 = vmatprep.subr.bf16.mxu0 %v6032_v22  ;;  %6217 = vmatprep.subr.bf16.mxu1 %v6036_v23  ;;  %s1370_s8 = scalar_lea.vmem [#allocation4], %s6029_s14  ;;  %s1415_s12 = scalar_lea.vmem [#allocation4], %s7247_s19 }
 0x141   : >> { %6211 = vmatprep.mubr.msk.bf16.mxu0 %vm968_vm9, %v954_v24  ;;  %6219 = vmatprep.mubr.msk.bf16.mxu1 %vm968_vm9, %v1033_v25  ;;  %v1030_v25 = vld [vmem:[%s1028_s20 + $0x8] sm:$0xff] }
 0x143   : >> { %6210 = vmatpush3.bf16.msra.mxu0 %v6032_v22  ;;  %6218 = vmatpush3.bf16.msra.mxu1 %v6036_v23  ;;  %v1031_v23 = vld [vmem:[%s1028_s20 + $0x10] sm:$0xff] }
 0x146   : >> { %6212 = vmatmul.mubr.msk.bf16.vlgmr.msra.gmra.mrb[0].mxu0 %vm968_vm9, %v955_v26  ;;  %6220 = vmatmul.mubr.msk.bf16.vlgmr.msra.gmra.mrb[0].mxu1 %vm968_vm9, %v1034_v27 }
 0x219   : >> { %v6213_v30 = vpop.f32.mrb[0].mxu0  ;;  %v6221_v31 = vpop.f32.mrb[0].mxu1 }
 0x21a   : >> { %v1026_v32 = vadd.f32 %v6213_v30, %v952_v28  ;;  %v1009_v33 = vpop.f32.mrb[1].mxu0  ;;  %v1087_v34 = vpop.f32.mrb[1].mxu1  ;;  %v1104_v26 = vadd.f32 %v6221_v31, %v1031_v23  ;;  %v1032_v28 = vld [vmem:[%s1028_s20 + $0x18] sm:$0xff] }
 0x21b   : >> { %v1024_v35 = vadd.f32 %v1009_v33, %v950_v29  ;;  %v6214_v36 = vpop.f32.mrb[2].mxu0  ;;  %v6222_v37 = vpop.f32.mrb[2].mxu1  ;;  %v1102_v45 = vadd.f32 %v1087_v34, %v1029_v43 }
 0x21c   : >> { %6437 = vtanh.f32 %v1026_v32  ;;  %v1012_v41 = vpop.f32.mrb[3].mxu0  ;;  %v1090_v42 = vpop.f32.mrb[3].mxu1  ;;  %v1027_v44 = vadd.f32 %v6214_v36, %v953_v38  ;;  %v1105_v30 = vadd.f32 %v6222_v37, %v1032_v28  ;;  %v6723_v36 = vmov 0  }
 0x21d   : >> { %6439 = vtanh.f32 %v1024_v35  ;;  %v1025_v21 = vadd.f32 %v1012_v41, %v951_v20  ;;  %v1103_v27 = vadd.f32 %v1090_v42, %v1030_v25  ;;  %6435 = vset.pattern.permute.xlu0 %v6723_v36  ;;  %6436 = vset.pattern.permute.xlu1 %v6723_v36 }
 0x21e   : >> { %6441 = vtanh.f32 %v1027_v44  ;;  %v6042_v41 = vmul.f32 -1.442695, %v1027_v44 }
 0x21f   : >> { %6443 = vtanh.f32 %v1102_v45  ;;  %v6044_v20 = vmul.f32 -1.442695, %v1103_v27 }
 0x220   : >> { %6445 = vtanh.f32 %v1025_v21 }
 0x221   : >> { %6447 = vtanh.f32 %v1104_v26 }
 0x222   : >> { %6449 = vtanh.f32 %v1103_v27 }
 0x223   : >> { %6451 = vtanh.f32 %v1105_v30 }
 0x226   : >> { %v6438_v22 = vpop.eup %6437 }
 0x227   : >> { %v6440_v24 = vpop.eup %6439  ;;  %1162 = vrot.lane.b32.xlu1 %v6438_v22, %s6722_s27 }
 0x228   : >> { %1158 = vrot.lane.b32.xlu0 %v6440_v24, %s6722_s27  ;;  %v6442_v29 = vpop.eup %6441 }
 0x229   : >> { %v6444_v33 = vpop.eup %6443 }
 0x22a   : >> { %v6446_v34 = vpop.eup %6445 }
 0x22b   : >> { %1164 = vrot.lane.b32.xlu1 %v6442_v29, %s6722_s27  ;;  %v6448_v31 = vpop.eup %6447 }
 0x22c   : >> { %1270 = vrot.lane.b32.xlu0 %v6444_v33, %s6722_s27  ;;  %v6450_v38 = vpop.eup %6449 }
 0x22d   : >> { %v6452_v37 = vpop.eup %6451 }
 0x22f   : >> { %1272 = vrot.lane.b32.xlu1 %v6450_v38, %s6722_s27 }
 0x230   : >> { %1160 = vrot.lane.b32.xlu0 %v6446_v34, %s6722_s27 }
 0x233   : >> { %1276 = vrot.lane.b32.xlu1 %v6452_v37, %s6722_s27 }
 0x234   : >> { %1274 = vrot.lane.b32.xlu0 %v6448_v31, %s6722_s27 }
 0x237   : >> { %1140 = vrot.lane.b32.xlu1 %v6693_v49, %s6724_s16  ;;  %v6043_v49 = vmul.f32 -1.442695, %v1102_v45 }
 0x238   : >> { %1138 = vrot.lane.b32.xlu0 %v6697_v48, %s6724_s16  ;;  %v6041_v48 = vmul.f32 -1.442695, %v1026_v32 }
 0x23a   : >> { %6453 = vpow2.f32 %v6041_v48 }
 0x23b   : >> { %1144 = vrot.lane.b32.xlu1 %v6685_v51, %s6724_s16  ;;  %v6045_v51 = vmul.f32 -1.442695, %v1104_v26 }
 0x23c   : >> { %1142 = vrot.lane.b32.xlu0 %v6689_v50, %s6724_s16  ;;  %v6039_v50 = vmul.f32 -1.442695, %v1024_v35 }
 0x23e   : >> { %6455 = vpow2.f32 %v6039_v50 }
 0x23f   : >> { %1252 = vrot.lane.b32.xlu1 %v6661_v57, %s6724_s16  ;;  %6457 = vpow2.f32 %v6042_v41 }
 0x240   : >> { %1250 = vrot.lane.b32.xlu0 %v6665_v56, %s6724_s16  ;;  %6459 = vpow2.f32 %v6043_v49  ;;  %v6040_v56 = vmul.f32 -1.442695, %v1025_v21 }
 0x242   : >> { %6461 = vpow2.f32 %v6040_v56 }
 0x243   : >> { %1256 = vrot.lane.b32.xlu1 %v6653_v59, %s6724_s16  ;;  %6463 = vpow2.f32 %v6045_v51  ;;  %v6046_v59 = vmul.f32 -1.442695, %v1105_v30 }
 0x244   : >> { %1254 = vrot.lane.b32.xlu0 %v6657_v58, %s6724_s16  ;;  %v6454_v42 = vpop.eup %6453 }
 0x245   : >> { %v1120_v43 = vadd.f32 1.0, %v6454_v42 }
 0x247   : >> { %6465 = vrcp.f32 %v1120_v43 }
 0x248   : >> { %v6456_v58 = vpop.eup %6455  ;;  %6467 = vpow2.f32 %v6044_v20 }
 0x249   : >> { %v6458_v57 = vpop.eup %6457  ;;  %v1118_v22 = vadd.f32 1.0, %v6456_v58  ;;  %v937_v58 = vstv %s6717_s17  ;;  %s919_s17 = sadd.s32 1, %s6717_s17  }
 0x24a   : >> { %v6460_v32 = vpop.eup %6459  ;;  %v1121_v35 = vadd.f32 1.0, %v6458_v57  ;;  %vm938_vm10 = vcmp.lt.s32.totalorder %v937_v58, %v7116_v8  ;;  %vm941_vm11 = vcmp.lt.s32.totalorder %v937_v58, %v7126_v11  ;;  %vm939_vm12 = vcmp.lt.s32.totalorder %v937_v58, %v7119_v9  ;;  %p7523_p13 = scmp.ge.s32.totalorder %s919_s17, 8  }
 0x24b   : >> { %6469 = vrcp.f32 %v1118_v22  ;;  %v1230_v44 = vadd.f32 1.0, %v6460_v32  ;;  %vm940_vm14 = vcmp.lt.s32.totalorder %v937_v58, %v7122_v10 }
 0x24c   : >> { %6471 = vpow2.f32 %v6046_v59  ;;  %v6462_v45 = vpop.eup %6461 }
 0x24d   : >> { %6473 = vrcp.f32 %v1121_v35  ;;  %v6464_v21 = vpop.eup %6463  ;;  %v1119_v23 = vadd.f32 1.0, %v6462_v45 }
 0x24e   : >> { %6475 = vrcp.f32 %v1230_v44  ;;  %v1232_v29 = vadd.f32 1.0, %v6464_v21  ;;  %v1330_v44 = vsel %vm938_vm10, 1, %v6723_v36 }
 0x24f   : >> { %6477 = vrcp.f32 %v1119_v23 }
 0x250   : >> { %6479 = vrcp.f32 %v1232_v29  ;;  %v1332_v29 = vsel %vm940_vm14, 1, %v6723_v36 }
 0x251   : >> { %v7276_v24 = vpop.eup %6465 }
 0x252   : >> { %v6468_v26 = vpop.eup %6467 }
 0x253   : >> { %v1231_v33 = vadd.f32 1.0, %v6468_v26  ;;  %v1333_v26 = vsel %vm941_vm11, 1, %v6723_v36  ;;  %vm1416_vm11 = vcmask 523520  }
 0x255   : >> { %v7280_v30 = vpop.eup %6469  ;;  %6481 = vrcp.f32 %v1231_v33 }
 0x256   : >> { %v6472_v34 = vpop.eup %6471 }
 0x257   : >> { %v7283_v38 = vpop.eup %6473  ;;  %v1233_v48 = vadd.f32 1.0, %v6472_v34 }
 0x258   : >> { %v7287_v41 = vpop.eup %6475 }
 0x259   : >> { %6483 = vrcp.f32 %v1233_v48  ;;  %v7292_v42 = vpop.eup %6477 }
 0x25a   : >> { %v7297_v20 = vpop.eup %6479 }
 0x25f   : >> { %v7299_v22 = vpop.eup %6481 }
 0x263   : >> { %v7307_v45 = vpop.eup %6483 }
 0x299   : >> { %v1163_v25 = vpop.permute.xlu1 %1162 }
 0x29a   : >> { %v1172_v27 = vmul.f32 %v7276_v24, %v1163_v25  ;;  %v1159_v28 = vpop.permute.xlu0 %1158  ;;  %v942_v25 = vstv %s936_s15 }
 0x29b   : >> { %v1170_v31 = vmul.f32 %v7280_v30, %v1159_v28  ;;  %vm944_vm13 = vcmp.lt.s32.totalorder %v942_v25, %v7119_v9  ;;  %vm946_vm15 = vcmp.lt.s32.totalorder %v942_v25, %v7126_v11  ;;  %vm943_vm0 = vcmp.lt.s32.totalorder %v942_v25, %v7116_v8 }
 0x29c   : >> { %1182 = vrot.lane.b32.xlu0 %v1172_v27, %s6724_s16  ;;  %v1331_v27 = vsel %vm939_vm12, 1, %v6723_v36  ;;  %v1376_v28 = vsel %vm944_vm13, 1, %v6723_v36  ;;  %v1378_v33 = vsel %vm946_vm15, 1, %v6723_v36  ;;  %v1375_v34 = vsel %vm943_vm0, 1, %v6723_v36 }
 0x29d   : >> { %v1165_v37 = vpop.permute.xlu1 %1164  ;;  %vm945_vm1 = vcmp.lt.s32.totalorder %v942_v25, %v7122_v10 }
 0x29e   : >> { %v1173_v50 = vmul.f32 %v7283_v38, %v1165_v37  ;;  %v1271_v49 = vpop.permute.xlu0 %1270 }
 0x29f   : >> { %v1282_v56 = vmul.f32 %v7287_v41, %v1271_v49 }
 0x2a0   : >> { %1178 = vrot.lane.b32.xlu0 %v1170_v31, %s6724_s16  ;;  %1184 = vrot.lane.b32.xlu1 %v1173_v50, %s6724_s16  ;;  %v1377_v31 = vsel %vm945_vm1, 1, %v6723_v36 }
 0x2a1   : >> { %v1273_v59 = vpop.permute.xlu1 %1272 }
 0x2a2   : >> { %v1161_v51 = vpop.permute.xlu0 %1160  ;;  %v1283_v35 = vmul.f32 %v7299_v22, %v1273_v59 }
 0x2a3   : >> { %v1171_v43 = vmul.f32 %v7292_v42, %v1161_v51 }
 0x2a4   : >> { %1290 = vrot.lane.b32.xlu0 %v1282_v56, %s6724_s16 }
 0x2a5   : >> { %1180 = vrot.lane.b32.xlu1 %v1171_v43, %s6724_s16  ;;  %v1277_v21 = vpop.permute.xlu1 %1276 }
 0x2a6   : >> { %v1275_v57 = vpop.permute.xlu0 %1274  ;;  %v1285_v23 = vmul.f32 %v7307_v45, %v1277_v21 }
 0x2a7   : >> { %v1284_v32 = vmul.f32 %v7297_v20, %v1275_v57 }
 0x2a9   : >> { %1294 = vrot.lane.b32.xlu0 %v1284_v32, %s6724_s16  ;;  %1292 = vrot.lane.b32.xlu1 %v1283_v35, %s6724_s16 }
 0x2aa   : >> { %v1139_v36 = vpop.permute.xlu0 %1138 }
 0x2ab   : >> { %v1150_v21 = vmul.f32 %v7280_v30, %v1139_v36 }
 0x2ad   : >> { %1335 = vperm.xlu0 %6435, %v1330_v44   ;;  %1296 = vrot.lane.b32.xlu1 %v1285_v23, %s6724_s16 }
 0x2ae   : >> { %v7339_v37 = vpop.permute.xlu0 %1142 }
 0x2b1   : >> { %1344 = vperm.xlu0 %6435, %v1333_v26   ;;  %1338 = vperm.xlu1 %6436, %v1331_v27  }
 0x2b2   : >> { %v7343_v48 = vpop.permute.xlu0 %1250 }
 0x2b5   : >> { %1383 = vperm.xlu0 %6435, %v1376_v28   ;;  %1341 = vperm.xlu1 %6436, %v1332_v29   ;;  %v1262_v29 = vmul.f32 %v7287_v41, %v7343_v48 }
 0x2b6   : >> { %v7347_v50 = vpop.permute.xlu0 %1254 }
 0x2b7   : >> { %v1264_v35 = vmul.f32 %v7297_v20, %v7347_v50 }
 0x2b9   : >> { %1389 = vperm.xlu0 %6435, %v1378_v33   ;;  %1380 = vperm.xlu1 %6436, %v1375_v34  }
 0x2bd   : >> { %1427 = vrot.lane.b32.xlu0 %v6709_v18, %s6725_s30  ;;  %1386 = vperm.xlu1 %6436, %v1377_v31   ;;  %v7341_v18 = vpop.permute.xlu1 %1140 }
 0x2be   : >> { %v1151_v34 = vmul.f32 %v7292_v42, %v7341_v18 }
 0x2c1   : >> { %1431 = vrot.lane.b32.xlu0 %v6701_v16, %s6725_s30  ;;  %1425 = vrot.lane.b32.xlu1 %v6713_v19, %s6725_s30  ;;  %v7345_v16 = vpop.permute.xlu1 %1144 }
 0x2c2   : >> { %v1153_v51 = vmul.f32 %v7283_v38, %v7345_v16 }
 0x2c5   : >> { %1451 = vrot.lane.b32.xlu0 %v6677_v14, %s6725_s30  ;;  %1429 = vrot.lane.b32.xlu1 %v6705_v17, %s6725_s30  ;;  %v7349_v19 = vpop.permute.xlu1 %1252  ;;  %v1152_v14 = vmul.f32 %v7276_v24, %v7339_v37 }
 0x2c9   : >> { %1449 = vrot.lane.b32.xlu1 %v6681_v15, %s6725_s30  ;;  %v7353_v56 = vpop.permute.xlu1 %1256 }
 0x2ca   : >> { %v1265_v28 = vmul.f32 %v7307_v45, %v7353_v56 }
 0x30e   : >> { %v1183_v17 = vpop.permute.xlu0 %1182 }
 0x30f   : >> { %v1192_v49 = vadd.f32 %v1183_v17, %v1152_v14 }
 0x311   : >> { %6485 = vtanh.f32 %v1192_v49 }
 0x312   : >> { %v1179_v15 = vpop.permute.xlu0 %1178  ;;  %v1185_v43 = vpop.permute.xlu1 %1184 }
 0x313   : >> { %v1193_v58 = vadd.f32 %v1185_v43, %v1153_v51  ;;  %v1190_v27 = vadd.f32 %v1179_v15, %v1150_v21  ;;  %v1263_v15 = vmul.f32 %v7299_v22, %v7349_v19 }
 0x315   : >> { %6487 = vtanh.f32 %v1193_v58 }
 0x316   : >> { %v1291_v57 = vpop.permute.xlu0 %1290 }
 0x317   : >> { %v1181_v32 = vpop.permute.xlu1 %1180  ;;  %v1302_v14 = vadd.f32 %v1291_v57, %v1262_v29 }
 0x318   : >> { %v1191_v17 = vadd.f32 %v1181_v32, %v1151_v34 }
 0x31b   : >> { %v6486_v59 = vpop.eup %6485  ;;  %v1295_v44 = vpop.permute.xlu0 %1294 }
 0x31c   : >> { %1206 = vrot.lane.b32.xlu1 %v6486_v59, %s6722_s27  ;;  %v7361_v23 = vadd.f32 %v1295_v44, %v1264_v35  ;;  %v1293_v25 = vpop.permute.xlu1 %1292 }
 0x31d   : >> { %v1303_v51 = vadd.f32 %v1293_v25, %v1263_v15 }
 0x31e   : >> { %6489 = vtanh.f32 %v7361_v23 }
 0x31f   : >> { %v6488_v26 = vpop.eup %6487  ;;  %6491 = vtanh.f32 %v1190_v27 }
 0x320   : >> { %1208 = vrot.lane.b32.xlu0 %v6488_v26, %s6722_s27  ;;  %v1297_v33 = vpop.permute.xlu1 %1296 }
 0x321   : >> { %v7371_v31 = vadd.f32 %v1297_v33, %v1265_v28 }
 0x323   : >> { %6493 = vtanh.f32 %v7371_v31 }
 0x324   : >> { %6495 = vtanh.f32 %v1302_v14 }
 0x325   : >> { %6497 = vtanh.f32 %v1191_v17 }
 0x326   : >> { %6499 = vtanh.f32 %v1303_v51 }
 0x328   : >> { %v6490_v43 = vpop.eup %6489 }
 0x329   : >> { %1318 = vrot.lane.b32.xlu1 %v6490_v43, %s6722_s27  ;;  %v6492_v59 = vpop.eup %6491 }
 0x32c   : >> { %v7382_v21 = vpop.permute.xlu0 %1335 }
 0x32d   : >> { %v6494_v35 = vpop.eup %6493  ;;  %1202 = vrot.lane.b32.xlu1 %v6492_v59, %s6722_s27  ;;  %vm1346_vm2 = vcmp.eq.s32.totalorder %v7382_v21, 1 }
 0x32e   : >> { %1320 = vrot.lane.b32.xlu0 %v6494_v35, %s6722_s27  ;;  %v6496_v57 = vpop.eup %6495  ;;  %v1441_v28 = vsel %vm1346_vm2, %v1190_v27, %v1139_v36 }
 0x32f   : >> { %v6498_v32 = vpop.eup %6497 }
 0x330   : >> { %v7379_v44 = vpop.permute.xlu1 %1338  ;;  %v6500_v25 = vpop.eup %6499 }
 0x331   : >> { %1314 = vrot.lane.b32.xlu1 %v6496_v57, %s6722_s27  ;;  %v1345_v29 = vpop.permute.xlu0 %1344  ;;  %vm1347_vm4 = vcmp.eq.s32.totalorder %v7379_v44, 1 }
 0x332   : >> { %1204 = vrot.lane.b32.xlu0 %v6498_v32, %s6722_s27  ;;  %vm1349_vm6 = vcmp.eq.s32.totalorder %v1345_v29, 1 }
 0x334   : >> { %v1342_v26 = vpop.permute.xlu1 %1341 }
 0x335   : >> { %1453 = vrot.lane.b32.xlu1 %v6673_v13, %s6725_s30  ;;  %vm1348_vm3 = vcmp.eq.s32.totalorder %v1342_v26, 1  ;;  %v1442_v13 = vsel %vm1347_vm4, %v1191_v17, %v7341_v18  ;;  %v7405_v36 = vpop.permute.xlu0 %1383 }
 0x336   : >> { %1316 = vrot.lane.b32.xlu0 %v6500_v25, %s6722_s27  ;;  %v1443_v34 = vsel %vm1348_vm3, %v1192_v49, %v7339_v37  ;;  %v1444_v37 = vsel %vm1349_vm6, %v1193_v58, %v7345_v16  ;;  %vm1392_vm7 = vcmp.eq.s32.totalorder %v7405_v36, 1 }
 0x337   : >> { %v1466_v18 = vsel %vm1392_vm7, %v1303_v51, %v7349_v19 }
 0x338   : >> { %v7393_v33 = vpop.permute.xlu1 %1380 }
 0x339   : >> { %1489 = vrot.lane.b32.xlu1 %v1441_v28, %s6725_s30  ;;  %vm1391_vm5 = vcmp.eq.s32.totalorder %v7393_v33, 1  ;;  %v7421_v17 = vpop.permute.xlu0 %1389 }
 0x33a   : >> { %1455 = vrot.lane.b32.xlu0 %v6669_v12, %s6725_s30  ;;  %v1465_v12 = vsel %vm1391_vm5, %v1302_v14, %v7343_v48  ;;  %vm1394_vm10 = vcmp.eq.s32.totalorder %v7421_v17, 1 }
 0x33b   : >> { %v1468_v44 = vsel %vm1394_vm10, %v7371_v31, %v7353_v56 }
 0x33c   : >> { %v7419_v49 = vpop.permute.xlu1 %1386 }
 0x33d   : >> { %1493 = vrot.lane.b32.xlu1 %v1443_v34, %s6725_s30  ;;  %v1428_v14 = vpop.permute.xlu0 %1427  ;;  %vm1393_vm8 = vcmp.eq.s32.totalorder %v7419_v49, 1 }
 0x33e   : >> { %1491 = vrot.lane.b32.xlu0 %v1442_v13, %s6725_s30  ;;  %v1467_v21 = vsel %vm1393_vm8, %v7361_v23, %v7347_v50 }
 0x340   : >> { %v1426_v27 = vpop.permute.xlu1 %1425 }
 0x341   : >> { %1521 = vrot.lane.b32.xlu1 %v1465_v12, %s6725_s30  ;;  %v1432_v58 = vpop.permute.xlu0 %1431 }
 0x342   : >> { %1495 = vrot.lane.b32.xlu0 %v1444_v37, %s6725_s30 }
 0x344   : >> { %v1430_v48 = vpop.permute.xlu1 %1429 }
 0x345   : >> { %v1452_v43 = vpop.permute.xlu0 %1451 }
 0x346   : >> { %1523 = vrot.lane.b32.xlu0 %v1466_v18, %s6725_s30 }
 0x348   : >> { %v1450_v16 = vpop.permute.xlu1 %1449 }
 0x38e   : >> { %v1207_v15 = vpop.permute.xlu1 %1206 }
 0x38f   : >> { %v1216_v59 = vmul.f32 %v7276_v24, %v1207_v15 }
 0x391   : >> { %v1352_v35 = vsel %vm1348_vm3, %v1216_v59, 0.0 }
 0x392   : >> { %1362 = vrot.lane.b32.xlu1 %v1352_v35, %s6724_s16  ;;  %v1209_v19 = vpop.permute.xlu0 %1208 }
 0x393   : >> { %v1217_v51 = vmul.f32 %v7283_v38, %v1209_v19  ;;  %v1439_v38 = vsel %vm1348_vm3, %v1216_v59, %v1430_v48 }
 0x395   : >> { %v1353_v57 = vsel %vm1349_vm6, %v1217_v51, 0.0  ;;  %v1440_v18 = vsel %vm1349_vm6, %v1217_v51, %v1432_v58 }
 0x396   : >> { %1364 = vrot.lane.b32.xlu0 %v1353_v57, %s6724_s16 }
 0x39b   : >> { %v1319_v32 = vpop.permute.xlu1 %1318 }
 0x39c   : >> { %v1328_v25 = vmul.f32 %v7297_v20, %v1319_v32 }
 0x39e   : >> { %v1397_v28 = vsel %vm1393_vm8, %v1328_v25, 0.0 }
 0x39f   : >> { %1407 = vrot.lane.b32.xlu1 %v1397_v28, %s6722_s27  ;;  %v1203_v24 = vpop.permute.xlu1 %1202 }
 0x3a0   : >> { %v1321_v34 = vpop.permute.xlu0 %1320  ;;  %v1214_v35 = vmul.f32 %v7280_v30, %v1203_v24 }
 0x3a1   : >> { %v1329_v13 = vmul.f32 %v7307_v45, %v1321_v34 }
 0x3a2   : >> { %v1350_v29 = vsel %vm1346_vm2, %v1214_v35, 0.0  ;;  %v1437_v34 = vsel %vm1346_vm2, %v1214_v35, %v1426_v27 }
 0x3a3   : >> { %v1398_v12 = vsel %vm1394_vm10, %v1329_v13, 0.0  ;;  %1477 = vrot.lane.b32.xlu1 %v1439_v38, %s6724_s16  ;;  %v1315_v20 = vpop.permute.xlu1 %1314 }
 0x3a4   : >> { %v1205_v37 = vpop.permute.xlu0 %1204  ;;  %1409 = vrot.lane.b32.xlu0 %v1398_v12, %s6722_s27  ;;  %v1326_v59 = vmul.f32 %v7287_v41, %v1315_v20 }
 0x3a5   : >> { %v1215_v58 = vmul.f32 %v7292_v42, %v1205_v37 }
 0x3a6   : >> { %v1395_v41 = vsel %vm1391_vm5, %v1326_v59, 0.0  ;;  %v1461_v38 = vsel %vm1391_vm5, %v1326_v59, %v1450_v16 }
 0x3a7   : >> { %v1454_v15 = vpop.permute.xlu1 %1453  ;;  %v1351_v28 = vsel %vm1347_vm4, %v1215_v58, 0.0  ;;  %v1438_v12 = vsel %vm1347_vm4, %v1215_v58, %v1428_v14 }
 0x3a8   : >> { %v1317_v19 = vpop.permute.xlu0 %1316  ;;  %1479 = vrot.lane.b32.xlu0 %v1440_v18, %s6724_s16  ;;  %v1463_v45 = vsel %vm1393_vm8, %v1328_v25, %v1454_v15 }
 0x3a9   : >> { %1509 = vrot.lane.b32.xlu1 %v1463_v45, %s6724_s16 }
 0x3ab   : >> { %v7447_v48 = vpop.permute.xlu1 %1489  }
 0x3ac   : >> { %v9325_v26 = vmov %v7447_v48  ;;  %v1456_v57 = vpop.permute.xlu0 %1455  ;;  %v1327_v48 = vmul.f32 %v7299_v22, %v1317_v19 }
 0x3ad   : >> { %v1464_v30 = vsel %vm1394_vm10, %v1329_v13, %v1456_v57  ;;  %1358 = vrot.lane.b32.xlu1 %v1350_v29, %s6724_s16 }
 0x3ae   : >> { %1511 = vrot.lane.b32.xlu0 %v1464_v30, %s6724_s16  ;;  %v1396_v13 = vsel %vm1392_vm7, %v1327_v48, 0.0  ;;  %v1462_v27 = vsel %vm1392_vm7, %v1327_v48, %v1452_v43  ;;  %v9349_v48 = vmov %v9325_v26 }
 0x3af   : >> { %v7457_v51 = vpop.permute.xlu1 %1493  }
 0x3b0   : >> { %v9326_v32 = vmov %v7457_v51  ;;  %v7459_v25 = vpop.permute.xlu0 %1491  }
 0x3b1   : >> { %1403 = vrot.lane.b32.xlu1 %v1395_v41, %s6722_s27 }
 0x3b2   : >> { %1360 = vrot.lane.b32.xlu0 %v1351_v28, %s6724_s16 }
 0x3b3   : >> { %v7468_v42 = vpop.permute.xlu1 %1521  }
 0x3b4   : >> { %v7470_v51 = vpop.permute.xlu0 %1495  }
 0x3b5   : >> { %v9327_v24 = vmov %v7470_v51  ;;  %1473 = vrot.lane.b32.xlu1 %v1437_v34, %s6724_s16 }
 0x3b6   : >> { %1405 = vrot.lane.b32.xlu0 %v1396_v13, %s6722_s27  ;;  %v9346_v51 = vmov %v9327_v24 }
 0x3b8   : >> { %v7478_v57 = vpop.permute.xlu0 %1523  }
 0x3b9   : >> { %v9328_v22 = vmov %v7478_v57  ;;  %1505 = vrot.lane.b32.xlu1 %v1461_v38, %s6724_s16 }
 0x3ba   : >> { %1475 = vrot.lane.b32.xlu0 %v1438_v12, %s6724_s16  ;;  %v9340_v57 = vmov %v9328_v22 }
 0x3bd   : >> { %1525 = vrot.lane.b32.xlu1 %v1467_v21, %s6725_s30 }
 0x3be   : >> { %1507 = vrot.lane.b32.xlu0 %v1462_v27, %s6724_s16 }
 0x3c2   : >> { %1527 = vrot.lane.b32.xlu0 %v1468_v44, %s6725_s30 }
 0x404   : >> { %v1363_v33 = vpop.permute.xlu1 %1362 }
 0x405   : >> { %1373 = vst.msk [vmem:[%s1370_s8 + $0x10] sm:$0xff] %vm968_vm9, %v1363_v33 }
 0x408   : >> { %v1365_v50 = vpop.permute.xlu0 %1364 }
 0x409   : >> { %1374 = vst.msk [vmem:[%s1370_s8 + $0x18] sm:$0xff] %vm968_vm9, %v1365_v50  ;;  %v9347_v50 = vmov %v9326_v32 }
 0x411   : >> { %v1408_v23 = vpop.permute.xlu1 %1407 }
 0x415   : >> { %v7503_v17 = vpop.permute.xlu1 %1477  }
 0x416   : >> { %v9329_v36 = vmov %v7503_v17  ;;  %v1410_v49 = vpop.permute.xlu0 %1409 }
 0x41a   : >> { %v7505_v16 = vpop.permute.xlu0 %1479  }
 0x41b   : >> { %v9330_v43 = vmov %v7505_v16  ;;  %v7507_v13 = vpop.permute.xlu1 %1509  }
 0x41c   : >> { %v9331_v20 = vmov %v7507_v13  ;;  %v9350_v16 = vmov %v9330_v43 }
 0x41d   : >> { %v9343_v13 = vmov %v9331_v20 }
 0x41f   : >> { %v1359_v56 = vpop.permute.xlu1 %1358 }
 0x420   : >> { %v7509_v12 = vpop.permute.xlu0 %1511   ;;  %1371 = vst.msk [vmem:[%s1370_s8] sm:$0xff] %vm968_vm9, %v1359_v56  ;;  %v9341_v56 = vmov %v7468_v42 }
 0x421   : >> { %v9332_v31 = vmov %v7509_v12 }
 0x422   : >> { %v9342_v12 = vmov %v9332_v31 }
 0x423   : >> { %v1404_v14 = vpop.permute.xlu1 %1403 }
 0x424   : >> { %v1361_v37 = vpop.permute.xlu0 %1360 }
 0x425   : >> { %1372 = vst.msk [vmem:[%s1370_s8 + $0x8] sm:$0xff] %vm968_vm9, %v1361_v37 }
 0x426   : >> { %1419 = vst.msk [vmem:[%s1415_s12 + $0x10] sm:$0xff] %vm1416_vm11, %v1408_v23  ;;  %1420 = vst.msk [vmem:[%s1415_s12 + $0x18] sm:$0xff] %vm1416_vm11, %v1410_v49  ;;  %v9348_v49 = vmov %v7459_v25 }
 0x427   : >> { %1417 = vst.msk [vmem:[%s1415_s12] sm:$0xff] %vm1416_vm11, %v1404_v14  ;;  %v7514_v19 = vpop.permute.xlu1 %1473  }
 0x428   : >> { %v9333_v35 = vmov %v7514_v19  ;;  %v1406_v17 = vpop.permute.xlu0 %1405 }
 0x429   : >> { %1418 = vst.msk [vmem:[%s1415_s12 + $0x8] sm:$0xff] %vm1416_vm11, %v1406_v17  ;;  %v9351_v17 = vmov %v9329_v36  ;;  %v9353_v19 = vmov %v9333_v35 }
 0x42b   : >> { %v7516_v15 = vpop.permute.xlu1 %1505  }
 0x42c   : >> { %v9334_v45 = vmov %v7516_v15  ;;  %v7518_v18 = vpop.permute.xlu0 %1475  }
 0x42d   : >> { %v9335_v29 = vmov %v7518_v18  ;;  %v9345_v15 = vmov %v9334_v45 }
 0x42e   : >> { %v9352_v18 = vmov %v9335_v29 }
 0x42f   : >> { %v1526_v30 = vpop.permute.xlu1 %1525   ;;  %918 = sbr.rel (!%p7523_p13) target bundleno = 316 (0x13c), region = 112 }
 0x430   : >> { %v7520_v14 = vpop.permute.xlu0 %1507   ;;  %v9339_v58 = vmov %v1526_v30 }
 0x431   : >> { %v9336_v41 = vmov %v7520_v14 }
 0x432   : >> { %v9344_v14 = vmov %v9336_v41 }
 0x434   : >> { %v1528_v28 = vpop.permute.xlu0 %1527  }
 0x435   : >> { %v9338_v59 = vmov %v1528_v28 }
 0x436   : > { %1535 = sbr.rel (%p6028_p12) target bundleno = 1086 (0x43e), region = 59  ;;  %1537 = vst.msk [vmem:[#allocation5] sm:$0xff] (!%p6028_p12), %vm968_vm9, %v9333_v35  ;;  %1538 = vst.msk [vmem:[#allocation5 + $0x8] sm:$0xff] (!%p6028_p12), %vm968_vm9, %v9335_v29 }
 0x437   : > { %1539 = vst.msk [vmem:[#allocation5 + $0x10] sm:$0xff] (!%p6028_p12), %vm968_vm9, %v9329_v36  ;;  %1540 = vst.msk [vmem:[#allocation5 + $0x18] sm:$0xff] (!%p6028_p12), %vm968_vm9, %v9330_v43 }
 0x438   : > { %1541 = vst.msk [vmem:[#allocation6] sm:$0xff] (!%p6028_p12), %vm968_vm9, %v9325_v26  ;;  %1542 = vst.msk [vmem:[#allocation6 + $0x8] sm:$0xff] (!%p6028_p12), %vm968_vm9, %v7459_v25 }
 0x439   : > { %1543 = vst.msk [vmem:[#allocation6 + $0x10] sm:$0xff] (!%p6028_p12), %vm968_vm9, %v9326_v32  ;;  %1544 = vst.msk [vmem:[#allocation6 + $0x18] sm:$0xff] (!%p6028_p12), %vm968_vm9, %v9327_v24 }
 0x43a   : > { %1545 = vst.msk [vmem:[#allocation7] sm:$0xff] (!%p6028_p12), %vm968_vm9, %v9334_v45  ;;  %1546 = vst.msk [vmem:[#allocation7 + $0x8] sm:$0xff] (!%p6028_p12), %vm968_vm9, %v9336_v41 }
 0x43b   : > { %1547 = vst.msk [vmem:[#allocation7 + $0x10] sm:$0xff] (!%p6028_p12), %vm968_vm9, %v9331_v20  ;;  %1548 = vst.msk [vmem:[#allocation7 + $0x18] sm:$0xff] (!%p6028_p12), %vm968_vm9, %v9332_v31 }
 0x43c   : > { %1549 = vst.msk [vmem:[#allocation8] sm:$0xff] (!%p6028_p12), %vm968_vm9, %v7468_v42  ;;  %1550 = vst.msk [vmem:[#allocation8 + $0x8] sm:$0xff] (!%p6028_p12), %vm968_vm9, %v9328_v22 }
 0x43d   : > { %1551 = vst.msk [vmem:[#allocation8 + $0x10] sm:$0xff] %vm968_vm9, %v1526_v30  ;;  %1552 = vst.msk [vmem:[#allocation8 + $0x18] sm:$0xff] %vm968_vm9, %v1528_v28 }
 0x43e PF: > { %p6048_p0 = scmp.le.s32.totalorder %s6641_s24, 0 }
 0x43f   : > { %vm1559_vm12 = vcmp.gt.s32.totalorder (!%p6048_p0), %v7107_v6, 0  ;;  %vm1557_vm13 = vcmp.gt.s32.totalorder (!%p6048_p0), %v7101_v4, 0  ;;  %vm1560_vm14 = vcmp.gt.s32.totalorder (!%p6048_p0), %v7110_v7, 0  ;;  %v6726_v60 = vmov (!%p6048_p0), 0  }
 0x440   : > { %1556 = sbr.rel (%p6048_p0) target bundleno = 1227 (0x4cb), region = 63  ;;  %6502 = vset.pattern.permute.xlu1 (!%p6048_p0), %v6726_v60  ;;  %6501 = vset.pattern.permute.xlu0 (!%p6048_p0), %v6726_v60  ;;  %v1563_v61 = vsel (!%p6048_p0), %vm1559_vm12, 1, %v6726_v60  ;;  %v1561_v62 = vsel (!%p6048_p0), %vm1557_vm13, 1, %v6726_v60  ;;  %vm1558_vm15 = vcmp.gt.s32.totalorder (!%p6048_p0), %v7104_v5, 0  ;;  %v1564_v63 = vsel (!%p6048_p0), %vm1560_vm14, 1, %v6726_v60 }
 0x441   : > { %1572 = vperm.xlu1 (!%p6048_p0), %6502, %v1563_v61   ;;  %1566 = vperm.xlu0 (!%p6048_p0), %6501, %v1561_v62   ;;  %v1562_v0 = vsel (!%p6048_p0), %vm1558_vm15, 1, %v6726_v60 }
 0x445   : > { %1575 = vperm.xlu1 (!%p6048_p0), %6502, %v1564_v63   ;;  %1569 = vperm.xlu0 (!%p6048_p0), %6501, %v1562_v0  }
 0x4c0   : > { %v1573_v1 = vpop.permute.xlu1 %1572  ;;  %v1567_v2 = vpop.permute.xlu0 %1566 }
 0x4c1   : > { %vm1579_vm0 = vcmp.eq.s32.totalorder %v1573_v1, 1  ;;  %vm1577_vm1 = vcmp.eq.s32.totalorder %v1567_v2, 1 }
 0x4c2   : > { %v1583_v3 = vsel %vm1579_vm0, %v9329_v36, %v7048_v46  ;;  %v1587_v4 = vsel %vm1579_vm0, %v9331_v20, %v7056_v54  ;;  %v1581_v6 = vsel %vm1577_vm1, %v9333_v35, %v7044_v39  ;;  %v1585_v5 = vsel %vm1577_vm1, %v9334_v45, %v7052_v52 }
 0x4c3   : > { %1592 = vst.msk [vmem:[#allocation5 + $0x10] sm:$0xff] %vm968_vm9, %v1583_v3  ;;  %1596 = vst.msk [vmem:[#allocation6 + $0x10] sm:$0xff] %vm968_vm9, %v1583_v3 }
 0x4c4   : > { %1600 = vst.msk [vmem:[#allocation7 + $0x10] sm:$0xff] %vm968_vm9, %v1587_v4  ;;  %1604 = vst.msk [vmem:[#allocation8 + $0x10] sm:$0xff] %vm968_vm9, %v1587_v4  ;;  %v1576_v39 = vpop.permute.xlu1 %1575  ;;  %v1570_v46 = vpop.permute.xlu0 %1569 }
 0x4c5   : > { %1590 = vst.msk [vmem:[#allocation5] sm:$0xff] %vm968_vm9, %v1581_v6  ;;  %1594 = vst.msk [vmem:[#allocation6] sm:$0xff] %vm968_vm9, %v1581_v6  ;;  %vm1580_vm2 = vcmp.eq.s32.totalorder %v1576_v39, 1  ;;  %vm1578_vm3 = vcmp.eq.s32.totalorder %v1570_v46, 1 }
 0x4c6   : > { %1598 = vst.msk [vmem:[#allocation7] sm:$0xff] %vm968_vm9, %v1585_v5  ;;  %1602 = vst.msk [vmem:[#allocation8] sm:$0xff] %vm968_vm9, %v1585_v5  ;;  %v1584_v52 = vsel %vm1580_vm2, %v9330_v43, %v7050_v47  ;;  %v1588_v54 = vsel %vm1580_vm2, %v9332_v31, %v7058_v55  ;;  %v1582_v7 = vsel %vm1578_vm3, %v9335_v29, %v7046_v40 }
 0x4c7   : > { %v1586_v8 = vsel %vm1578_vm3, %v9336_v41, %v7054_v53  ;;  %1593 = vst.msk [vmem:[#allocation5 + $0x18] sm:$0xff] %vm968_vm9, %v1584_v52  ;;  %1597 = vst.msk [vmem:[#allocation6 + $0x18] sm:$0xff] %vm968_vm9, %v1584_v52 }
 0x4c8   : > { %1601 = vst.msk [vmem:[#allocation7 + $0x18] sm:$0xff] %vm968_vm9, %v1588_v54  ;;  %1605 = vst.msk [vmem:[#allocation8 + $0x18] sm:$0xff] %vm968_vm9, %v1588_v54 }
 0x4c9   : > { %1591 = vst.msk [vmem:[#allocation5 + $0x8] sm:$0xff] %vm968_vm9, %v1582_v7  ;;  %1595 = vst.msk [vmem:[#allocation6 + $0x8] sm:$0xff] %vm968_vm9, %v1582_v7 }
 0x4ca   : > { %1599 = vst.msk [vmem:[#allocation7 + $0x8] sm:$0xff] %vm968_vm9, %v1586_v8  ;;  %1603 = vst.msk [vmem:[#allocation8 + $0x8] sm:$0xff] %vm968_vm9, %v1586_v8 }
 0x4cb PF: > { %v1606_v40 = vld [vmem:[#allocation4] sm:$0xff]  ;;  %v1607_v47 = vld [vmem:[#allocation4 + $0x8] sm:$0xff]  ;;  %v1618_v53 = vlaneseq  ;;  %v6727_v55 = vmov 1966171168   ;;  %v6728_v10 = vmov 286326784   ;;  %v1608_v57 = vld [vmem:[#allocation4 + $0x10] sm:$0xff] }
 0x4cc   : > { %v1616_v9 = vunpack.c.l.s4 %v6727_v55  ;;  %v1777_v11 = vunpack.c.l.s4 %v6728_v10  ;;  %v1610_v18 = vpack.c.bf16 %v1607_v47, %v1606_v40  ;;  %v6049_v19 = vpack.c.bf16 %v1607_v47, %v1607_v47  ;;  %v1609_v32 = vld [vmem:[#allocation4 + $0x18] sm:$0xff]  ;;  %v2035_v23 = vld [vmem:[%s7023_s28] sm:$0x1]  ;;  %v2038_v35 = vld [vmem:[%s7023_s28 + $0x4] sm:$0x1]  ;;  %s6194_s17 = sshll.u32 %s6641_s24, 6 }
 0x4cd   : > { %v1619_v16 = vshrl.u32 %v1618_v53, 7  ;;  %vm2032_vm4 = vcmask 516096   ;;  %vm2033_vm9 = vsmask.f32 256  ;;  %v1611_v48 = vpack.c.bf16 %v1609_v32, %v1608_v57  ;;  %v2041_v17 = vld [vmem:[%s7023_s28 + $0x8] sm:$0x1]  ;;  %s9248_s18 = scalar_lea.hbm %s9314_s6, %s6194_s17 }
 0x4ce   : > { %v1617_v15 = vunpack.c.0.s8 %v1616_v9  ;;  %v1778_v26 = vunpack.c.0.s8 %v1777_v11  ;;  %v6050_v42 = vpack.c.bf16 %v1609_v32, %v1609_v32  ;;  %vm7662_vm5 = vmand %vm2032_vm4, %vm2033_vm9  ;;  %v2059_v28 = vld [vmem:[%s7023_s28 + $0x20] sm:$0x1]  ;;  %v2047_v0 = vld [vmem:[%s7023_s28 + $0x10] sm:$0x1]  ;;  %vm3083_vm6 = vcmask 517121   ;;  %s5825_s14 = sshll.u32 %s7023_s28, 4  ;;  %s9254_s14 = int_to_ptr.vmem [resolvable:$true] %s5825_s14 }
 0x4cf   : > { %v2044_v1 = vld [vmem:[%s7023_s28 + $0xc] sm:$0x1]  ;;  %v2050_v52 = vld [vmem:[%s7023_s28 + $0x14] sm:$0x1]  ;;  %v2053_v54 = vld [vmem:[%s7023_s28 + $0x18] sm:$0x1] }
 0x4d0   : > { %v7646_v59 = vsub.s32 %v1617_v15, %v1619_v16  ;;  %v7650_v25 = vsub.s32 %v1778_v26, %v1619_v16  ;;  %v2056_v9 = vld [vmem:[%s7023_s28 + $0x1c] sm:$0x1]  ;;  %v2062_v26 = vld [vmem:[%s7023_s28 + $0x24] sm:$0x1]  ;;  %v2065_v57 = vld [vmem:[%s7023_s28 + $0x28] sm:$0x1] }
 0x4d1   : > { %vm3084_vm7 = vsmask.f32 1280  ;;  %v3092_v50 = vld [vmem:[%s7023_s28 + $0x8] sm:$0x2]  ;;  %vm4134_vm10 = vcmask 518146   ;;  %vm5185_vm13 = vcmask 519171  }
 0x4d2   : > { %v1621_v58 = vrot.slane %v1610_v18, %v7646_v59  ;;  %v1628_v51 = vrot.slane %v6049_v19, %v7646_v59  ;;  %v7655_v38 = vrot.slane %v1611_v48, %v7646_v59  ;;  %v7658_v12 = vrot.slane %v6050_v42, %v7646_v59  ;;  %v2071_v42 = vld [vmem:[%s7023_s28 + $0x30] sm:$0x1]  ;;  %vm7846_vm8 = vmand %vm3083_vm6, %vm3084_vm7  ;;  %s9262_s19 = scalar_lea.sflag [#allocation10], %s293_s11  ;;  %s6503_s20 = scalar_lea.vmem %s9254_s14, 2048 }
 0x4d3   : > { %vm4135_vm11 = vsmask.f32 2304  ;;  %vm5186_vm14 = vsmask.f32 3328  ;;  %vm2558_vm0 = vsmask.f32 7938  ;;  %p6504_p1 = scmp.ne.s32.totalorder %s9254_s14, %s6503_s20 }
 0x4d4   : > { %v1637_v24 = vrot.slane %v1621_v58, %v7646_v59  ;;  %v1629_v34 = vcombine.high %v1621_v58, %v1621_v58  ;;  %v1644_v13 = vrot.slane %v1628_v51, %v7646_v59  ;;  %v1630_v22 = vcombine.high %v1628_v51, %v1628_v51  ;;  %vm8035_vm12 = vmand %vm4134_vm10, %vm4135_vm11  ;;  %s6729_s27 = smov [#allocation9]  }
 0x4d5   : > { %vm8244_vm15 = vmand %vm5185_vm13, %vm5186_vm14  ;;  %vm3609_vm2 = vsmask.f32 7942  ;;  %p6505_p2 = pnand %p6504_p1, %p6808_p4  ;;  %s6507_s16 = sshll.u32 %s6729_s27, 4  ;;  %s6508_s16 = int_to_ptr.vmem [resolvable:$false] %s6507_s16 }
 0x4d6   : > { %v6051_v21 = vpack.i.b16 %v1637_v24, %v1637_v24  ;;  %v1713_v27 = vunpack.i.h.s16 %v1637_v24  ;;  %v1651_v44 = vrot.slane %v1629_v34, %v7646_v59  ;;  %v1659_v33 = vcombine.high %v1637_v24, %v1637_v24  ;;  %vm8425_vm1 = vmand %vm2032_vm4, %vm2558_vm0  ;;  %s6509_s30 = scalar_lea.vmem %s6508_s16, 4096  ;;  %p6510_p5 = scmp.lt.s32.totalorder %s9254_s14, %s6508_s16 }
 0x4d7   : > { %v6055_v36 = vpack.i.b16 %v1644_v13, %v1644_v13  ;;  %v1721_v49 = vunpack.i.h.s16 %v1644_v13  ;;  %v1658_v43 = vrot.slane %v1630_v22, %v7646_v59  ;;  %v7668_v20 = vcombine.high %v1644_v13, %v1644_v13  ;;  %v2068_v13 = vld [vmem:[%s7023_s28 + $0x2c] sm:$0x1]  ;;  %vm8615_vm3 = vmand %vm3083_vm6, %vm3609_vm2  ;;  %p6506_p3 = pneg %p6505_p2  ;;  %p6511_p6 = scmp.lt.s32.totalorder %s6509_s30, %s6503_s20 }
 0x4d8   : > { %v1782_v56 = vrot.slane %v6051_v21, %v7650_v25  ;;  %v1745_v31 = vpack.i.b16 %v1713_v27, %v1713_v27  ;;  %v6052_v14 = vpack.i.b16 %v1651_v44, %v1651_v44  ;;  %v1715_v37 = vunpack.i.h.s16 %v1651_v44 }
 0x4d9   : > { %v6053_v45 = vpack.i.b16 %v1659_v33, %v1659_v33  ;;  %v1717_v29 = vunpack.i.h.s16 %v1659_v33  ;;  %v1661_v30 = vcombine.high %v1651_v44, %v1651_v44  ;;  %v1838_v41 = vrot.slane %v6055_v36, %v7650_v25  ;;  %p6512_p7 = por %p6511_p6, %p6510_p5 }
 0x4da   : > { %v2036_v60 = vsel %vm7662_vm5, %v1782_v56, %v2035_v23  ;;  %v1789_v61 = vrot.slane %v1745_v31, %v7650_v25  ;;  %v1796_v62 = vrot.slane %v6052_v14, %v7650_v25  ;;  %v1747_v63 = vpack.i.b16 %v1715_v37, %v1715_v37 }
 0x4db   : > { %2037 = vst [vmem:[%s7023_s28] sm:$0x1] %v2036_v60  ;;  %v1810_v2 = vrot.slane %v6053_v45, %v7650_v25  ;;  %v1749_v3 = vpack.i.b16 %v1717_v29, %v1717_v29  ;;  %v6054_v4 = vpack.i.b16 %v1661_v30, %v1661_v30  ;;  %v1719_v6 = vunpack.i.h.s16 %v1661_v30  ;;  %p6513_p9 = pnand %p6512_p7, %p6506_p3 }
 0x4dc   : > { %v2039_v5 = vsel %vm7662_vm5, %v1789_v61, %v2038_v35  ;;  %v2042_v39 = vsel %vm7662_vm5, %v1796_v62, %v2041_v17  ;;  %v1803_v46 = vrot.slane %v1747_v63, %v7650_v25  ;;  %v2060_v7 = vsel %vm7662_vm5, %v1838_v41, %v2059_v28  ;;  %v2077_v35 = vld [vmem:[%s7023_s28 + $0x38] sm:$0x1]  ;;  %v2083_v17 = vld [vmem:[%s7023_s28 + $0x40] sm:$0x1]  ;;  %v2080_v62 = vld [vmem:[%s7023_s28 + $0x3c] sm:$0x1] }
 0x4dd   : > { %2040 = vst [vmem:[%s7023_s28 + $0x4] sm:$0x1] %v2039_v5  ;;  %2043 = vst [vmem:[%s7023_s28 + $0x8] sm:$0x1] %v2042_v39  ;;  %v2048_v8 = vsel %vm7662_vm5, %v1810_v2, %v2047_v0  ;;  %v1817_v40 = vrot.slane %v1749_v3, %v7650_v25  ;;  %v1824_v47 = vrot.slane %v6054_v4, %v7650_v25  ;;  %v1723_v16 = vunpack.i.h.s16 %v1658_v43  ;;  %v2086_v4 = vld [vmem:[%s7023_s28 + $0x44] sm:$0x1] }
 0x4de   : > { %v1751_v53 = vpack.i.b16 %v1719_v6, %v1719_v6  ;;  %2061 = vst [vmem:[%s7023_s28 + $0x20] sm:$0x1] %v2060_v7  ;;  %v2045_v55 = vsel %vm7662_vm5, %v1803_v46, %v2044_v1  ;;  %2049 = vst [vmem:[%s7023_s28 + $0x10] sm:$0x1] %v2048_v8  ;;  %v1753_v10 = vpack.i.b16 %v1721_v49, %v1721_v49  ;;  %v1725_v24 = vunpack.i.h.s16 %v7668_v20  ;;  %v2089_v8 = vld [vmem:[%s7023_s28 + $0x48] sm:$0x1] }
 0x4df   : > { %v6056_v11 = vpack.i.b16 %v1658_v43, %v1658_v43  ;;  %2046 = vst [vmem:[%s7023_s28 + $0xc] sm:$0x1] %v2045_v55  ;;  %v2051_v18 = vsel %vm7662_vm5, %v1817_v40, %v2050_v52  ;;  %v2054_v15 = vsel %vm7662_vm5, %v1824_v47, %v2053_v54  ;;  %v6057_v58 = vpack.i.b16 %v7668_v20, %v7668_v20  ;;  %v2095_v52 = vld [vmem:[%s7023_s28 + $0x50] sm:$0x1] }
 0x4e0   : > { %v1831_v19 = vrot.slane %v1751_v53, %v7650_v25  ;;  %2052 = vst [vmem:[%s7023_s28 + $0x14] sm:$0x1] %v2051_v18  ;;  %2055 = vst [vmem:[%s7023_s28 + $0x18] sm:$0x1] %v2054_v15  ;;  %v1845_v51 = vrot.slane %v1753_v10, %v7650_v25  ;;  %v1755_v48 = vpack.i.b16 %v1723_v16, %v1723_v16  ;;  %v2107_v16 = vld [vmem:[%s7023_s28 + $0x60] sm:$0x1] }
 0x4e1   : > { %v1852_v32 = vrot.slane %v6056_v11, %v7650_v25  ;;  %v1866_v22 = vrot.slane %v6057_v58, %v7650_v25  ;;  %v1662_v21 = vcombine.high %v1658_v43, %v1658_v43  ;;  %v1686_v27 = vrot.slane %v7655_v38, %v7646_v59  ;;  %v2074_v43 = vld [vmem:[%s7023_s28 + $0x34] sm:$0x1]  ;;  %v2092_v18 = vld [vmem:[%s7023_s28 + $0x4c] sm:$0x1] }
 0x4e2   : > { %v2057_v34 = vsel %vm7662_vm5, %v1831_v19, %v2056_v9  ;;  %v2063_v44 = vsel %vm7662_vm5, %v1845_v51, %v2062_v26  ;;  %v1859_v23 = vrot.slane %v1755_v48, %v7650_v25  ;;  %v1757_v36 = vpack.i.b16 %v1725_v24, %v1725_v24  ;;  %v2098_v19 = vld [vmem:[%s7023_s28 + $0x54] sm:$0x1] }
 0x4e3   : > { %2058 = vst [vmem:[%s7023_s28 + $0x1c] sm:$0x1] %v2057_v34  ;;  %v2066_v33 = vsel %vm7662_vm5, %v1852_v32, %v2065_v57  ;;  %2064 = vst [vmem:[%s7023_s28 + $0x24] sm:$0x1] %v2063_v44  ;;  %v2072_v49 = vsel %vm7662_vm5, %v1866_v22, %v2071_v42  ;;  %v6058_v20 = vpack.i.b16 %v1662_v21, %v1662_v21  ;;  %v1727_v56 = vunpack.i.h.s16 %v1662_v21  ;;  %v2101_v42 = vld [vmem:[%s7023_s28 + $0x58] sm:$0x1] }
 0x4e4   : > { %2067 = vst [vmem:[%s7023_s28 + $0x28] sm:$0x1] %v2066_v33  ;;  %v6059_v31 = vpack.i.b16 %v1686_v27, %v1686_v27  ;;  %v2069_v14 = vsel %vm7662_vm5, %v1859_v23, %v2068_v13  ;;  %2073 = vst [vmem:[%s7023_s28 + $0x30] sm:$0x1] %v2072_v49  ;;  %v1873_v37 = vrot.slane %v1757_v36, %v7650_v25  ;;  %v1729_v45 = vunpack.i.h.s16 %v1686_v27  ;;  %v2657_v34 = vld [vmem:[#allocation4 + $0x40] sm:$0xff]  ;;  %v7785_v13 = vld [vmem:[#allocation4 + $0x48] sm:$0xff] }
 0x4e5   : > { %v1678_v29 = vcombine.high %v7655_v38, %v7655_v38  ;;  %2070 = vst [vmem:[%s7023_s28 + $0x2c] sm:$0x1] %v2069_v14  ;;  %v1880_v30 = vrot.slane %v6058_v20, %v7650_v25  ;;  %v1759_v41 = vpack.i.b16 %v1727_v56, %v1727_v56  ;;  %v1708_v60 = vcombine.high %v1686_v27, %v1686_v27  ;;  %v2104_v36 = vld [vmem:[%s7023_s28 + $0x5c] sm:$0x1] }
 0x4e6   : > { %v1894_v28 = vrot.slane %v6059_v31, %v7650_v25  ;;  %v2075_v61 = vsel %vm7662_vm5, %v1873_v37, %v2074_v43  ;;  %v1761_v63 = vpack.i.b16 %v1729_v45, %v1729_v45  ;;  %v1693_v38 = vrot.slane %v7658_v12, %v7646_v59 }
 0x4e7   : > { %v1700_v0 = vrot.slane %v1678_v29, %v7646_v59  ;;  %2076 = vst [vmem:[%s7023_s28 + $0x34] sm:$0x1] %v2075_v61  ;;  %v2078_v1 = vsel %vm7662_vm5, %v1880_v30, %v2077_v35  ;;  %v1887_v2 = vrot.slane %v1759_v41, %v7650_v25  ;;  %v6061_v6 = vpack.i.b16 %v1708_v60, %v1708_v60  ;;  %v2119_v41 = vld [vmem:[%s7023_s28 + $0x70] sm:$0x1]  ;;  %v2113_v61 = vld [vmem:[%s7023_s28 + $0x68] sm:$0x1] }
 0x4e8   : > { %v2084_v3 = vsel %vm7662_vm5, %v1894_v28, %v2083_v17  ;;  %2079 = vst [vmem:[%s7023_s28 + $0x38] sm:$0x1] %v2078_v1  ;;  %v1901_v5 = vrot.slane %v1761_v63, %v7650_v25  ;;  %v1733_v54 = vunpack.i.h.s16 %v1708_v60  ;;  %v6063_v53 = vpack.i.b16 %v1693_v38, %v1693_v38 }
 0x4e9   : > { %2085 = vst [vmem:[%s7023_s28 + $0x40] sm:$0x1] %v2084_v3  ;;  %v6060_v39 = vpack.i.b16 %v1700_v0, %v1700_v0  ;;  %v1731_v46 = vunpack.i.h.s16 %v1700_v0  ;;  %v2081_v7 = vsel %vm7662_vm5, %v1887_v2, %v2080_v62  ;;  %v1922_v40 = vrot.slane %v6061_v6, %v7650_v25  ;;  %v2122_v2 = vld [vmem:[%s7023_s28 + $0x74] sm:$0x1]  ;;  %v2116_v6 = vld [vmem:[%s7023_s28 + $0x6c] sm:$0x1] }
 0x4ea   : > { %v1710_v47 = vcombine.high %v1700_v0, %v1700_v0  ;;  %2082 = vst [vmem:[%s7023_s28 + $0x3c] sm:$0x1] %v2081_v7  ;;  %v2087_v55 = vsel %vm7662_vm5, %v1901_v5, %v2086_v4  ;;  %v1765_v11 = vpack.i.b16 %v1733_v54, %v1733_v54  ;;  %v1950_v58 = vrot.slane %v6063_v53, %v7650_v25  ;;  %v2128_v53 = vld [vmem:[%s7023_s28 + $0x7c] sm:$0x1] }
 0x4eb   : > { %v1908_v9 = vrot.slane %v6060_v39, %v7650_v25  ;;  %v1763_v10 = vpack.i.b16 %v1731_v46, %v1731_v46  ;;  %2088 = vst [vmem:[%s7023_s28 + $0x44] sm:$0x1] %v2087_v55  ;;  %v2096_v15 = vsel %vm7662_vm5, %v1922_v40, %v2095_v52  ;;  %v1737_v24 = vunpack.i.h.s16 %v1693_v38  ;;  %v2125_v46 = vld [vmem:[%s7023_s28 + $0x78] sm:$0x1] }
 0x4ec   : > { %v6062_v26 = vpack.i.b16 %v1710_v47, %v1710_v47  ;;  %v1735_v57 = vunpack.i.h.s16 %v1710_v47  ;;  %2097 = vst [vmem:[%s7023_s28 + $0x50] sm:$0x1] %v2096_v15  ;;  %v1929_v48 = vrot.slane %v1765_v11, %v7650_v25  ;;  %v2108_v27 = vsel %vm7662_vm5, %v1950_v58, %v2107_v16  ;;  %v2659_v11 = vld [vmem:[#allocation4 + $0x50] sm:$0xff]  ;;  %v7836_v16 = vld [vmem:[#allocation4 + $0x58] sm:$0xff] }
 0x4ed   : > { %v2090_v51 = vsel %vm7662_vm5, %v1908_v9, %v2089_v8  ;;  %v1915_v32 = vrot.slane %v1763_v10, %v7650_v25  ;;  %v1679_v44 = vcombine.high %v7658_v12, %v7658_v12  ;;  %2109 = vst [vmem:[%s7023_s28 + $0x60] sm:$0x1] %v2108_v27  ;;  %v1769_v49 = vpack.i.b16 %v1737_v24, %v1737_v24  ;;  %v2110_v12 = vld [vmem:[%s7023_s28 + $0x64] sm:$0x1] }
 0x4ee   : > { %2091 = vst [vmem:[%s7023_s28 + $0x48] sm:$0x1] %v2090_v51  ;;  %v1936_v22 = vrot.slane %v6062_v26, %v7650_v25  ;;  %v1767_v21 = vpack.i.b16 %v1735_v57, %v1735_v57  ;;  %v2099_v23 = vsel %vm7662_vm5, %v1929_v48, %v2098_v19  ;;  %v1709_v43 = vcombine.high %v1693_v38, %v1693_v38  ;;  %v3086_v57 = vld [vmem:[%s7023_s28] sm:$0x2] }
 0x4ef   : > { %v2093_v33 = vsel %vm7662_vm5, %v1915_v32, %v2092_v18  ;;  %2100 = vst [vmem:[%s7023_s28 + $0x54] sm:$0x1] %v2099_v23  ;;  %v1707_v31 = vrot.slane %v1679_v44, %v7646_v59  ;;  %v2661_v14 = vpack.c.bf16 %v7785_v13, %v2657_v34  ;;  %v1957_v37 = vrot.slane %v1769_v49, %v7650_v25  ;;  %v3089_v34 = vld [vmem:[%s7023_s28 + $0x4] sm:$0x2] }
 0x4f0   : > { %2094 = vst [vmem:[%s7023_s28 + $0x4c] sm:$0x1] %v2093_v33  ;;  %v2102_v20 = vsel %vm7662_vm5, %v1936_v22, %v2101_v42  ;;  %v1943_v56 = vrot.slane %v1767_v21, %v7650_v25  ;;  %v6065_v35 = vpack.i.b16 %v1709_v43, %v1709_v43  ;;  %v1741_v17 = vunpack.i.h.s16 %v1709_v43 }
 0x4f1   : > { %2103 = vst [vmem:[%s7023_s28 + $0x58] sm:$0x1] %v2102_v20  ;;  %v6064_v29 = vpack.i.b16 %v1707_v31, %v1707_v31  ;;  %v1739_v30 = vunpack.i.h.s16 %v1707_v31  ;;  %v1711_v28 = vcombine.high %v1707_v31, %v1707_v31  ;;  %v2111_v60 = vsel %vm7662_vm5, %v1957_v37, %v2110_v12  ;;  %v3101_v37 = vld [vmem:[%s7023_s28 + $0x14] sm:$0x2] }
 0x4f2   : > { %v2105_v45 = vsel %vm7662_vm5, %v1943_v56, %v2104_v36  ;;  %v1978_v62 = vrot.slane %v6065_v35, %v7650_v25  ;;  %v1773_v63 = vpack.i.b16 %v1741_v17, %v1741_v17  ;;  %v2672_v0 = vrot.slane %v2661_v14, %v7646_v59  ;;  %2112 = vst [vmem:[%s7023_s28 + $0x64] sm:$0x1] %v2111_v60  ;;  %v3095_v17 = vld [vmem:[%s7023_s28 + $0xc] sm:$0x2] }
 0x4f3   : > { %2106 = vst [vmem:[%s7023_s28 + $0x5c] sm:$0x1] %v2105_v45  ;;  %v1964_v38 = vrot.slane %v6064_v29, %v7650_v25  ;;  %v1771_v1 = vpack.i.b16 %v1739_v30, %v1739_v30  ;;  %v6066_v3 = vpack.i.b16 %v1711_v28, %v1711_v28  ;;  %v1743_v4 = vunpack.i.h.s16 %v1711_v28 }
 0x4f4   : > { %v2120_v5 = vsel %vm7662_vm5, %v1978_v62, %v2119_v41  ;;  %v1985_v39 = vrot.slane %v1773_v63, %v7650_v25  ;;  %v2688_v52 = vrot.slane %v2672_v0, %v7646_v59  ;;  %v2680_v10 = vcombine.high %v2672_v0, %v2672_v0 }
 0x4f5   : > { %v2114_v54 = vsel %vm7662_vm5, %v1964_v38, %v2113_v61  ;;  %v1971_v7 = vrot.slane %v1771_v1, %v7650_v25  ;;  %2121 = vst [vmem:[%s7023_s28 + $0x70] sm:$0x1] %v2120_v5  ;;  %v1992_v8 = vrot.slane %v6066_v3, %v7650_v25  ;;  %v1775_v40 = vpack.i.b16 %v1743_v4, %v1743_v4  ;;  %v3104_v61 = vld [vmem:[%s7023_s28 + $0x18] sm:$0x2]  ;;  %v3107_v4 = vld [vmem:[%s7023_s28 + $0x1c] sm:$0x2] }
 0x4f6   : > { %2115 = vst [vmem:[%s7023_s28 + $0x68] sm:$0x1] %v2114_v54  ;;  %v2123_v47 = vsel %vm7662_vm5, %v1985_v39, %v2122_v2  ;;  %v6087_v55 = vpack.i.b16 %v2688_v52, %v2688_v52  ;;  %v2764_v9 = vunpack.i.h.s16 %v2688_v52  ;;  %v2710_v58 = vcombine.high %v2688_v52, %v2688_v52  ;;  %v3110_v54 = vld [vmem:[%s7023_s28 + $0x20] sm:$0x2] }
 0x4f7   : > { %v2117_v18 = vsel %vm7662_vm5, %v1971_v7, %v2116_v6  ;;  %2124 = vst [vmem:[%s7023_s28 + $0x74] sm:$0x1] %v2123_v47  ;;  %v2126_v15 = vsel %vm7662_vm5, %v1992_v8, %v2125_v46  ;;  %v1999_v19 = vrot.slane %v1775_v40, %v7650_v25  ;;  %v2702_v48 = vrot.slane %v2680_v10, %v7646_v59  ;;  %v3113_v10 = vld [vmem:[%s7023_s28 + $0x24] sm:$0x2] }
 0x4f8   : > { %2118 = vst [vmem:[%s7023_s28 + $0x6c] sm:$0x1] %v2117_v18  ;;  %2127 = vst [vmem:[%s7023_s28 + $0x78] sm:$0x1] %v2126_v15  ;;  %v2833_v51 = vrot.slane %v6087_v55, %v7650_v25  ;;  %v2796_v32 = vpack.i.b16 %v2764_v9, %v2764_v9  ;;  %v6085_v42 = vpack.c.bf16 %v7785_v13, %v7785_v13  ;;  %v2768_v21 = vunpack.i.h.s16 %v2710_v58  ;;  %v3098_v13 = vld [vmem:[%s7023_s28 + $0x10] sm:$0x2] }
 0x4f9   : > { %v2129_v24 = vsel %vm7662_vm5, %v1999_v19, %v2128_v53  ;;  %v6089_v22 = vpack.i.b16 %v2710_v58, %v2710_v58  ;;  %v2662_v27 = vpack.c.bf16 %v7836_v16, %v2659_v11  ;;  %v6088_v23 = vpack.i.b16 %v2702_v48, %v2702_v48  ;;  %v3116_v11 = vld [vmem:[%s7023_s28 + $0x28] sm:$0x2] }
 0x4fa   : > { %2130 = vst [vmem:[%s7023_s28 + $0x7c] sm:$0x1] %v2129_v24  ;;  %v3087_v44 = vsel %vm7846_vm8, %v2833_v51, %v3086_v57  ;;  %v2840_v33 = vrot.slane %v2796_v32, %v7650_v25  ;;  %v2766_v36 = vunpack.i.h.s16 %v2702_v48  ;;  %v2800_v43 = vpack.i.b16 %v2768_v21, %v2768_v21 }
 0x4fb   : > { %3088 = vst [vmem:[%s7023_s28] sm:$0x2] %v3087_v44  ;;  %v2861_v49 = vrot.slane %v6089_v22, %v7650_v25  ;;  %v2712_v20 = vcombine.high %v2702_v48, %v2702_v48  ;;  %v2679_v56 = vrot.slane %v6085_v42, %v7646_v59  ;;  %v2847_v31 = vrot.slane %v6088_v23, %v7650_v25  ;;  %v3122_v48 = vld [vmem:[%s7023_s28 + $0x30] sm:$0x2]  ;;  %v3119_v42 = vld [vmem:[%s7023_s28 + $0x2c] sm:$0x2] }
 0x4fc   : > { %v3090_v12 = vsel %vm7846_vm8, %v2840_v33, %v3089_v34  ;;  %v2798_v14 = vpack.i.b16 %v2766_v36, %v2766_v36  ;;  %v7875_v35 = vrot.slane %v2662_v27, %v7646_v59  ;;  %v2868_v29 = vrot.slane %v2800_v43, %v7650_v25  ;;  %v3134_v27 = vld [vmem:[%s7023_s28 + $0x40] sm:$0x2]  ;;  %v3125_v36 = vld [vmem:[%s7023_s28 + $0x34] sm:$0x2] }
 0x4fd   : > { %3091 = vst [vmem:[%s7023_s28 + $0x4] sm:$0x2] %v3090_v12  ;;  %v3099_v45 = vsel %vm7846_vm8, %v2861_v49, %v3098_v13  ;;  %v6090_v30 = vpack.i.b16 %v2712_v20, %v2712_v20  ;;  %v2770_v41 = vunpack.i.h.s16 %v2712_v20  ;;  %v3093_v28 = vsel %vm7846_vm8, %v2847_v31, %v3092_v50  ;;  %v3128_v13 = vld [vmem:[%s7023_s28 + $0x38] sm:$0x2]  ;;  %v3708_v12 = vld [vmem:[#allocation4 + $0x80] sm:$0xff]  ;;  %v7938_v31 = vld [vmem:[#allocation4 + $0x88] sm:$0xff] }
 0x4fe   : > { %v2854_v60 = vrot.slane %v2798_v14, %v7650_v25  ;;  %3100 = vst [vmem:[%s7023_s28 + $0x10] sm:$0x2] %v3099_v45  ;;  %v2695_v62 = vrot.slane %v2679_v56, %v7646_v59  ;;  %v2681_v63 = vcombine.high %v2679_v56, %v2679_v56  ;;  %3094 = vst [vmem:[%s7023_s28 + $0x8] sm:$0x2] %v3093_v28  ;;  %vm4660_vm4 = vsmask.f32 7946 }
 0x4ff   : > { %v3102_v0 = vsel %vm7846_vm8, %v2868_v29, %v3101_v37  ;;  %v2875_v38 = vrot.slane %v6090_v30, %v7650_v25  ;;  %v2802_v1 = vpack.i.b16 %v2770_v41, %v2770_v41  ;;  %v7894_v2 = vrot.slane %v7875_v35, %v7646_v59  ;;  %v3131_v37 = vld [vmem:[%s7023_s28 + $0x3c] sm:$0x2]  ;;  %vm8854_vm9 = vmand %vm4134_vm10, %vm4660_vm4 }
 0x500   : > { %v3096_v3 = vsel %vm7846_vm8, %v2854_v60, %v3095_v17  ;;  %3103 = vst [vmem:[%s7023_s28 + $0x14] sm:$0x2] %v3102_v0  ;;  %v6091_v6 = vpack.i.b16 %v2695_v62, %v2695_v62  ;;  %v2772_v5 = vunpack.i.h.s16 %v2695_v62  ;;  %v2709_v39 = vrot.slane %v2681_v63, %v7646_v59 }
 0x501   : > { %3097 = vst [vmem:[%s7023_s28 + $0xc] sm:$0x2] %v3096_v3  ;;  %v3105_v46 = vsel %vm7846_vm8, %v2875_v38, %v3104_v61  ;;  %v2882_v52 = vrot.slane %v2802_v1, %v7650_v25  ;;  %v2711_v7 = vcombine.high %v2695_v62, %v2695_v62  ;;  %v6095_v8 = vpack.i.b16 %v7894_v2, %v7894_v2  ;;  %v3137_v38 = vld [vmem:[%s7023_s28 + $0x44] sm:$0x2] }
 0x502   : > { %3106 = vst [vmem:[%s7023_s28 + $0x18] sm:$0x2] %v3105_v46  ;;  %v2889_v40 = vrot.slane %v6091_v6, %v7650_v25  ;;  %v2804_v47 = vpack.i.b16 %v2772_v5, %v2772_v5  ;;  %v6092_v53 = vpack.i.b16 %v2709_v39, %v2709_v39  ;;  %v2774_v55 = vunpack.i.h.s16 %v2709_v39  ;;  %v3146_v5 = vld [vmem:[%s7023_s28 + $0x50] sm:$0x2]  ;;  %v3140_v46 = vld [vmem:[%s7023_s28 + $0x48] sm:$0x2] }
 0x503   : > { %v3108_v9 = vsel %vm7846_vm8, %v2882_v52, %v3107_v4  ;;  %v6093_v18 = vpack.i.b16 %v2711_v7, %v2711_v7  ;;  %v2776_v15 = vunpack.i.h.s16 %v2711_v7  ;;  %v2713_v19 = vcombine.high %v2709_v39, %v2709_v39 }
 0x504   : > { %3109 = vst [vmem:[%s7023_s28 + $0x1c] sm:$0x2] %v3108_v9  ;;  %v3111_v57 = vsel %vm7846_vm8, %v2889_v40, %v3110_v54  ;;  %v2896_v58 = vrot.slane %v2804_v47, %v7650_v25  ;;  %v2903_v51 = vrot.slane %v6092_v53, %v7650_v25  ;;  %v2806_v32 = vpack.i.b16 %v2774_v55, %v2774_v55  ;;  %v3149_v53 = vld [vmem:[%s7023_s28 + $0x54] sm:$0x2]  ;;  %v3143_v9 = vld [vmem:[%s7023_s28 + $0x4c] sm:$0x2] }
 0x505   : > { %3112 = vst [vmem:[%s7023_s28 + $0x20] sm:$0x2] %v3111_v57  ;;  %v2917_v24 = vrot.slane %v6093_v18, %v7650_v25  ;;  %v2808_v34 = vpack.i.b16 %v2776_v15, %v2776_v15  ;;  %v6094_v22 = vpack.i.b16 %v2713_v19, %v2713_v19  ;;  %v2778_v21 = vunpack.i.h.s16 %v2713_v19  ;;  %v3152_v18 = vld [vmem:[%s7023_s28 + $0x58] sm:$0x2] }
 0x506   : > { %v3114_v44 = vsel %vm7846_vm8, %v2896_v58, %v3113_v10  ;;  %v3117_v33 = vsel %vm7846_vm8, %v2903_v51, %v3116_v11  ;;  %v2910_v23 = vrot.slane %v2806_v32, %v7650_v25  ;;  %v2945_v50 = vrot.slane %v6095_v8, %v7650_v25 }
 0x507   : > { %3115 = vst [vmem:[%s7023_s28 + $0x24] sm:$0x2] %v3114_v44  ;;  %3118 = vst [vmem:[%s7023_s28 + $0x28] sm:$0x2] %v3117_v33  ;;  %v3123_v49 = vsel %vm7846_vm8, %v2917_v24, %v3122_v48  ;;  %v2924_v43 = vrot.slane %v2808_v34, %v7650_v25  ;;  %v2931_v20 = vrot.slane %v6094_v22, %v7650_v25  ;;  %v2780_v45 = vunpack.i.h.s16 %v7894_v2  ;;  %v3158_v44 = vld [vmem:[%s7023_s28 + $0x60] sm:$0x2] }
 0x508   : > { %v2810_v56 = vpack.i.b16 %v2778_v21, %v2778_v21  ;;  %v3120_v14 = vsel %vm7846_vm8, %v2910_v23, %v3119_v42  ;;  %3124 = vst [vmem:[%s7023_s28 + $0x30] sm:$0x2] %v3123_v49  ;;  %v3135_v17 = vsel %vm7846_vm8, %v2945_v50, %v3134_v27  ;;  %v2729_v29 = vcombine.high %v7875_v35, %v7875_v35  ;;  %v3155_v27 = vld [vmem:[%s7023_s28 + $0x5c] sm:$0x2] }
 0x509   : > { %3121 = vst [vmem:[%s7023_s28 + $0x2c] sm:$0x2] %v3120_v14  ;;  %v3126_v30 = vsel %vm7846_vm8, %v2924_v43, %v3125_v36  ;;  %v3129_v41 = vsel %vm7846_vm8, %v2931_v20, %v3128_v13  ;;  %3136 = vst [vmem:[%s7023_s28 + $0x40] sm:$0x2] %v3135_v17  ;;  %v2759_v60 = vcombine.high %v7894_v2, %v7894_v2  ;;  %v3161_v43 = vld [vmem:[%s7023_s28 + $0x64] sm:$0x2] }
 0x50a   : > { %v2938_v28 = vrot.slane %v2810_v56, %v7650_v25  ;;  %3127 = vst [vmem:[%s7023_s28 + $0x34] sm:$0x2] %v3126_v30  ;;  %3130 = vst [vmem:[%s7023_s28 + $0x38] sm:$0x2] %v3129_v41  ;;  %v2812_v61 = vpack.i.b16 %v2780_v45, %v2780_v45  ;;  %v2751_v35 = vrot.slane %v2729_v29, %v7646_v59  ;;  %v3164_v29 = vld [vmem:[%s7023_s28 + $0x68] sm:$0x2] }
 0x50b   : > { %v6086_v62 = vpack.c.bf16 %v7836_v16, %v7836_v16  ;;  %v3712_v63 = vpack.c.bf16 %v7938_v31, %v3708_v12  ;;  %v6097_v1 = vpack.i.b16 %v2759_v60, %v2759_v60  ;;  %v2784_v3 = vunpack.i.h.s16 %v2759_v60  ;;  %v3170_v30 = vld [vmem:[%s7023_s28 + $0x70] sm:$0x2] }
 0x50c   : > { %v3132_v0 = vsel %vm7846_vm8, %v2938_v28, %v3131_v37  ;;  %v2952_v2 = vrot.slane %v2812_v61, %v7650_v25  ;;  %v6096_v4 = vpack.i.b16 %v2751_v35, %v2751_v35  ;;  %v2782_v6 = vunpack.i.h.s16 %v2751_v35 }
 0x50d   : > { %3133 = vst [vmem:[%s7023_s28 + $0x3c] sm:$0x2] %v3132_v0  ;;  %v2761_v39 = vcombine.high %v2751_v35, %v2751_v35  ;;  %v2973_v16 = vrot.slane %v6097_v1, %v7650_v25  ;;  %v2816_v52 = vpack.i.b16 %v2784_v3, %v2784_v3  ;;  %v2728_v54 = vrot.slane %v6086_v62, %v7646_v59  ;;  %v3173_v0 = vld [vmem:[%s7023_s28 + $0x74] sm:$0x2] }
 0x50e   : > { %v7974_v7 = vrot.slane %v3712_v63, %v7646_v59  ;;  %v3138_v8 = vsel %vm7846_vm8, %v2952_v2, %v3137_v38  ;;  %v2959_v40 = vrot.slane %v6096_v4, %v7650_v25  ;;  %v2814_v47 = vpack.i.b16 %v2782_v6, %v2782_v6  ;;  %v3167_v63 = vld [vmem:[%s7023_s28 + $0x6c] sm:$0x2] }
 0x50f   : > { %v6098_v55 = vpack.i.b16 %v2761_v39, %v2761_v39  ;;  %3139 = vst [vmem:[%s7023_s28 + $0x44] sm:$0x2] %v3138_v8  ;;  %v3147_v10 = vsel %vm7846_vm8, %v2973_v16, %v3146_v5  ;;  %v2980_v11 = vrot.slane %v2816_v52, %v7650_v25  ;;  %v2786_v15 = vunpack.i.h.s16 %v2761_v39  ;;  %v3176_v39 = vld [vmem:[%s7023_s28 + $0x78] sm:$0x2]  ;;  %v4137_v16 = vld [vmem:[%s7023_s28] sm:$0x4] }
 0x510   : > { %v2744_v19 = vrot.slane %v2728_v54, %v7646_v59  ;;  %v3141_v57 = vsel %vm7846_vm8, %v2959_v40, %v3140_v46  ;;  %v2966_v58 = vrot.slane %v2814_v47, %v7650_v25  ;;  %3148 = vst [vmem:[%s7023_s28 + $0x50] sm:$0x2] %v3147_v10  ;;  %v2730_v32 = vcombine.high %v2728_v54, %v2728_v54  ;;  %v3710_v40 = vld [vmem:[#allocation4 + $0x90] sm:$0xff]  ;;  %v8044_v47 = vld [vmem:[#allocation4 + $0x98] sm:$0xff] }
 0x511   : > { %v2987_v51 = vrot.slane %v6098_v55, %v7650_v25  ;;  %3142 = vst [vmem:[%s7023_s28 + $0x48] sm:$0x2] %v3141_v57  ;;  %v3150_v48 = vsel %vm7846_vm8, %v2980_v11, %v3149_v53  ;;  %v2818_v42 = vpack.i.b16 %v2786_v15, %v2786_v15  ;;  %v3739_v49 = vrot.slane %v7974_v7, %v7646_v59 }
 0x512   : > { %v6099_v24 = vpack.i.b16 %v2744_v19, %v2744_v19  ;;  %v2788_v34 = vunpack.i.h.s16 %v2744_v19  ;;  %v3144_v22 = vsel %vm7846_vm8, %v2966_v58, %v3143_v9  ;;  %3151 = vst [vmem:[%s7023_s28 + $0x54] sm:$0x2] %v3150_v48  ;;  %v2758_v33 = vrot.slane %v2730_v32, %v7646_v59  ;;  %v3179_v9 = vld [vmem:[%s7023_s28 + $0x7c] sm:$0x2] }
 0x513   : > { %v3153_v21 = vsel %vm7846_vm8, %v2987_v51, %v3152_v18  ;;  %v2760_v23 = vcombine.high %v2744_v19, %v2744_v19  ;;  %3145 = vst [vmem:[%s7023_s28 + $0x4c] sm:$0x2] %v3144_v22  ;;  %v2994_v36 = vrot.slane %v2818_v42, %v7650_v25  ;;  %v6123_v3 = vpack.i.b16 %v3739_v49, %v3739_v49  ;;  %v4140_v42 = vld [vmem:[%s7023_s28 + $0x4] sm:$0x4] }
 0x514   : > { %3154 = vst [vmem:[%s7023_s28 + $0x58] sm:$0x2] %v3153_v21  ;;  %v3001_v13 = vrot.slane %v6099_v24, %v7650_v25  ;;  %v2820_v50 = vpack.i.b16 %v2788_v34, %v2788_v34  ;;  %v6100_v20 = vpack.i.b16 %v2758_v33, %v2758_v33  ;;  %v2790_v56 = vunpack.i.h.s16 %v2758_v33 }
 0x515   : > { %v6101_v12 = vpack.i.b16 %v2760_v23, %v2760_v23  ;;  %v2792_v14 = vunpack.i.h.s16 %v2760_v23  ;;  %v3156_v37 = vsel %vm7846_vm8, %v2994_v36, %v3155_v27  ;;  %v2762_v41 = vcombine.high %v2758_v33, %v2758_v33  ;;  %v4143_v23 = vld [vmem:[%s7023_s28 + $0x8] sm:$0x4] }
 0x516   : > { %v3159_v17 = vsel %vm7846_vm8, %v3001_v13, %v3158_v44  ;;  %v3008_v45 = vrot.slane %v2820_v50, %v7650_v25  ;;  %3157 = vst [vmem:[%s7023_s28 + $0x5c] sm:$0x2] %v3156_v37  ;;  %v3015_v28 = vrot.slane %v6100_v20, %v7650_v25  ;;  %v2822_v60 = vpack.i.b16 %v2790_v56, %v2790_v56  ;;  %v4152_v56 = vld [vmem:[%s7023_s28 + $0x14] sm:$0x4] }
 0x517   : > { %3160 = vst [vmem:[%s7023_s28 + $0x60] sm:$0x2] %v3159_v17  ;;  %v3029_v61 = vrot.slane %v6101_v12, %v7650_v25  ;;  %v2824_v35 = vpack.i.b16 %v2792_v14, %v2792_v14  ;;  %v6102_v38 = vpack.i.b16 %v2762_v41, %v2762_v41  ;;  %v2794_v1 = vunpack.i.h.s16 %v2762_v41  ;;  %v4146_v14 = vld [vmem:[%s7023_s28 + $0xc] sm:$0x4] }
 0x518   : > { %v3162_v62 = vsel %vm7846_vm8, %v3008_v45, %v3161_v43  ;;  %v3165_v2 = vsel %vm7846_vm8, %v3015_v28, %v3164_v29  ;;  %v3022_v4 = vrot.slane %v2822_v60, %v7650_v25  ;;  %v3884_v8 = vrot.slane %v6123_v3, %v7650_v25  ;;  %v4155_v45 = vld [vmem:[%s7023_s28 + $0x18] sm:$0x4]  ;;  %v4158_v3 = vld [vmem:[%s7023_s28 + $0x1c] sm:$0x4] }
 0x519   : > { %3163 = vst [vmem:[%s7023_s28 + $0x64] sm:$0x2] %v3162_v62  ;;  %v3171_v6 = vsel %vm7846_vm8, %v3029_v61, %v3170_v30  ;;  %v3036_v5 = vrot.slane %v2824_v35, %v7650_v25  ;;  %3166 = vst [vmem:[%s7023_s28 + $0x68] sm:$0x2] %v3165_v2  ;;  %v3043_v52 = vrot.slane %v6102_v38, %v7650_v25  ;;  %v3815_v10 = vunpack.i.h.s16 %v3739_v49  ;;  %v4161_v2 = vld [vmem:[%s7023_s28 + $0x20] sm:$0x4] }
 0x51a   : > { %3172 = vst [vmem:[%s7023_s28 + $0x70] sm:$0x2] %v3171_v6  ;;  %v2826_v54 = vpack.i.b16 %v2794_v1, %v2794_v1  ;;  %v3168_v53 = vsel %vm7846_vm8, %v3022_v4, %v3167_v63  ;;  %v3731_v11 = vcombine.high %v7974_v7, %v7974_v7  ;;  %v4138_v19 = vsel %vm8035_vm12, %v3884_v8, %v4137_v16 }
 0x51b   : > { %v3174_v55 = vsel %vm7846_vm8, %v3036_v5, %v3173_v0  ;;  %3169 = vst [vmem:[%s7023_s28 + $0x6c] sm:$0x2] %v3168_v53  ;;  %v3177_v18 = vsel %vm7846_vm8, %v3043_v52, %v3176_v39  ;;  %v3761_v57 = vcombine.high %v3739_v49, %v3739_v49  ;;  %4139 = vst [vmem:[%s7023_s28] sm:$0x4] %v4138_v19  ;;  %vm5711_vm5 = vsmask.f32 7950 }
 0x51c   : > { %3175 = vst [vmem:[%s7023_s28 + $0x74] sm:$0x2] %v3174_v55  ;;  %v3050_v15 = vrot.slane %v2826_v54, %v7650_v25  ;;  %3178 = vst [vmem:[%s7023_s28 + $0x78] sm:$0x2] %v3177_v18  ;;  %v3847_v58 = vpack.i.b16 %v3815_v10, %v3815_v10  ;;  %v3753_v51 = vrot.slane %v3731_v11, %v7646_v59  ;;  %v4164_v54 = vld [vmem:[%s7023_s28 + $0x24] sm:$0x4] }
 0x51d   : > { %v6121_v7 = vpack.c.bf16 %v7938_v31, %v7938_v31  ;;  %v3713_v32 = vpack.c.bf16 %v8044_v47, %v3710_v40  ;;  %v6125_v24 = vpack.i.b16 %v3761_v57, %v3761_v57  ;;  %v3819_v34 = vunpack.i.h.s16 %v3761_v57  ;;  %v4149_v31 = vld [vmem:[%s7023_s28 + $0x10] sm:$0x4]  ;;  %v4167_v18 = vld [vmem:[%s7023_s28 + $0x28] sm:$0x4]  ;;  %vm9036_vm6 = vmand %vm5185_vm13, %vm5711_vm5 }
 0x51e   : > { %v3180_v48 = vsel %vm7846_vm8, %v3050_v15, %v3179_v9  ;;  %v6122_v22 = vpack.c.bf16 %v8044_v47, %v8044_v47  ;;  %v3891_v21 = vrot.slane %v3847_v58, %v7650_v25  ;;  %v6124_v27 = vpack.i.b16 %v3753_v51, %v3753_v51  ;;  %v4173_v15 = vld [vmem:[%s7023_s28 + $0x30] sm:$0x4] }
 0x51f   : > { %3181 = vst [vmem:[%s7023_s28 + $0x7c] sm:$0x2] %v3180_v48  ;;  %v3817_v44 = vunpack.i.h.s16 %v3753_v51  ;;  %v3763_v33 = vcombine.high %v3753_v51, %v3753_v51  ;;  %v3912_v26 = vrot.slane %v6125_v24, %v7650_v25  ;;  %v3851_v36 = vpack.i.b16 %v3819_v34, %v3819_v34  ;;  %v4170_v48 = vld [vmem:[%s7023_s28 + $0x2c] sm:$0x4] }
 0x520   : > { %v3730_v13 = vrot.slane %v6121_v7, %v7646_v59  ;;  %v8078_v50 = vrot.slane %v3713_v32, %v7646_v59  ;;  %v4141_v49 = vsel %vm8035_vm12, %v3891_v21, %v4140_v42  ;;  %v3898_v43 = vrot.slane %v6124_v27, %v7650_v25  ;;  %v4176_v42 = vld [vmem:[%s7023_s28 + $0x34] sm:$0x4] }
 0x521   : > { %v3849_v20 = vpack.i.b16 %v3817_v44, %v3817_v44  ;;  %v6126_v12 = vpack.i.b16 %v3763_v33, %v3763_v33  ;;  %4142 = vst [vmem:[%s7023_s28 + $0x4] sm:$0x4] %v4141_v49  ;;  %v4150_v37 = vsel %vm8035_vm12, %v3912_v26, %v4149_v31  ;;  %v3919_v17 = vrot.slane %v3851_v36, %v7650_v25  ;;  %v4185_v26 = vld [vmem:[%s7023_s28 + $0x40] sm:$0x4] }
 0x522   : > { %v3821_v29 = vunpack.i.h.s16 %v3763_v33  ;;  %v3746_v30 = vrot.slane %v3730_v13, %v7646_v59  ;;  %v4144_v41 = vsel %vm8035_vm12, %v3898_v43, %v4143_v23  ;;  %4151 = vst [vmem:[%s7023_s28 + $0x10] sm:$0x4] %v4150_v37  ;;  %v3732_v61 = vcombine.high %v3730_v13, %v3730_v13  ;;  %v4179_v23 = vld [vmem:[%s7023_s28 + $0x38] sm:$0x4] }
 0x523   : > { %v3905_v28 = vrot.slane %v3849_v20, %v7650_v25  ;;  %v3926_v60 = vrot.slane %v6126_v12, %v7650_v25  ;;  %4145 = vst [vmem:[%s7023_s28 + $0x8] sm:$0x4] %v4144_v41  ;;  %v4153_v35 = vsel %vm8035_vm12, %v3919_v17, %v4152_v56  ;;  %v3788_v52 = vrot.slane %v8078_v50, %v7646_v59  ;;  %v4182_v12 = vld [vmem:[%s7023_s28 + $0x3c] sm:$0x4]  ;;  %v8149_v17 = vld [vmem:[#allocation4 + $0xc0] sm:$0xff] }
 0x524   : > { %v3853_v62 = vpack.i.b16 %v3821_v29, %v3821_v29  ;;  %v6127_v63 = vpack.i.b16 %v3746_v30, %v3746_v30  ;;  %v3823_v0 = vunpack.i.h.s16 %v3746_v30  ;;  %4154 = vst [vmem:[%s7023_s28 + $0x14] sm:$0x4] %v4153_v35  ;;  %v3760_v4 = vrot.slane %v3732_v61, %v7646_v59 }
 0x525   : > { %v4147_v38 = vsel %vm8035_vm12, %v3905_v28, %v4146_v14  ;;  %v4156_v1 = vsel %vm8035_vm12, %v3926_v60, %v4155_v45  ;;  %v3762_v6 = vcombine.high %v3746_v30, %v3746_v30  ;;  %v6131_v21 = vpack.i.b16 %v3788_v52, %v3788_v52  ;;  %v8151_v45 = vld [vmem:[#allocation4 + $0xc8] sm:$0xff] }
 0x526   : > { %4148 = vst [vmem:[%s7023_s28 + $0xc] sm:$0x4] %v4147_v38  ;;  %4157 = vst [vmem:[%s7023_s28 + $0x18] sm:$0x4] %v4156_v1  ;;  %v3933_v5 = vrot.slane %v3853_v62, %v7650_v25  ;;  %v3940_v39 = vrot.slane %v6127_v63, %v7650_v25  ;;  %v3855_v16 = vpack.i.b16 %v3823_v0, %v3823_v0  ;;  %v3825_v40 = vunpack.i.h.s16 %v3760_v4  ;;  %v4197_v38 = vld [vmem:[%s7023_s28 + $0x50] sm:$0x4] }
 0x527   : > { %v6128_v8 = vpack.i.b16 %v3760_v4, %v3760_v4  ;;  %v6129_v53 = vpack.i.b16 %v3762_v6, %v3762_v6  ;;  %v3827_v55 = vunpack.i.h.s16 %v3762_v6  ;;  %v3764_v19 = vcombine.high %v3760_v4, %v3760_v4 }
 0x528   : > { %v4159_v9 = vsel %vm8035_vm12, %v3933_v5, %v4158_v3  ;;  %v4162_v10 = vsel %vm8035_vm12, %v3940_v39, %v4161_v2  ;;  %v3947_v11 = vrot.slane %v3855_v16, %v7650_v25  ;;  %v3857_v58 = vpack.i.b16 %v3825_v40, %v3825_v40  ;;  %v4200_v5 = vld [vmem:[%s7023_s28 + $0x54] sm:$0x4] }
 0x529   : > { %4160 = vst [vmem:[%s7023_s28 + $0x1c] sm:$0x4] %v4159_v9  ;;  %4163 = vst [vmem:[%s7023_s28 + $0x20] sm:$0x4] %v4162_v10  ;;  %v3954_v57 = vrot.slane %v6128_v8, %v7650_v25  ;;  %v3968_v51 = vrot.slane %v6129_v53, %v7650_v25  ;;  %v3859_v7 = vpack.i.b16 %v3827_v55, %v3827_v55  ;;  %v3829_v34 = vunpack.i.h.s16 %v3764_v19  ;;  %v4194_v55 = vld [vmem:[%s7023_s28 + $0x4c] sm:$0x4] }
 0x52a   : > { %v4165_v32 = vsel %vm8035_vm12, %v3947_v11, %v4164_v54  ;;  %v6130_v24 = vpack.i.b16 %v3764_v19, %v3764_v19  ;;  %v3961_v44 = vrot.slane %v3857_v58, %v7650_v25  ;;  %v3996_v49 = vrot.slane %v6131_v21, %v7650_v25  ;;  %v4203_v58 = vld [vmem:[%s7023_s28 + $0x58] sm:$0x4]  ;;  %v4206_v21 = vld [vmem:[%s7023_s28 + $0x5c] sm:$0x4] }
 0x52b   : > { %4166 = vst [vmem:[%s7023_s28 + $0x24] sm:$0x4] %v4165_v32  ;;  %v4168_v27 = vsel %vm8035_vm12, %v3954_v57, %v4167_v18  ;;  %v4174_v31 = vsel %vm8035_vm12, %v3968_v51, %v4173_v15  ;;  %v3975_v33 = vrot.slane %v3859_v7, %v7650_v25  ;;  %v3861_v13 = vpack.i.b16 %v3829_v34, %v3829_v34  ;;  %v4209_v51 = vld [vmem:[%s7023_s28 + $0x60] sm:$0x4] }
 0x52c   : > { %4169 = vst [vmem:[%s7023_s28 + $0x28] sm:$0x4] %v4168_v27  ;;  %4175 = vst [vmem:[%s7023_s28 + $0x30] sm:$0x4] %v4174_v31  ;;  %v3982_v36 = vrot.slane %v6130_v24, %v7650_v25  ;;  %v3831_v43 = vunpack.i.h.s16 %v3788_v52  ;;  %v4171_v20 = vsel %vm8035_vm12, %v3961_v44, %v4170_v48  ;;  %v3780_v14 = vcombine.high %v8078_v50, %v8078_v50  ;;  %v4188_v50 = vld [vmem:[%s7023_s28 + $0x44] sm:$0x4] }
 0x52d   : > { %v4177_v56 = vsel %vm8035_vm12, %v3975_v33, %v4176_v42  ;;  %v3810_v37 = vcombine.high %v3788_v52, %v3788_v52  ;;  %4172 = vst [vmem:[%s7023_s28 + $0x2c] sm:$0x4] %v4171_v20  ;;  %v3989_v30 = vrot.slane %v3861_v13, %v7650_v25  ;;  %v4186_v41 = vsel %vm8035_vm12, %v3996_v49, %v4185_v26  ;;  %v4212_v27 = vld [vmem:[%s7023_s28 + $0x64] sm:$0x4]  ;;  %v4215_v49 = vld [vmem:[%s7023_s28 + $0x68] sm:$0x4] }
 0x52e   : > { %4178 = vst [vmem:[%s7023_s28 + $0x34] sm:$0x4] %v4177_v56  ;;  %v4180_v29 = vsel %vm8035_vm12, %v3982_v36, %v4179_v23  ;;  %v3863_v28 = vpack.i.b16 %v3831_v43, %v3831_v43  ;;  %4187 = vst [vmem:[%s7023_s28 + $0x40] sm:$0x4] %v4186_v41  ;;  %v3802_v60 = vrot.slane %v3780_v14, %v7646_v59 }
 0x52f   : > { %4181 = vst [vmem:[%s7023_s28 + $0x38] sm:$0x4] %v4180_v29  ;;  %v6133_v61 = vpack.i.b16 %v3810_v37, %v3810_v37  ;;  %v3835_v35 = vunpack.i.h.s16 %v3810_v37  ;;  %v3779_v62 = vrot.slane %v6122_v22, %v7646_v59  ;;  %v4183_v63 = vsel %vm8035_vm12, %v3989_v30, %v4182_v12  ;;  %v4191_v22 = vld [vmem:[%s7023_s28 + $0x48] sm:$0x4]  ;;  %v4221_v29 = vld [vmem:[%s7023_s28 + $0x70] sm:$0x4] }
 0x530   : > { %v4003_v0 = vrot.slane %v3863_v28, %v7650_v25  ;;  %v4763_v1 = vpack.c.bf16 %v8151_v45, %v8149_v17  ;;  %4184 = vst [vmem:[%s7023_s28 + $0x3c] sm:$0x4] %v4183_v63  ;;  %v6132_v3 = vpack.i.b16 %v3802_v60, %v3802_v60  ;;  %v3833_v2 = vunpack.i.h.s16 %v3802_v60  ;;  %v4218_v17 = vld [vmem:[%s7023_s28 + $0x6c] sm:$0x4] }
 0x531   : > { %v4024_v4 = vrot.slane %v6133_v61, %v7650_v25  ;;  %v3867_v6 = vpack.i.b16 %v3835_v35, %v3835_v35  ;;  %v3812_v39 = vcombine.high %v3802_v60, %v3802_v60  ;;  %v3795_v16 = vrot.slane %v3779_v62, %v7646_v59  ;;  %v4224_v35 = vld [vmem:[%s7023_s28 + $0x74] sm:$0x4] }
 0x532   : > { %v4189_v47 = vsel %vm8035_vm12, %v4003_v0, %v4188_v50  ;;  %v3781_v52 = vcombine.high %v3779_v62, %v3779_v62  ;;  %v4010_v54 = vrot.slane %v6132_v3, %v7650_v25  ;;  %v3865_v8 = vpack.i.b16 %v3833_v2, %v3833_v2  ;;  %v4227_v2 = vld [vmem:[%s7023_s28 + $0x78] sm:$0x4] }
 0x533   : > { %4190 = vst [vmem:[%s7023_s28 + $0x44] sm:$0x4] %v4189_v47  ;;  %v4198_v40 = vsel %vm8035_vm12, %v4024_v4, %v4197_v38  ;;  %v4031_v53 = vrot.slane %v3867_v6, %v7650_v25  ;;  %v6134_v9 = vpack.i.b16 %v3812_v39, %v3812_v39  ;;  %v3837_v10 = vunpack.i.h.s16 %v3812_v39 }
 0x534   : > { %4199 = vst [vmem:[%s7023_s28 + $0x50] sm:$0x4] %v4198_v40  ;;  %v6135_v11 = vpack.i.b16 %v3795_v16, %v3795_v16  ;;  %v3839_v18 = vunpack.i.h.s16 %v3795_v16  ;;  %v4192_v15 = vsel %vm8035_vm12, %v4010_v54, %v4191_v22  ;;  %v4017_v19 = vrot.slane %v3865_v8, %v7650_v25  ;;  %v5188_v54 = vld [vmem:[%s7023_s28] sm:$0x8] }
 0x535   : > { %v4201_v57 = vsel %vm8035_vm12, %v4031_v53, %v4200_v5  ;;  %v3809_v7 = vrot.slane %v3781_v52, %v7646_v59  ;;  %4193 = vst [vmem:[%s7023_s28 + $0x48] sm:$0x4] %v4192_v15  ;;  %v4038_v32 = vrot.slane %v6134_v9, %v7650_v25  ;;  %v3869_v48 = vpack.i.b16 %v3837_v10, %v3837_v10 }
 0x536   : > { %4202 = vst [vmem:[%s7023_s28 + $0x54] sm:$0x4] %v4201_v57  ;;  %v4052_v42 = vrot.slane %v6135_v11, %v7650_v25  ;;  %v3871_v24 = vpack.i.b16 %v3839_v18, %v3839_v18  ;;  %v4195_v34 = vsel %vm8035_vm12, %v4017_v19, %v4194_v55  ;;  %v3811_v33 = vcombine.high %v3795_v16, %v3795_v16  ;;  %v4230_v16 = vld [vmem:[%s7023_s28 + $0x7c] sm:$0x4]  ;;  %v5191_v18 = vld [vmem:[%s7023_s28 + $0x4] sm:$0x8] }
 0x537   : > { %v6136_v44 = vpack.i.b16 %v3809_v7, %v3809_v7  ;;  %v3841_v31 = vunpack.i.h.s16 %v3809_v7  ;;  %4196 = vst [vmem:[%s7023_s28 + $0x4c] sm:$0x4] %v4195_v34  ;;  %v4204_v23 = vsel %vm8035_vm12, %v4038_v32, %v4203_v58  ;;  %v4045_v26 = vrot.slane %v3869_v48, %v7650_v25  ;;  %v5194_v32 = vld [vmem:[%s7023_s28 + $0x8] sm:$0x8]  ;;  %v5200_v48 = vld [vmem:[%s7023_s28 + $0x10] sm:$0x8] }
 0x538   : > { %v4210_v36 = vsel %vm8035_vm12, %v4052_v42, %v4209_v51  ;;  %v4059_v13 = vrot.slane %v3871_v24, %v7650_v25  ;;  %4205 = vst [vmem:[%s7023_s28 + $0x58] sm:$0x4] %v4204_v23  ;;  %v6137_v56 = vpack.i.b16 %v3811_v33, %v3811_v33  ;;  %v3843_v12 = vunpack.i.h.s16 %v3811_v33 }
 0x539   : > { %4211 = vst [vmem:[%s7023_s28 + $0x60] sm:$0x4] %v4210_v36  ;;  %v4066_v43 = vrot.slane %v6136_v44, %v7650_v25  ;;  %v3873_v20 = vpack.i.b16 %v3841_v31, %v3841_v31  ;;  %v4207_v14 = vsel %vm8035_vm12, %v4045_v26, %v4206_v21  ;;  %v3813_v30 = vcombine.high %v3809_v7, %v3809_v7  ;;  %v5197_v21 = vld [vmem:[%s7023_s28 + $0xc] sm:$0x8]  ;;  %v5203_v31 = vld [vmem:[%s7023_s28 + $0x14] sm:$0x8] }
 0x53a   : > { %v4213_v37 = vsel %vm8035_vm12, %v4059_v13, %v4212_v27  ;;  %v4774_v41 = vrot.slane %v4763_v1, %v7646_v59  ;;  %4208 = vst [vmem:[%s7023_s28 + $0x5c] sm:$0x4] %v4207_v14  ;;  %v4080_v60 = vrot.slane %v6137_v56, %v7650_v25  ;;  %v3875_v61 = vpack.i.b16 %v3843_v12, %v3843_v12  ;;  %v4761_v36 = vld [vmem:[#allocation4 + $0xd0] sm:$0xff]  ;;  %v4762_v13 = vld [vmem:[#allocation4 + $0xd8] sm:$0xff] }
 0x53b   : > { %4214 = vst [vmem:[%s7023_s28 + $0x64] sm:$0x4] %v4213_v37  ;;  %v4216_v28 = vsel %vm8035_vm12, %v4066_v43, %v4215_v49  ;;  %v4073_v50 = vrot.slane %v3873_v20, %v7650_v25  ;;  %v6138_v62 = vpack.i.b16 %v3813_v30, %v3813_v30  ;;  %v3845_v63 = vunpack.i.h.s16 %v3813_v30  ;;  %v5206_v12 = vld [vmem:[%s7023_s28 + $0x18] sm:$0x8] }
 0x53c   : > { %4217 = vst [vmem:[%s7023_s28 + $0x68] sm:$0x4] %v4216_v28  ;;  %v4790_v0 = vrot.slane %v4774_v41, %v7646_v59  ;;  %v4222_v1 = vsel %vm8035_vm12, %v4080_v60, %v4221_v29  ;;  %v4087_v3 = vrot.slane %v3875_v61, %v7650_v25  ;;  %v4782_v4 = vcombine.high %v4774_v41, %v4774_v41  ;;  %v5209_v28 = vld [vmem:[%s7023_s28 + $0x1c] sm:$0x8]  ;;  %v8292_v61 = vld [vmem:[#allocation4 + $0x20] sm:$0xff] }
 0x53d   : > { %v4219_v38 = vsel %vm8035_vm12, %v4073_v50, %v4218_v17  ;;  %4223 = vst [vmem:[%s7023_s28 + $0x70] sm:$0x4] %v4222_v1  ;;  %v4094_v6 = vrot.slane %v6138_v62, %v7650_v25  ;;  %v3877_v47 = vpack.i.b16 %v3845_v63, %v3845_v63  ;;  %v6157_v53 = vpack.c.bf16 %v8151_v45, %v8151_v45  ;;  %v5212_v1 = vld [vmem:[%s7023_s28 + $0x20] sm:$0x8] }
 0x53e   : > { %4220 = vst [vmem:[%s7023_s28 + $0x6c] sm:$0x4] %v4219_v38  ;;  %v6159_v22 = vpack.i.b16 %v4790_v0, %v4790_v0  ;;  %v4866_v5 = vunpack.i.h.s16 %v4790_v0  ;;  %v4225_v39 = vsel %vm8035_vm12, %v4087_v3, %v4224_v35  ;;  %v4804_v8 = vrot.slane %v4782_v4, %v7646_v59  ;;  %v8294_v35 = vld [vmem:[#allocation4 + $0x28] sm:$0xff] }
 0x53f   : > { %v4812_v40 = vcombine.high %v4790_v0, %v4790_v0  ;;  %4226 = vst [vmem:[%s7023_s28 + $0x74] sm:$0x4] %v4225_v39  ;;  %v4228_v55 = vsel %vm8035_vm12, %v4094_v6, %v4227_v2  ;;  %v4101_v9 = vrot.slane %v3877_v47, %v7650_v25  ;;  %v4781_v26 = vrot.slane %v6157_v53, %v7646_v59 }
 0x540   : > { %v4935_v10 = vrot.slane %v6159_v22, %v7650_v25  ;;  %v4898_v11 = vpack.i.b16 %v4866_v5, %v4866_v5  ;;  %4229 = vst [vmem:[%s7023_s28 + $0x78] sm:$0x4] %v4228_v55  ;;  %v6160_v15 = vpack.i.b16 %v4804_v8, %v4804_v8  ;;  %v4868_v19 = vunpack.i.h.s16 %v4804_v8 }
 0x541   : > { %v6161_v57 = vpack.i.b16 %v4812_v40, %v4812_v40  ;;  %v4870_v45 = vunpack.i.h.s16 %v4812_v40  ;;  %v4231_v58 = vsel %vm8035_vm12, %v4101_v9, %v4230_v16  ;;  %v4814_v42 = vcombine.high %v4804_v8, %v4804_v8  ;;  %v5215_v16 = vld [vmem:[%s7023_s28 + $0x24] sm:$0x8] }
 0x542   : > { %v5189_v51 = vsel %vm8244_vm15, %v4935_v10, %v5188_v54  ;;  %v4942_v7 = vrot.slane %v4898_v11, %v7650_v25  ;;  %4232 = vst [vmem:[%s7023_s28 + $0x7c] sm:$0x4] %v4231_v58  ;;  %v4949_v24 = vrot.slane %v6160_v15, %v7650_v25  ;;  %v4900_v34 = vpack.i.b16 %v4868_v19, %v4868_v19  ;;  %v5218_v10 = vld [vmem:[%s7023_s28 + $0x28] sm:$0x8]  ;;  %v5224_v11 = vld [vmem:[%s7023_s28 + $0x30] sm:$0x8] }
 0x543   : > { %5190 = vst [vmem:[%s7023_s28] sm:$0x8] %v5189_v51  ;;  %v4963_v46 = vrot.slane %v6161_v57, %v7650_v25  ;;  %v4902_v27 = vpack.i.b16 %v4870_v45, %v4870_v45  ;;  %v6162_v33 = vpack.i.b16 %v4814_v42, %v4814_v42  ;;  %v4872_v23 = vunpack.i.h.s16 %v4814_v42 }
 0x544   : > { %v5192_v44 = vsel %vm8244_vm15, %v4942_v7, %v5191_v18  ;;  %v5195_v49 = vsel %vm8244_vm15, %v4949_v24, %v5194_v32  ;;  %v4956_v43 = vrot.slane %v4900_v34, %v7650_v25  ;;  %v4797_v17 = vrot.slane %v4781_v26, %v7646_v59  ;;  %v5221_v7 = vld [vmem:[%s7023_s28 + $0x2c] sm:$0x8]  ;;  %v5227_v32 = vld [vmem:[%s7023_s28 + $0x34] sm:$0x8] }
 0x545   : > { %5193 = vst [vmem:[%s7023_s28 + $0x4] sm:$0x8] %v5192_v44  ;;  %v5201_v20 = vsel %vm8244_vm15, %v4963_v46, %v5200_v48  ;;  %v4970_v56 = vrot.slane %v4902_v27, %v7650_v25  ;;  %5196 = vst [vmem:[%s7023_s28 + $0x8] sm:$0x8] %v5195_v49  ;;  %v4977_v14 = vrot.slane %v6162_v33, %v7650_v25  ;;  %v5230_v44 = vld [vmem:[%s7023_s28 + $0x38] sm:$0x8] }
 0x546   : > { %5202 = vst [vmem:[%s7023_s28 + $0x10] sm:$0x8] %v5201_v20  ;;  %v4904_v37 = vpack.i.b16 %v4872_v23, %v4872_v23  ;;  %v4783_v29 = vcombine.high %v4781_v26, %v4781_v26  ;;  %v5198_v30 = vsel %vm8244_vm15, %v4956_v43, %v5197_v21  ;;  %v4764_v50 = vpack.c.bf16 %v4762_v13, %v4761_v36  ;;  %v5233_v43 = vld [vmem:[%s7023_s28 + $0x3c] sm:$0x8] }
 0x547   : > { %v5204_v41 = vsel %vm8244_vm15, %v4970_v56, %v5203_v31  ;;  %v6158_v60 = vpack.c.bf16 %v4762_v13, %v4762_v13  ;;  %5199 = vst [vmem:[%s7023_s28 + $0xc] sm:$0x8] %v5198_v30  ;;  %v5207_v62 = vsel %vm8244_vm15, %v4977_v14, %v5206_v12  ;;  %v6163_v0 = vpack.i.b16 %v4797_v17, %v4797_v17  ;;  %v5236_v31 = vld [vmem:[%s7023_s28 + $0x40] sm:$0x8] }
 0x548   : > { %5205 = vst [vmem:[%s7023_s28 + $0x14] sm:$0x8] %v5204_v41  ;;  %v4984_v63 = vrot.slane %v4904_v37, %v7650_v25  ;;  %v4874_v38 = vunpack.i.h.s16 %v4797_v17  ;;  %5208 = vst [vmem:[%s7023_s28 + $0x18] sm:$0x8] %v5207_v62  ;;  %v4811_v3 = vrot.slane %v4783_v29, %v7646_v59  ;;  %v4813_v2 = vcombine.high %v4797_v17, %v4797_v17  ;;  %v5239_v29 = vld [vmem:[%s7023_s28 + $0x44] sm:$0x8] }
 0x549   : > { %v4823_v4 = vrot.slane %v4764_v50, %v7646_v59  ;;  %v8306_v6 = vrot.slane %v6158_v60, %v7646_v59  ;;  %v4991_v22 = vrot.slane %v6163_v0, %v7650_v25  ;;  %v2136_v39 = vpack.c.bf16 %v8294_v35, %v8292_v61  ;;  %v5248_v62 = vld [vmem:[%s7023_s28 + $0x50] sm:$0x8] }
 0x54a   : > { %v5210_v47 = vsel %vm8244_vm15, %v4984_v63, %v5209_v28  ;;  %v4906_v5 = vpack.i.b16 %v4874_v38, %v4874_v38  ;;  %v6164_v54 = vpack.i.b16 %v4811_v3, %v4811_v3  ;;  %v4876_v8 = vunpack.i.h.s16 %v4811_v3 }
 0x54b   : > { %5211 = vst [vmem:[%s7023_s28 + $0x1c] sm:$0x8] %v5210_v47  ;;  %v6165_v40 = vpack.i.b16 %v4813_v2, %v4813_v2  ;;  %v4878_v53 = vunpack.i.h.s16 %v4813_v2  ;;  %v5213_v55 = vsel %vm8244_vm15, %v4991_v22, %v5212_v1  ;;  %v4815_v18 = vcombine.high %v4811_v3, %v4811_v3  ;;  %v5242_v47 = vld [vmem:[%s7023_s28 + $0x48] sm:$0x8]  ;;  %v5251_v22 = vld [vmem:[%s7023_s28 + $0x54] sm:$0x8] }
 0x54c   : > { %v4998_v9 = vrot.slane %v4906_v5, %v7650_v25  ;;  %v4839_v15 = vrot.slane %v4823_v4, %v7646_v59  ;;  %5214 = vst [vmem:[%s7023_s28 + $0x20] sm:$0x8] %v5213_v55  ;;  %v5005_v19 = vrot.slane %v6164_v54, %v7650_v25  ;;  %v4908_v57 = vpack.i.b16 %v4876_v8, %v4876_v8  ;;  %v5245_v55 = vld [vmem:[%s7023_s28 + $0x4c] sm:$0x8] }
 0x54d   : > { %v5019_v45 = vrot.slane %v6165_v40, %v7650_v25  ;;  %v4910_v58 = vpack.i.b16 %v4878_v53, %v4878_v53  ;;  %v6166_v48 = vpack.i.b16 %v4815_v18, %v4815_v18  ;;  %v4880_v42 = vunpack.i.h.s16 %v4815_v18  ;;  %v5260_v53 = vld [vmem:[%s7023_s28 + $0x60] sm:$0x8] }
 0x54e   : > { %v5216_v51 = vsel %vm8244_vm15, %v4998_v9, %v5215_v16  ;;  %v6167_v24 = vpack.i.b16 %v4839_v15, %v4839_v15  ;;  %v5219_v34 = vsel %vm8244_vm15, %v5005_v19, %v5218_v10  ;;  %v5012_v21 = vrot.slane %v4908_v57, %v7650_v25 }
 0x54f   : > { %5217 = vst [vmem:[%s7023_s28 + $0x24] sm:$0x8] %v5216_v51  ;;  %v5225_v46 = vsel %vm8244_vm15, %v5019_v45, %v5224_v11  ;;  %v5026_v27 = vrot.slane %v4910_v58, %v7650_v25  ;;  %5220 = vst [vmem:[%s7023_s28 + $0x28] sm:$0x8] %v5219_v34  ;;  %v5033_v33 = vrot.slane %v6166_v48, %v7650_v25  ;;  %v4882_v36 = vunpack.i.h.s16 %v4839_v15  ;;  %v5254_v45 = vld [vmem:[%s7023_s28 + $0x58] sm:$0x8] }
 0x550   : > { %5226 = vst [vmem:[%s7023_s28 + $0x30] sm:$0x8] %v5225_v46  ;;  %v4912_v23 = vpack.i.b16 %v4880_v42, %v4880_v42  ;;  %v5047_v26 = vrot.slane %v6167_v24, %v7650_v25  ;;  %v5222_v13 = vsel %vm8244_vm15, %v5012_v21, %v5221_v7  ;;  %v4831_v20 = vcombine.high %v4823_v4, %v4823_v4  ;;  %v5263_v58 = vld [vmem:[%s7023_s28 + $0x64] sm:$0x8]  ;;  %v5257_v34 = vld [vmem:[%s7023_s28 + $0x5c] sm:$0x8] }
 0x551   : > { %v5228_v49 = vsel %vm8244_vm15, %v5026_v27, %v5227_v32  ;;  %v4861_v56 = vcombine.high %v4839_v15, %v4839_v15  ;;  %5223 = vst [vmem:[%s7023_s28 + $0x2c] sm:$0x8] %v5222_v13  ;;  %v5231_v12 = vsel %vm8244_vm15, %v5033_v33, %v5230_v44  ;;  %v4914_v17 = vpack.i.b16 %v4882_v36, %v4882_v36 }
 0x552   : > { %5229 = vst [vmem:[%s7023_s28 + $0x34] sm:$0x8] %v5228_v49  ;;  %v5040_v14 = vrot.slane %v4912_v23, %v7650_v25  ;;  %v5237_v37 = vsel %vm8244_vm15, %v5047_v26, %v5236_v31  ;;  %5232 = vst [vmem:[%s7023_s28 + $0x38] sm:$0x8] %v5231_v12  ;;  %v4853_v30 = vrot.slane %v4831_v20, %v7646_v59  ;;  %v5266_v23 = vld [vmem:[%s7023_s28 + $0x68] sm:$0x8] }
 0x553   : > { %5238 = vst [vmem:[%s7023_s28 + $0x40] sm:$0x8] %v5237_v37  ;;  %v6169_v41 = vpack.i.b16 %v4861_v56, %v4861_v56  ;;  %v4886_v28 = vunpack.i.h.s16 %v4861_v56  ;;  %v4846_v50 = vrot.slane %v8306_v6, %v7646_v59  ;;  %v5054_v61 = vrot.slane %v4914_v17, %v7650_v25  ;;  %v5269_v56 = vld [vmem:[%s7023_s28 + $0x6c] sm:$0x8]  ;;  %v5272_v12 = vld [vmem:[%s7023_s28 + $0x70] sm:$0x8] }
 0x554   : > { %v5234_v60 = vsel %vm8244_vm15, %v5040_v14, %v5233_v43  ;;  %v4832_v63 = vcombine.high %v8306_v6, %v8306_v6  ;;  %v8366_v0 = vrot.slane %v2136_v39, %v7646_v59  ;;  %v6168_v38 = vpack.i.b16 %v4853_v30, %v4853_v30 }
 0x555   : > { %5235 = vst [vmem:[%s7023_s28 + $0x3c] sm:$0x8] %v5234_v60  ;;  %v4884_v1 = vunpack.i.h.s16 %v4853_v30  ;;  %v5075_v3 = vrot.slane %v6169_v41, %v7650_v25  ;;  %v4918_v2 = vpack.i.b16 %v4886_v28, %v4886_v28  ;;  %v5240_v4 = vsel %vm8244_vm15, %v5054_v61, %v5239_v29  ;;  %v5275_v61 = vld [vmem:[%s7023_s28 + $0x74] sm:$0x8] }
 0x556   : > { %v4863_v5 = vcombine.high %v4853_v30, %v4853_v30  ;;  %v6171_v6 = vpack.i.b16 %v4846_v50, %v4846_v50  ;;  %v4890_v16 = vunpack.i.h.s16 %v4846_v50  ;;  %5241 = vst [vmem:[%s7023_s28 + $0x44] sm:$0x8] %v5240_v4  ;;  %v5061_v39 = vrot.slane %v6168_v38, %v7650_v25  ;;  %v5281_v38 = vld [vmem:[%s7023_s28 + $0x7c] sm:$0x8] }
 0x557   : > { %v4916_v54 = vpack.i.b16 %v4884_v1, %v4884_v1  ;;  %v5249_v8 = vsel %vm8244_vm15, %v5075_v3, %v5248_v62  ;;  %v5082_v40 = vrot.slane %v4918_v2, %v7650_v25  ;;  %v4860_v51 = vrot.slane %v4832_v63, %v7646_v59 }
 0x558   : > { %5250 = vst [vmem:[%s7023_s28 + $0x50] sm:$0x8] %v5249_v8  ;;  %v6170_v9 = vpack.i.b16 %v4863_v5, %v4863_v5  ;;  %v4888_v10 = vunpack.i.h.s16 %v4863_v5  ;;  %v5103_v11 = vrot.slane %v6171_v6, %v7650_v25  ;;  %v4922_v18 = vpack.i.b16 %v4890_v16, %v4890_v16  ;;  %v2134_v6 = vld [vmem:[#allocation4 + $0x30] sm:$0xff]  ;;  %v8441_v16 = vld [vmem:[#allocation4 + $0x38] sm:$0xff] }
 0x559   : > { %v5243_v15 = vsel %vm8244_vm15, %v5061_v39, %v5242_v47  ;;  %v5068_v19 = vrot.slane %v4916_v54, %v7650_v25  ;;  %v5252_v57 = vsel %vm8244_vm15, %v5082_v40, %v5251_v22  ;;  %v6172_v21 = vpack.i.b16 %v4860_v51, %v4860_v51  ;;  %v2560_v22 = vld [vmem:[%s7023_s28] sm:$0x1] }
 0x55a   : > { %5244 = vst [vmem:[%s7023_s28 + $0x48] sm:$0x8] %v5243_v15  ;;  %5253 = vst [vmem:[%s7023_s28 + $0x54] sm:$0x8] %v5252_v57  ;;  %v5089_v7 = vrot.slane %v6170_v9, %v7650_v25  ;;  %v4920_v32 = vpack.i.b16 %v4888_v10, %v4888_v10  ;;  %v5261_v48 = vsel %vm8244_vm15, %v5103_v11, %v5260_v53  ;;  %v4892_v46 = vunpack.i.h.s16 %v4860_v51 }
 0x55b   : > { %v5110_v42 = vrot.slane %v4922_v18, %v7650_v25  ;;  %v5246_v24 = vsel %vm8244_vm15, %v5068_v19, %v5245_v55  ;;  %5262 = vst [vmem:[%s7023_s28 + $0x60] sm:$0x8] %v5261_v48  ;;  %v4862_v27 = vcombine.high %v4846_v50, %v4846_v50  ;;  %v4864_v26 = vcombine.high %v4860_v51, %v4860_v51  ;;  %v5278_v50 = vld [vmem:[%s7023_s28 + $0x78] sm:$0x8]  ;;  %v2566_v51 = vld [vmem:[%s7023_s28 + $0x8] sm:$0x1] }
 0x55c   : > { %5247 = vst [vmem:[%s7023_s28 + $0x4c] sm:$0x8] %v5246_v24  ;;  %v5255_v44 = vsel %vm8244_vm15, %v5089_v7, %v5254_v45  ;;  %v5096_v31 = vrot.slane %v4920_v32, %v7650_v25  ;;  %v5117_v36 = vrot.slane %v6172_v21, %v7650_v25  ;;  %v4924_v13 = vpack.i.b16 %v4892_v46, %v4892_v46  ;;  %v2572_v7 = vld [vmem:[%s7023_s28 + $0x10] sm:$0x1] }
 0x55d   : > { %v5264_v33 = vsel %vm8244_vm15, %v5110_v42, %v5263_v58  ;;  %5256 = vst [vmem:[%s7023_s28 + $0x58] sm:$0x8] %v5255_v44  ;;  %v6173_v49 = vpack.i.b16 %v4862_v27, %v4862_v27  ;;  %v4894_v43 = vunpack.i.h.s16 %v4862_v27  ;;  %v6174_v14 = vpack.i.b16 %v4864_v26, %v4864_v26  ;;  %v2569_v27 = vld [vmem:[%s7023_s28 + $0xc] sm:$0x1]  ;;  %v2575_v44 = vld [vmem:[%s7023_s28 + $0x14] sm:$0x1] }
 0x55e   : > { %5265 = vst [vmem:[%s7023_s28 + $0x64] sm:$0x8] %v5264_v33  ;;  %v5258_v20 = vsel %vm8244_vm15, %v5096_v31, %v5257_v34  ;;  %v4896_v37 = vunpack.i.h.s16 %v4864_v26  ;;  %v2163_v17 = vrot.slane %v8366_v0, %v7646_v59  ;;  %v5267_v29 = vsel %vm8244_vm15, %v5117_v36, %v5266_v23 }
 0x55f   : > { %5259 = vst [vmem:[%s7023_s28 + $0x5c] sm:$0x8] %v5258_v20  ;;  %v5124_v30 = vrot.slane %v4924_v13, %v7650_v25  ;;  %v5131_v41 = vrot.slane %v6173_v49, %v7650_v25  ;;  %v4926_v28 = vpack.i.b16 %v4894_v43, %v4894_v43  ;;  %5268 = vst [vmem:[%s7023_s28 + $0x68] sm:$0x8] %v5267_v29  ;;  %v2578_v20 = vld [vmem:[%s7023_s28 + $0x18] sm:$0x1] }
 0x560   : > { %v5145_v62 = vrot.slane %v6174_v14, %v7650_v25  ;;  %v4928_v63 = vpack.i.b16 %v4896_v37, %v4896_v37  ;;  %v6069_v1 = vpack.i.b16 %v2163_v17, %v2163_v17  ;;  %v2239_v3 = vunpack.i.h.s16 %v2163_v17 }
 0x561   : > { %v5270_v2 = vsel %vm8244_vm15, %v5124_v30, %v5269_v56  ;;  %v5273_v4 = vsel %vm8244_vm15, %v5131_v41, %v5272_v12  ;;  %v5138_v47 = vrot.slane %v4926_v28, %v7650_v25  ;;  %v2155_v5 = vcombine.high %v8366_v0, %v8366_v0  ;;  %v2563_v0 = vld [vmem:[%s7023_s28 + $0x4] sm:$0x1]  ;;  %v2581_v30 = vld [vmem:[%s7023_s28 + $0x1c] sm:$0x1]  ;;  %v2584_v41 = vld [vmem:[%s7023_s28 + $0x20] sm:$0x1] }
 0x562   : > { %5271 = vst [vmem:[%s7023_s28 + $0x6c] sm:$0x8] %v5270_v2  ;;  %5274 = vst [vmem:[%s7023_s28 + $0x70] sm:$0x8] %v5273_v4  ;;  %v5279_v39 = vsel %vm8244_vm15, %v5145_v62, %v5278_v50  ;;  %v5152_v54 = vrot.slane %v4928_v63, %v7650_v25  ;;  %v2308_v8 = vrot.slane %v6069_v1, %v7650_v25  ;;  %v2587_v1 = vld [vmem:[%s7023_s28 + $0x24] sm:$0x1] }
 0x563   : > { %v2271_v40 = vpack.i.b16 %v2239_v3, %v2239_v3  ;;  %v5276_v53 = vsel %vm8244_vm15, %v5138_v47, %v5275_v61  ;;  %5280 = vst [vmem:[%s7023_s28 + $0x78] sm:$0x8] %v5279_v39  ;;  %v2177_v55 = vrot.slane %v2155_v5, %v7646_v59  ;;  %v2185_v9 = vcombine.high %v2163_v17, %v2163_v17  ;;  %v2590_v39 = vld [vmem:[%s7023_s28 + $0x28] sm:$0x1] }
 0x564   : > { %v6067_v10 = vpack.c.bf16 %v8294_v35, %v8294_v35  ;;  %5277 = vst [vmem:[%s7023_s28 + $0x74] sm:$0x8] %v5276_v53  ;;  %v5282_v11 = vsel %vm8244_vm15, %v5152_v54, %v5281_v38  ;;  %v2561_v18 = vsel %vm8425_vm1, %v2308_v8, %v2560_v22  ;;  %v2137_v19 = vpack.c.bf16 %v8441_v16, %v2134_v6  ;;  %v2596_v54 = vld [vmem:[%s7023_s28 + $0x30] sm:$0x1] }
 0x565   : > { %v2315_v15 = vrot.slane %v2271_v40, %v7650_v25  ;;  %5283 = vst [vmem:[%s7023_s28 + $0x7c] sm:$0x8] %v5282_v11  ;;  %2562 = vst [vmem:[%s7023_s28] sm:$0x1] %v2561_v18  ;;  %v6070_v57 = vpack.i.b16 %v2177_v55, %v2177_v55  ;;  %v2241_v45 = vunpack.i.h.s16 %v2177_v55  ;;  %v6071_v58 = vpack.i.b16 %v2185_v9, %v2185_v9  ;;  %v2599_v11 = vld [vmem:[%s7023_s28 + $0x34] sm:$0x1] }
 0x566   : > { %v2243_v35 = vunpack.i.h.s16 %v2185_v9  ;;  %v2187_v32 = vcombine.high %v2177_v55, %v2177_v55  ;;  %v2154_v48 = vrot.slane %v6067_v10, %v7646_v59  ;;  %v8471_v42 = vrot.slane %v2137_v19, %v7646_v59  ;;  %v2593_v10 = vld [vmem:[%s7023_s28 + $0x2c] sm:$0x1] }
 0x567   : > { %v2564_v52 = vsel %vm8425_vm1, %v2315_v15, %v2563_v0  ;;  %v2322_v24 = vrot.slane %v6070_v57, %v7650_v25  ;;  %v2273_v34 = vpack.i.b16 %v2241_v45, %v2241_v45  ;;  %v2336_v21 = vrot.slane %v6071_v58, %v7650_v25 }
 0x568   : > { %2565 = vst [vmem:[%s7023_s28 + $0x4] sm:$0x1] %v2564_v52  ;;  %v2275_v46 = vpack.i.b16 %v2243_v35, %v2243_v35  ;;  %v6072_v31 = vpack.i.b16 %v2187_v32, %v2187_v32  ;;  %v2245_v33 = vunpack.i.h.s16 %v2187_v32  ;;  %v2170_v23 = vrot.slane %v2154_v48, %v7646_v59  ;;  %v2602_v52 = vld [vmem:[%s7023_s28 + $0x38] sm:$0x1]  ;;  %v2605_v32 = vld [vmem:[%s7023_s28 + $0x3c] sm:$0x1] }
 0x569   : > { %v2156_v26 = vcombine.high %v2154_v48, %v2154_v48  ;;  %v2567_v36 = vsel %vm8425_vm1, %v2322_v24, %v2566_v51  ;;  %v2329_v13 = vrot.slane %v2273_v34, %v7650_v25  ;;  %v2573_v49 = vsel %vm8425_vm1, %v2336_v21, %v2572_v7 }
 0x56a   : > { %v2343_v43 = vrot.slane %v2275_v46, %v7650_v25  ;;  %2568 = vst [vmem:[%s7023_s28 + $0x8] sm:$0x1] %v2567_v36  ;;  %2574 = vst [vmem:[%s7023_s28 + $0x10] sm:$0x1] %v2573_v49  ;;  %v2350_v56 = vrot.slane %v6072_v31, %v7650_v25  ;;  %v2277_v12 = vpack.i.b16 %v2245_v33, %v2245_v33  ;;  %v2247_v37 = vunpack.i.h.s16 %v2170_v23  ;;  %v2608_v46 = vld [vmem:[%s7023_s28 + $0x40] sm:$0x1] }
 0x56b   : > { %v6073_v14 = vpack.i.b16 %v2170_v23, %v2170_v23  ;;  %v2570_v17 = vsel %vm8425_vm1, %v2329_v13, %v2569_v27  ;;  %v2184_v28 = vrot.slane %v2156_v26, %v7646_v59  ;;  %v2186_v50 = vcombine.high %v2170_v23, %v2170_v23  ;;  %v3183_v31 = vld [vmem:[#allocation4 + $0x60] sm:$0xff]  ;;  %v8540_v33 = vld [vmem:[#allocation4 + $0x68] sm:$0xff] }
 0x56c   : > { %v2576_v29 = vsel %vm8425_vm1, %v2343_v43, %v2575_v44  ;;  %2571 = vst [vmem:[%s7023_s28 + $0xc] sm:$0x1] %v2570_v17  ;;  %v2579_v61 = vsel %vm8425_vm1, %v2350_v56, %v2578_v20  ;;  %v2357_v62 = vrot.slane %v2277_v12, %v7650_v25  ;;  %v2279_v38 = vpack.i.b16 %v2247_v37, %v2247_v37  ;;  %v2611_v49 = vld [vmem:[%s7023_s28 + $0x44] sm:$0x1]  ;;  %v2620_v17 = vld [vmem:[%s7023_s28 + $0x50] sm:$0x1] }
 0x56d   : > { %2577 = vst [vmem:[%s7023_s28 + $0x14] sm:$0x1] %v2576_v29  ;;  %v2364_v63 = vrot.slane %v6073_v14, %v7650_v25  ;;  %2580 = vst [vmem:[%s7023_s28 + $0x18] sm:$0x1] %v2579_v61  ;;  %v6074_v3 = vpack.i.b16 %v2184_v28, %v2184_v28  ;;  %v2249_v2 = vunpack.i.h.s16 %v2184_v28  ;;  %v6075_v4 = vpack.i.b16 %v2186_v50, %v2186_v50  ;;  %v2614_v61 = vld [vmem:[%s7023_s28 + $0x48] sm:$0x1] }
 0x56e   : > { %v2251_v47 = vunpack.i.h.s16 %v2186_v50  ;;  %v2582_v22 = vsel %vm8425_vm1, %v2357_v62, %v2581_v30  ;;  %v2371_v6 = vrot.slane %v2279_v38, %v7650_v25  ;;  %v2188_v8 = vcombine.high %v2184_v28, %v2184_v28  ;;  %v2623_v62 = vld [vmem:[%s7023_s28 + $0x54] sm:$0x1] }
 0x56f   : > { %v2585_v5 = vsel %vm8425_vm1, %v2364_v63, %v2584_v41  ;;  %2583 = vst [vmem:[%s7023_s28 + $0x1c] sm:$0x1] %v2582_v22  ;;  %v2378_v40 = vrot.slane %v6074_v3, %v7650_v25  ;;  %v2281_v53 = vpack.i.b16 %v2249_v2, %v2249_v2  ;;  %v2392_v0 = vrot.slane %v6075_v4, %v7650_v25  ;;  %v2617_v22 = vld [vmem:[%s7023_s28 + $0x4c] sm:$0x1] }
 0x570   : > { %2586 = vst [vmem:[%s7023_s28 + $0x20] sm:$0x1] %v2585_v5  ;;  %v2283_v55 = vpack.i.b16 %v2251_v47, %v2251_v47  ;;  %v2588_v9 = vsel %vm8425_vm1, %v2371_v6, %v2587_v1  ;;  %v6076_v18 = vpack.i.b16 %v2188_v8, %v2188_v8  ;;  %v2253_v15 = vunpack.i.h.s16 %v2188_v8 }
 0x571   : > { %v2212_v19 = vrot.slane %v8471_v42, %v7646_v59  ;;  %2589 = vst [vmem:[%s7023_s28 + $0x24] sm:$0x1] %v2588_v9  ;;  %v2591_v57 = vsel %vm8425_vm1, %v2378_v40, %v2590_v39  ;;  %v2385_v45 = vrot.slane %v2281_v53, %v7650_v25  ;;  %v2597_v58 = vsel %vm8425_vm1, %v2392_v0, %v2596_v54  ;;  %v2626_v0 = vld [vmem:[%s7023_s28 + $0x58] sm:$0x1] }
 0x572   : > { %v2399_v35 = vrot.slane %v2283_v55, %v7650_v25  ;;  %2592 = vst [vmem:[%s7023_s28 + $0x28] sm:$0x1] %v2591_v57  ;;  %2598 = vst [vmem:[%s7023_s28 + $0x30] sm:$0x1] %v2597_v58  ;;  %v2406_v51 = vrot.slane %v6076_v18, %v7650_v25  ;;  %v2285_v7 = vpack.i.b16 %v2253_v15, %v2253_v15  ;;  %v2632_v57 = vld [vmem:[%s7023_s28 + $0x60] sm:$0x1] }
 0x573   : > { %v6077_v48 = vpack.i.b16 %v2212_v19, %v2212_v19  ;;  %v2255_v24 = vunpack.i.h.s16 %v2212_v19  ;;  %v2594_v34 = vsel %vm8425_vm1, %v2385_v45, %v2593_v10  ;;  %v2204_v27 = vcombine.high %v8471_v42, %v8471_v42 }
 0x574   : > { %v2600_v21 = vsel %vm8425_vm1, %v2399_v35, %v2599_v11  ;;  %v2234_v44 = vcombine.high %v2212_v19, %v2212_v19  ;;  %2595 = vst [vmem:[%s7023_s28 + $0x2c] sm:$0x1] %v2594_v34  ;;  %v2603_v23 = vsel %vm8425_vm1, %v2406_v51, %v2602_v52  ;;  %v2413_v26 = vrot.slane %v2285_v7, %v7650_v25  ;;  %v2629_v19 = vld [vmem:[%s7023_s28 + $0x5c] sm:$0x1] }
 0x575   : > { %2601 = vst [vmem:[%s7023_s28 + $0x34] sm:$0x1] %v2600_v21  ;;  %v2420_v36 = vrot.slane %v6077_v48, %v7650_v25  ;;  %v2287_v13 = vpack.i.b16 %v2255_v24, %v2255_v24  ;;  %2604 = vst [vmem:[%s7023_s28 + $0x38] sm:$0x1] %v2603_v23  ;;  %v2226_v42 = vrot.slane %v2204_v27, %v7646_v59  ;;  %v2635_v48 = vld [vmem:[%s7023_s28 + $0x64] sm:$0x1] }
 0x576   : > { %v6079_v43 = vpack.i.b16 %v2234_v44, %v2234_v44  ;;  %v2259_v20 = vunpack.i.h.s16 %v2234_v44  ;;  %v6068_v56 = vpack.c.bf16 %v8441_v16, %v8441_v16  ;;  %v2606_v12 = vsel %vm8425_vm1, %v2413_v26, %v2605_v32  ;;  %v2638_v23 = vld [vmem:[%s7023_s28 + $0x68] sm:$0x1]  ;;  %v2644_v26 = vld [vmem:[%s7023_s28 + $0x70] sm:$0x1] }
 0x577   : > { %v2609_v14 = vsel %vm8425_vm1, %v2420_v36, %v2608_v46  ;;  %v2427_v37 = vrot.slane %v2287_v13, %v7650_v25  ;;  %v3187_v29 = vpack.c.bf16 %v8540_v33, %v3183_v31  ;;  %2607 = vst [vmem:[%s7023_s28 + $0x3c] sm:$0x1] %v2606_v12  ;;  %v6078_v30 = vpack.i.b16 %v2226_v42, %v2226_v42 }
 0x578   : > { %2610 = vst [vmem:[%s7023_s28 + $0x40] sm:$0x1] %v2609_v14  ;;  %v2257_v41 = vunpack.i.h.s16 %v2226_v42  ;;  %v2448_v16 = vrot.slane %v6079_v43, %v7650_v25  ;;  %v2291_v28 = vpack.i.b16 %v2259_v20, %v2259_v20  ;;  %v2236_v63 = vcombine.high %v2226_v42, %v2226_v42  ;;  %v2641_v14 = vld [vmem:[%s7023_s28 + $0x6c] sm:$0x1] }
 0x579   : > { %v2612_v50 = vsel %vm8425_vm1, %v2427_v37, %v2611_v49  ;;  %v2203_v38 = vrot.slane %v6068_v56, %v7646_v59  ;;  %v8569_v1 = vrot.slane %v3187_v29, %v7646_v59  ;;  %v2434_v3 = vrot.slane %v6078_v30, %v7650_v25  ;;  %v3611_v56 = vld [vmem:[%s7023_s28] sm:$0x2]  ;;  %v2647_v37 = vld [vmem:[%s7023_s28 + $0x74] sm:$0x1] }
 0x57a   : > { %2613 = vst [vmem:[%s7023_s28 + $0x44] sm:$0x1] %v2612_v50  ;;  %v2289_v2 = vpack.i.b16 %v2257_v41, %v2257_v41  ;;  %v2621_v4 = vsel %vm8425_vm1, %v2448_v16, %v2620_v17  ;;  %v2455_v47 = vrot.slane %v2291_v28, %v7650_v25  ;;  %v6080_v5 = vpack.i.b16 %v2236_v63, %v2236_v63 }
 0x57b   : > { %2622 = vst [vmem:[%s7023_s28 + $0x50] sm:$0x1] %v2621_v4  ;;  %v2261_v6 = vunpack.i.h.s16 %v2236_v63  ;;  %v2219_v39 = vrot.slane %v2203_v38, %v7646_v59  ;;  %v2205_v54 = vcombine.high %v2203_v38, %v2203_v38  ;;  %v2615_v8 = vsel %vm8425_vm1, %v2434_v3, %v2614_v61  ;;  %v2650_v61 = vld [vmem:[%s7023_s28 + $0x78] sm:$0x1] }
 0x57c   : > { %v2441_v40 = vrot.slane %v2289_v2, %v7650_v25  ;;  %v2624_v53 = vsel %vm8425_vm1, %v2455_v47, %v2623_v62  ;;  %v8587_v55 = vrot.slane %v8569_v1, %v7646_v59  ;;  %2616 = vst [vmem:[%s7023_s28 + $0x48] sm:$0x1] %v2615_v8  ;;  %v2462_v9 = vrot.slane %v6080_v5, %v7650_v25  ;;  %v8643_v2 = vld [vmem:[#allocation4 + $0x70] sm:$0xff]  ;;  %v8645_v4 = vld [vmem:[#allocation4 + $0x78] sm:$0xff] }
 0x57d   : > { %2625 = vst [vmem:[%s7023_s28 + $0x54] sm:$0x1] %v2624_v53  ;;  %v2293_v10 = vpack.i.b16 %v2261_v6, %v2261_v6  ;;  %v6081_v11 = vpack.i.b16 %v2219_v39, %v2219_v39  ;;  %v2263_v18 = vunpack.i.h.s16 %v2219_v39  ;;  %v2233_v45 = vrot.slane %v2205_v54, %v7646_v59  ;;  %v2653_v5 = vld [vmem:[%s7023_s28 + $0x7c] sm:$0x1] }
 0x57e   : > { %v2618_v15 = vsel %vm8425_vm1, %v2441_v40, %v2617_v22  ;;  %v2235_v58 = vcombine.high %v2219_v39, %v2219_v39  ;;  %v6105_v35 = vpack.i.b16 %v8587_v55, %v8587_v55  ;;  %v2627_v52 = vsel %vm8425_vm1, %v2462_v9, %v2626_v0  ;;  %v3614_v0 = vld [vmem:[%s7023_s28 + $0x4] sm:$0x2] }
 0x57f   : > { %2619 = vst [vmem:[%s7023_s28 + $0x4c] sm:$0x1] %v2618_v15  ;;  %v2469_v51 = vrot.slane %v2293_v10, %v7650_v25  ;;  %v2476_v7 = vrot.slane %v6081_v11, %v7650_v25  ;;  %v2295_v32 = vpack.i.b16 %v2263_v18, %v2263_v18  ;;  %2628 = vst [vmem:[%s7023_s28 + $0x58] sm:$0x1] %v2627_v52  ;;  %v2265_v34 = vunpack.i.h.s16 %v2233_v45  ;;  %v3623_v15 = vld [vmem:[%s7023_s28 + $0x10] sm:$0x2] }
 0x580   : > { %v6082_v24 = vpack.i.b16 %v2233_v45, %v2233_v45  ;;  %v6083_v21 = vpack.i.b16 %v2235_v58, %v2235_v58  ;;  %v2267_v46 = vunpack.i.h.s16 %v2235_v58  ;;  %v2237_v36 = vcombine.high %v2233_v45, %v2233_v45  ;;  %v3617_v52 = vld [vmem:[%s7023_s28 + $0x8] sm:$0x2] }
 0x581   : > { %v2630_v27 = vsel %vm8425_vm1, %v2469_v51, %v2629_v19  ;;  %v2633_v44 = vsel %vm8425_vm1, %v2476_v7, %v2632_v57  ;;  %v2483_v31 = vrot.slane %v2295_v32, %v7650_v25  ;;  %v2297_v42 = vpack.i.b16 %v2265_v34, %v2265_v34  ;;  %v3626_v51 = vld [vmem:[%s7023_s28 + $0x14] sm:$0x2] }
 0x582   : > { %2631 = vst [vmem:[%s7023_s28 + $0x5c] sm:$0x1] %v2630_v27  ;;  %2634 = vst [vmem:[%s7023_s28 + $0x60] sm:$0x1] %v2633_v44  ;;  %v2490_v49 = vrot.slane %v6082_v24, %v7650_v25  ;;  %v2504_v43 = vrot.slane %v6083_v21, %v7650_v25  ;;  %v2299_v20 = vpack.i.b16 %v2267_v46, %v2267_v46  ;;  %v2269_v29 = vunpack.i.h.s16 %v2237_v36  ;;  %v3620_v27 = vld [vmem:[%s7023_s28 + $0xc] sm:$0x2] }
 0x583   : > { %v2636_v12 = vsel %vm8425_vm1, %v2483_v31, %v2635_v48  ;;  %v6084_v17 = vpack.i.b16 %v2237_v36, %v2237_v36  ;;  %v3359_v30 = vrot.slane %v6105_v35, %v7650_v25  ;;  %v2497_v16 = vrot.slane %v2297_v42, %v7650_v25 }
 0x584   : > { %2637 = vst [vmem:[%s7023_s28 + $0x64] sm:$0x1] %v2636_v12  ;;  %v2639_v41 = vsel %vm8425_vm1, %v2490_v49, %v2638_v23  ;;  %v2645_v28 = vsel %vm8425_vm1, %v2504_v43, %v2644_v26  ;;  %v2511_v50 = vrot.slane %v2299_v20, %v7650_v25  ;;  %v2301_v63 = vpack.i.b16 %v2269_v29, %v2269_v29  ;;  %v3629_v43 = vld [vmem:[%s7023_s28 + $0x18] sm:$0x2]  ;;  %v3635_v20 = vld [vmem:[%s7023_s28 + $0x20] sm:$0x2] }
 0x585   : > { %2640 = vst [vmem:[%s7023_s28 + $0x68] sm:$0x1] %v2639_v41  ;;  %2646 = vst [vmem:[%s7023_s28 + $0x70] sm:$0x1] %v2645_v28  ;;  %v2518_v62 = vrot.slane %v6084_v17, %v7650_v25  ;;  %v3612_v38 = vsel %vm8615_vm3, %v3359_v30, %v3611_v56  ;;  %v3290_v3 = vunpack.i.h.s16 %v8587_v55  ;;  %v2642_v47 = vsel %vm8425_vm1, %v2497_v16, %v2641_v14  ;;  %v3632_v30 = vld [vmem:[%s7023_s28 + $0x1c] sm:$0x2] }
 0x586   : > { %v2648_v22 = vsel %vm8425_vm1, %v2511_v50, %v2647_v37  ;;  %3613 = vst [vmem:[%s7023_s28] sm:$0x2] %v3612_v38  ;;  %v3206_v6 = vcombine.high %v8569_v1, %v8569_v1  ;;  %v3236_v39 = vcombine.high %v8587_v55, %v8587_v55  ;;  %2643 = vst [vmem:[%s7023_s28 + $0x6c] sm:$0x1] %v2642_v47  ;;  %v3638_v41 = vld [vmem:[%s7023_s28 + $0x24] sm:$0x2] }
 0x587   : > { %2649 = vst [vmem:[%s7023_s28 + $0x74] sm:$0x1] %v2648_v22  ;;  %v2651_v54 = vsel %vm8425_vm1, %v2518_v62, %v2650_v61  ;;  %v2525_v8 = vrot.slane %v2301_v63, %v7650_v25  ;;  %v3322_v40 = vpack.i.b16 %v3290_v3, %v3290_v3  ;;  %v6103_v53 = vpack.c.bf16 %v8540_v33, %v8540_v33  ;;  %v3641_v3 = vld [vmem:[%s7023_s28 + $0x28] sm:$0x2] }
 0x588   : > { %2652 = vst [vmem:[%s7023_s28 + $0x78] sm:$0x1] %v2651_v54  ;;  %v3228_v1 = vrot.slane %v3206_v6, %v7646_v59  ;;  %v6107_v9 = vpack.i.b16 %v3236_v39, %v3236_v39  ;;  %v3294_v55 = vunpack.i.h.s16 %v3236_v39  ;;  %v3188_v10 = vpack.c.bf16 %v8645_v4, %v8643_v2 }
 0x589   : > { %v2654_v11 = vsel %vm8425_vm1, %v2525_v8, %v2653_v5  ;;  %v3366_v18 = vrot.slane %v3322_v40, %v7650_v25  ;;  %v3205_v33 = vrot.slane %v6103_v53, %v7646_v59  ;;  %v6104_v19 = vpack.c.bf16 %v8645_v4, %v8645_v4  ;;  %v3644_v8 = vld [vmem:[%s7023_s28 + $0x2c] sm:$0x2]  ;;  %v3647_v40 = vld [vmem:[%s7023_s28 + $0x30] sm:$0x2] }
 0x58a   : > { %2655 = vst [vmem:[%s7023_s28 + $0x7c] sm:$0x1] %v2654_v11  ;;  %v6106_v57 = vpack.i.b16 %v3228_v1, %v3228_v1  ;;  %v3292_v45 = vunpack.i.h.s16 %v3228_v1  ;;  %v3387_v58 = vrot.slane %v6107_v9, %v7650_v25  ;;  %v3326_v35 = vpack.i.b16 %v3294_v55, %v3294_v55 }
 0x58b   : > { %v3615_v60 = vsel %vm8615_vm3, %v3366_v18, %v3614_v0  ;;  %v3238_v7 = vcombine.high %v3228_v1, %v3228_v1  ;;  %v3221_v32 = vrot.slane %v3205_v33, %v7646_v59  ;;  %v3207_v48 = vcombine.high %v3205_v33, %v3205_v33  ;;  %v3650_v18 = vld [vmem:[%s7023_s28 + $0x34] sm:$0x2] }
 0x58c   : > { %3616 = vst [vmem:[%s7023_s28 + $0x4] sm:$0x2] %v3615_v60  ;;  %v3373_v24 = vrot.slane %v6106_v57, %v7650_v25  ;;  %v3324_v34 = vpack.i.b16 %v3292_v45, %v3292_v45  ;;  %v3624_v21 = vsel %vm8615_vm3, %v3387_v58, %v3623_v15  ;;  %v3394_v46 = vrot.slane %v3326_v35, %v7650_v25  ;;  %v3653_v35 = vld [vmem:[%s7023_s28 + $0x38] sm:$0x2] }
 0x58d   : > { %3625 = vst [vmem:[%s7023_s28 + $0x10] sm:$0x2] %v3624_v21  ;;  %v6108_v44 = vpack.i.b16 %v3238_v7, %v3238_v7  ;;  %v3296_v31 = vunpack.i.h.s16 %v3238_v7  ;;  %v6109_v23 = vpack.i.b16 %v3221_v32, %v3221_v32  ;;  %v3298_v26 = vunpack.i.h.s16 %v3221_v32 }
 0x58e   : > { %v3618_v36 = vsel %vm8615_vm3, %v3373_v24, %v3617_v52  ;;  %v3380_v49 = vrot.slane %v3324_v34, %v7650_v25  ;;  %v3627_v42 = vsel %vm8615_vm3, %v3394_v46, %v3626_v51  ;;  %v3235_v56 = vrot.slane %v3207_v48, %v7646_v59  ;;  %v3656_v24 = vld [vmem:[%s7023_s28 + $0x3c] sm:$0x2]  ;;  %v3659_v34 = vld [vmem:[%s7023_s28 + $0x40] sm:$0x2] }
 0x58f   : > { %3619 = vst [vmem:[%s7023_s28 + $0x8] sm:$0x2] %v3618_v36  ;;  %3628 = vst [vmem:[%s7023_s28 + $0x14] sm:$0x2] %v3627_v42  ;;  %v3401_v12 = vrot.slane %v6108_v44, %v7650_v25  ;;  %v3328_v14 = vpack.i.b16 %v3296_v31, %v3296_v31  ;;  %v3415_v37 = vrot.slane %v6109_v23, %v7650_v25  ;;  %v3662_v23 = vld [vmem:[%s7023_s28 + $0x44] sm:$0x2] }
 0x590   : > { %v3330_v17 = vpack.i.b16 %v3298_v26, %v3298_v26  ;;  %v3621_v29 = vsel %vm8615_vm3, %v3380_v49, %v3620_v27  ;;  %v6110_v16 = vpack.i.b16 %v3235_v56, %v3235_v56  ;;  %v3300_v28 = vunpack.i.h.s16 %v3235_v56 }
 0x591   : > { %v3237_v50 = vcombine.high %v3221_v32, %v3221_v32  ;;  %3622 = vst [vmem:[%s7023_s28 + $0xc] sm:$0x2] %v3621_v29  ;;  %v3630_v61 = vsel %vm8615_vm3, %v3401_v12, %v3629_v43  ;;  %v3408_v62 = vrot.slane %v3328_v14, %v7650_v25  ;;  %v3636_v63 = vsel %vm8615_vm3, %v3415_v37, %v3635_v20  ;;  %v3665_v12 = vld [vmem:[%s7023_s28 + $0x48] sm:$0x2]  ;;  %v3671_v14 = vld [vmem:[%s7023_s28 + $0x50] sm:$0x2] }
 0x592   : > { %v3422_v38 = vrot.slane %v3330_v17, %v7650_v25  ;;  %3631 = vst [vmem:[%s7023_s28 + $0x18] sm:$0x2] %v3630_v61  ;;  %3637 = vst [vmem:[%s7023_s28 + $0x20] sm:$0x2] %v3636_v63  ;;  %v3429_v47 = vrot.slane %v6110_v16, %v7650_v25  ;;  %v3332_v22 = vpack.i.b16 %v3300_v28, %v3300_v28  ;;  %v3668_v28 = vld [vmem:[%s7023_s28 + $0x4c] sm:$0x2] }
 0x593   : > { %v6111_v5 = vpack.i.b16 %v3237_v50, %v3237_v50  ;;  %v3302_v6 = vunpack.i.h.s16 %v3237_v50  ;;  %v3633_v39 = vsel %vm8615_vm3, %v3408_v62, %v3632_v30  ;;  %v3239_v53 = vcombine.high %v3235_v56, %v3235_v56  ;;  %v3674_v50 = vld [vmem:[%s7023_s28 + $0x54] sm:$0x2] }
 0x594   : > { %v3639_v54 = vsel %vm8615_vm3, %v3422_v38, %v3638_v41  ;;  %v3247_v0 = vrot.slane %v3188_v10, %v7646_v59  ;;  %3634 = vst [vmem:[%s7023_s28 + $0x1c] sm:$0x2] %v3633_v39  ;;  %v3642_v1 = vsel %vm8615_vm3, %v3429_v47, %v3641_v3  ;;  %v3436_v9 = vrot.slane %v3332_v22, %v7650_v25 }
 0x595   : > { %3640 = vst [vmem:[%s7023_s28 + $0x24] sm:$0x2] %v3639_v54  ;;  %v3443_v55 = vrot.slane %v6111_v5, %v7650_v25  ;;  %v3334_v11 = vpack.i.b16 %v3302_v6, %v3302_v6  ;;  %3643 = vst [vmem:[%s7023_s28 + $0x28] sm:$0x2] %v3642_v1  ;;  %v6112_v15 = vpack.i.b16 %v3239_v53, %v3239_v53  ;;  %v3304_v33 = vunpack.i.h.s16 %v3239_v53  ;;  %v3677_v5 = vld [vmem:[%s7023_s28 + $0x58] sm:$0x2] }
 0x596   : > { %v3263_v2 = vrot.slane %v3247_v0, %v7646_v59  ;;  %v3255_v10 = vcombine.high %v3247_v0, %v3247_v0  ;;  %v3645_v57 = vsel %vm8615_vm3, %v3436_v9, %v3644_v8  ;;  %v8746_v60 = vrot.slane %v6104_v19, %v7646_v59  ;;  %v3683_v6 = vld [vmem:[%s7023_s28 + $0x60] sm:$0x2]  ;;  %v4235_v0 = vld [vmem:[#allocation4 + $0xa8] sm:$0xff] }
 0x597   : > { %v3648_v45 = vsel %vm8615_vm3, %v3443_v55, %v3647_v40  ;;  %v3450_v58 = vrot.slane %v3334_v11, %v7650_v25  ;;  %3646 = vst [vmem:[%s7023_s28 + $0x2c] sm:$0x2] %v3645_v57  ;;  %v3457_v52 = vrot.slane %v6112_v15, %v7650_v25  ;;  %v3336_v51 = vpack.i.b16 %v3304_v33, %v3304_v33  ;;  %v4234_v53 = vld [vmem:[#allocation4 + $0xa0] sm:$0xff]  ;;  %v3680_v55 = vld [vmem:[%s7023_s28 + $0x5c] sm:$0x2]  ;;  %v8800_v15 = vld [vmem:[#allocation4 + $0xb0] sm:$0xff] }
 0x598   : > { %3649 = vst [vmem:[%s7023_s28 + $0x30] sm:$0x2] %v3648_v45  ;;  %v6113_v7 = vpack.i.b16 %v3263_v2, %v3263_v2  ;;  %v3306_v32 = vunpack.i.h.s16 %v3263_v2  ;;  %v3277_v21 = vrot.slane %v3255_v10, %v7646_v59  ;;  %v3285_v46 = vcombine.high %v3263_v2, %v3263_v2  ;;  %v8802_v33 = vld [vmem:[#allocation4 + $0xb8] sm:$0xff] }
 0x599   : > { %v3651_v48 = vsel %vm8615_vm3, %v3450_v58, %v3650_v18  ;;  %v3270_v4 = vrot.slane %v8746_v60, %v7646_v59  ;;  %v3654_v19 = vsel %vm8615_vm3, %v3457_v52, %v3653_v35  ;;  %v3464_v27 = vrot.slane %v3336_v51, %v7650_v25  ;;  %v3686_v58 = vld [vmem:[%s7023_s28 + $0x64] sm:$0x2] }
 0x59a   : > { %3652 = vst [vmem:[%s7023_s28 + $0x34] sm:$0x2] %v3651_v48  ;;  %v3471_v44 = vrot.slane %v6113_v7, %v7650_v25  ;;  %v3338_v31 = vpack.i.b16 %v3306_v32, %v3306_v32  ;;  %3655 = vst [vmem:[%s7023_s28 + $0x38] sm:$0x2] %v3654_v19  ;;  %v6114_v26 = vpack.i.b16 %v3277_v21, %v3277_v21  ;;  %v3308_v36 = vunpack.i.h.s16 %v3277_v21  ;;  %v3695_v48 = vld [vmem:[%s7023_s28 + $0x70] sm:$0x2] }
 0x59b   : > { %v6115_v49 = vpack.i.b16 %v3285_v46, %v3285_v46  ;;  %v3310_v42 = vunpack.i.h.s16 %v3285_v46  ;;  %v3657_v43 = vsel %vm8615_vm3, %v3464_v27, %v3656_v24  ;;  %v3287_v37 = vcombine.high %v3277_v21, %v3277_v21 }
 0x59c   : > { %v3660_v20 = vsel %vm8615_vm3, %v3471_v44, %v3659_v34  ;;  %v3478_v56 = vrot.slane %v3338_v31, %v7650_v25  ;;  %3658 = vst [vmem:[%s7023_s28 + $0x3c] sm:$0x2] %v3657_v43  ;;  %v3485_v17 = vrot.slane %v6114_v26, %v7650_v25  ;;  %v3340_v29 = vpack.i.b16 %v3308_v36, %v3308_v36  ;;  %v3689_v44 = vld [vmem:[%s7023_s28 + $0x68] sm:$0x2]  ;;  %v3698_v31 = vld [vmem:[%s7023_s28 + $0x74] sm:$0x2] }
 0x59d   : > { %3661 = vst [vmem:[%s7023_s28 + $0x40] sm:$0x2] %v3660_v20  ;;  %v3499_v30 = vrot.slane %v6115_v49, %v7650_v25  ;;  %v3342_v41 = vpack.i.b16 %v3310_v42, %v3310_v42  ;;  %v6116_v61 = vpack.i.b16 %v3287_v37, %v3287_v37  ;;  %v3312_v62 = vunpack.i.h.s16 %v3287_v37 }
 0x59e   : > { %v3663_v16 = vsel %vm8615_vm3, %v3478_v56, %v3662_v23  ;;  %v6117_v63 = vpack.i.b16 %v3270_v4, %v3270_v4  ;;  %v3666_v38 = vsel %vm8615_vm3, %v3485_v17, %v3665_v12  ;;  %v3492_v3 = vrot.slane %v3340_v29, %v7650_v25  ;;  %v3692_v56 = vld [vmem:[%s7023_s28 + $0x6c] sm:$0x2] }
 0x59f   : > { %3664 = vst [vmem:[%s7023_s28 + $0x44] sm:$0x2] %v3663_v16  ;;  %v3672_v47 = vsel %vm8615_vm3, %v3499_v30, %v3671_v14  ;;  %v3506_v22 = vrot.slane %v3342_v41, %v7650_v25  ;;  %3667 = vst [vmem:[%s7023_s28 + $0x48] sm:$0x2] %v3666_v38  ;;  %v3513_v39 = vrot.slane %v6116_v61, %v7650_v25  ;;  %v3314_v40 = vunpack.i.h.s16 %v3270_v4  ;;  %v3701_v16 = vld [vmem:[%s7023_s28 + $0x78] sm:$0x2] }
 0x5a0   : > { %3673 = vst [vmem:[%s7023_s28 + $0x50] sm:$0x2] %v3672_v47  ;;  %v3344_v54 = vpack.i.b16 %v3312_v62, %v3312_v62  ;;  %v3527_v8 = vrot.slane %v6117_v63, %v7650_v25  ;;  %v3669_v1 = vsel %vm8615_vm3, %v3492_v3, %v3668_v28  ;;  %v3256_v11 = vcombine.high %v8746_v60, %v8746_v60  ;;  %v3704_v47 = vld [vmem:[%s7023_s28 + $0x7c] sm:$0x2] }
 0x5a1   : > { %v3675_v9 = vsel %vm8615_vm3, %v3506_v22, %v3674_v50  ;;  %v3286_v18 = vcombine.high %v3270_v4, %v3270_v4  ;;  %3670 = vst [vmem:[%s7023_s28 + $0x4c] sm:$0x2] %v3669_v1  ;;  %v3678_v2 = vsel %vm8615_vm3, %v3513_v39, %v3677_v5  ;;  %v3346_v45 = vpack.i.b16 %v3314_v40, %v3314_v40  ;;  %v4662_v22 = vld [vmem:[%s7023_s28] sm:$0x4] }
 0x5a2   : > { %3676 = vst [vmem:[%s7023_s28 + $0x54] sm:$0x2] %v3675_v9  ;;  %v3520_v10 = vrot.slane %v3344_v54, %v7650_v25  ;;  %v3684_v57 = vsel %vm8615_vm3, %v3527_v8, %v3683_v6  ;;  %3679 = vst [vmem:[%s7023_s28 + $0x58] sm:$0x2] %v3678_v2  ;;  %v3284_v35 = vrot.slane %v3256_v11, %v7646_v59 }
 0x5a3   : > { %3685 = vst [vmem:[%s7023_s28 + $0x60] sm:$0x2] %v3684_v57  ;;  %v6119_v60 = vpack.i.b16 %v3286_v18, %v3286_v18  ;;  %v3318_v52 = vunpack.i.h.s16 %v3286_v18  ;;  %v4238_v51 = vpack.c.bf16 %v4235_v0, %v4234_v53  ;;  %v3534_v32 = vrot.slane %v3346_v45, %v7650_v25  ;;  %v4668_v57 = vld [vmem:[%s7023_s28 + $0x8] sm:$0x4]  ;;  %v4674_v45 = vld [vmem:[%s7023_s28 + $0x10] sm:$0x4] }
 0x5a4   : > { %v3681_v7 = vsel %vm8615_vm3, %v3520_v10, %v3680_v55  ;;  %v6139_v24 = vpack.c.bf16 %v4235_v0, %v4235_v0  ;;  %v4239_v34 = vpack.c.bf16 %v8802_v33, %v8800_v15  ;;  %v6118_v21 = vpack.i.b16 %v3284_v35, %v3284_v35  ;;  %v4665_v0 = vld [vmem:[%s7023_s28 + $0x4] sm:$0x4] }
 0x5a5   : > { %3682 = vst [vmem:[%s7023_s28 + $0x5c] sm:$0x2] %v3681_v7  ;;  %v3316_v46 = vunpack.i.h.s16 %v3284_v35  ;;  %v3555_v4 = vrot.slane %v6119_v60, %v7650_v25  ;;  %v3350_v19 = vpack.i.b16 %v3318_v52, %v3318_v52  ;;  %v3687_v27 = vsel %vm8615_vm3, %v3534_v32, %v3686_v58  ;;  %v4671_v32 = vld [vmem:[%s7023_s28 + $0xc] sm:$0x4] }
 0x5a6   : > { %v3288_v23 = vcombine.high %v3284_v35, %v3284_v35  ;;  %v4249_v26 = vrot.slane %v4238_v51, %v7646_v59  ;;  %v8829_v36 = vrot.slane %v6139_v24, %v7646_v59  ;;  %3688 = vst [vmem:[%s7023_s28 + $0x64] sm:$0x2] %v3687_v27  ;;  %v3541_v49 = vrot.slane %v6118_v21, %v7650_v25  ;;  %v4686_v51 = vld [vmem:[%s7023_s28 + $0x20] sm:$0x4] }
 0x5a7   : > { %v3348_v42 = vpack.i.b16 %v3316_v46, %v3316_v46  ;;  %v3696_v43 = vsel %vm8615_vm3, %v3555_v4, %v3695_v48  ;;  %v3562_v20 = vrot.slane %v3350_v19, %v7650_v25  ;;  %v4677_v48 = vld [vmem:[%s7023_s28 + $0x14] sm:$0x4] }
 0x5a8   : > { %3697 = vst [vmem:[%s7023_s28 + $0x70] sm:$0x2] %v3696_v43  ;;  %v6120_v12 = vpack.i.b16 %v3288_v23, %v3288_v23  ;;  %v3320_v14 = vunpack.i.h.s16 %v3288_v23  ;;  %v4265_v37 = vrot.slane %v4249_v26, %v7646_v59  ;;  %v4257_v17 = vcombine.high %v4249_v26, %v4249_v26 }
 0x5a9   : > { %v3690_v29 = vsel %vm8615_vm3, %v3541_v49, %v3689_v44  ;;  %v3548_v30 = vrot.slane %v3348_v42, %v7650_v25  ;;  %v3699_v41 = vsel %vm8615_vm3, %v3562_v20, %v3698_v31  ;;  %v8847_v28 = vrot.slane %v8829_v36, %v7646_v59  ;;  %v4680_v31 = vld [vmem:[%s7023_s28 + $0x18] sm:$0x4] }
 0x5aa   : > { %3691 = vst [vmem:[%s7023_s28 + $0x68] sm:$0x2] %v3690_v29  ;;  %3700 = vst [vmem:[%s7023_s28 + $0x74] sm:$0x2] %v3699_v41  ;;  %v3569_v50 = vrot.slane %v6120_v12, %v7650_v25  ;;  %v3352_v61 = vpack.i.b16 %v3320_v14, %v3320_v14  ;;  %v6141_v62 = vpack.i.b16 %v4265_v37, %v4265_v37  ;;  %v4341_v63 = vunpack.i.h.s16 %v4265_v37 }
 0x5ab   : > { %v3693_v3 = vsel %vm8615_vm3, %v3548_v30, %v3692_v56  ;;  %v4279_v5 = vrot.slane %v4257_v17, %v7646_v59  ;;  %v4287_v6 = vcombine.high %v4265_v37, %v4265_v37  ;;  %v6145_v39 = vpack.i.b16 %v8847_v28, %v8847_v28  ;;  %v4683_v56 = vld [vmem:[%s7023_s28 + $0x1c] sm:$0x4] }
 0x5ac   : > { %3694 = vst [vmem:[%s7023_s28 + $0x6c] sm:$0x2] %v3693_v3  ;;  %v3702_v54 = vsel %vm8615_vm3, %v3569_v50, %v3701_v16  ;;  %v3576_v8 = vrot.slane %v3352_v61, %v7650_v25  ;;  %v4410_v40 = vrot.slane %v6141_v62, %v7650_v25  ;;  %v4373_v53 = vpack.i.b16 %v4341_v63, %v4341_v63  ;;  %v4698_v63 = vld [vmem:[%s7023_s28 + $0x30] sm:$0x4] }
 0x5ad   : > { %3703 = vst [vmem:[%s7023_s28 + $0x78] sm:$0x2] %v3702_v54  ;;  %v6142_v1 = vpack.i.b16 %v4279_v5, %v4279_v5  ;;  %v4343_v9 = vunpack.i.h.s16 %v4279_v5  ;;  %v6143_v55 = vpack.i.b16 %v4287_v6, %v4287_v6  ;;  %v4345_v11 = vunpack.i.h.s16 %v4287_v6  ;;  %v4701_v54 = vld [vmem:[%s7023_s28 + $0x34] sm:$0x4] }
 0x5ae   : > { %v3705_v18 = vsel %vm8615_vm3, %v3576_v8, %v3704_v47  ;;  %v4663_v2 = vsel %vm8854_vm9, %v4410_v40, %v4662_v22  ;;  %v4417_v10 = vrot.slane %v4373_v53, %v7650_v25  ;;  %v4289_v58 = vcombine.high %v4279_v5, %v4279_v5 }
 0x5af   : > { %3706 = vst [vmem:[%s7023_s28 + $0x7c] sm:$0x2] %v3705_v18  ;;  %4664 = vst [vmem:[%s7023_s28] sm:$0x4] %v4663_v2  ;;  %v4424_v35 = vrot.slane %v6142_v1, %v7650_v25  ;;  %v4375_v60 = vpack.i.b16 %v4343_v9, %v4343_v9  ;;  %v4438_v13 = vrot.slane %v6143_v55, %v7650_v25  ;;  %v4349_v42 = vunpack.i.h.s16 %v8847_v28  ;;  %v4695_v18 = vld [vmem:[%s7023_s28 + $0x2c] sm:$0x4] }
 0x5b0   : > { %v4377_v52 = vpack.i.b16 %v4345_v11, %v4345_v11  ;;  %v4666_v7 = vsel %vm8854_vm9, %v4417_v10, %v4665_v0  ;;  %v6144_v24 = vpack.i.b16 %v4289_v58, %v4289_v58  ;;  %v4347_v21 = vunpack.i.h.s16 %v4289_v58  ;;  %v4710_v11 = vld [vmem:[%s7023_s28 + $0x40] sm:$0x4] }
 0x5b1   : > { %v4466_v46 = vrot.slane %v6145_v39, %v7650_v25  ;;  %4667 = vst [vmem:[%s7023_s28 + $0x4] sm:$0x4] %v4666_v7  ;;  %v4669_v4 = vsel %vm8854_vm9, %v4424_v35, %v4668_v57  ;;  %v4431_v19 = vrot.slane %v4375_v60, %v7650_v25  ;;  %v4675_v27 = vsel %vm8854_vm9, %v4438_v13, %v4674_v45  ;;  %v4692_v39 = vld [vmem:[%s7023_s28 + $0x28] sm:$0x4]  ;;  %v4704_v13 = vld [vmem:[%s7023_s28 + $0x38] sm:$0x4] }
 0x5b2   : > { %v4445_v44 = vrot.slane %v4377_v52, %v7650_v25  ;;  %4670 = vst [vmem:[%s7023_s28 + $0x8] sm:$0x4] %v4669_v4  ;;  %4676 = vst [vmem:[%s7023_s28 + $0x10] sm:$0x4] %v4675_v27  ;;  %v4452_v23 = vrot.slane %v6144_v24, %v7650_v25  ;;  %v4379_v26 = vpack.i.b16 %v4347_v21, %v4347_v21  ;;  %v4713_v52 = vld [vmem:[%s7023_s28 + $0x44] sm:$0x4] }
 0x5b3   : > { %v4687_v49 = vsel %vm8854_vm9, %v4466_v46, %v4686_v51  ;;  %v4672_v43 = vsel %vm8854_vm9, %v4431_v19, %v4671_v32  ;;  %v4258_v12 = vcombine.high %v8829_v36, %v8829_v36  ;;  %v4288_v14 = vcombine.high %v8847_v28, %v8847_v28  ;;  %v4689_v36 = vld [vmem:[%s7023_s28 + $0x24] sm:$0x4]  ;;  %v4707_v46 = vld [vmem:[%s7023_s28 + $0x3c] sm:$0x4] }
 0x5b4   : > { %v4678_v20 = vsel %vm8854_vm9, %v4445_v44, %v4677_v48  ;;  %4688 = vst [vmem:[%s7023_s28 + $0x20] sm:$0x4] %v4687_v49  ;;  %4673 = vst [vmem:[%s7023_s28 + $0xc] sm:$0x4] %v4672_v43  ;;  %v4681_v37 = vsel %vm8854_vm9, %v4452_v23, %v4680_v31  ;;  %v4459_v17 = vrot.slane %v4379_v26, %v7650_v25  ;;  %v4716_v26 = vld [vmem:[%s7023_s28 + $0x48] sm:$0x4] }
 0x5b5   : > { %4679 = vst [vmem:[%s7023_s28 + $0x14] sm:$0x4] %v4678_v20  ;;  %v4381_v29 = vpack.i.b16 %v4349_v42, %v4349_v42  ;;  %v4298_v30 = vrot.slane %v4239_v34, %v7646_v59  ;;  %4682 = vst [vmem:[%s7023_s28 + $0x18] sm:$0x4] %v4681_v37  ;;  %v4286_v41 = vrot.slane %v4258_v12, %v7646_v59  ;;  %v4353_v28 = vunpack.i.h.s16 %v4288_v14  ;;  %v5285_v12 = vld [vmem:[#allocation4 + $0xe0] sm:$0xff] }
 0x5b6   : > { %v6147_v16 = vpack.i.b16 %v4288_v14, %v4288_v14  ;;  %v6140_v50 = vpack.c.bf16 %v8802_v33, %v8802_v33  ;;  %v4684_v61 = vsel %vm8854_vm9, %v4459_v17, %v4683_v56  ;;  %v4719_v37 = vld [vmem:[%s7023_s28 + $0x4c] sm:$0x4]  ;;  %v4722_v17 = vld [vmem:[%s7023_s28 + $0x50] sm:$0x4] }
 0x5b7   : > { %v4473_v62 = vrot.slane %v4381_v29, %v7650_v25  ;;  %v4314_v15 = vrot.slane %v4298_v30, %v7646_v59  ;;  %v4306_v34 = vcombine.high %v4298_v30, %v4298_v30  ;;  %4685 = vst [vmem:[%s7023_s28 + $0x1c] sm:$0x4] %v4684_v61  ;;  %v6146_v3 = vpack.i.b16 %v4286_v41, %v4286_v41 }
 0x5b8   : > { %v4351_v47 = vunpack.i.h.s16 %v4286_v41  ;;  %v4494_v22 = vrot.slane %v6147_v16, %v7650_v25  ;;  %v4385_v5 = vpack.i.b16 %v4353_v28, %v4353_v28  ;;  %v4290_v8 = vcombine.high %v4286_v41, %v4286_v41  ;;  %v8983_v41 = vld [vmem:[#allocation4 + $0xe8] sm:$0xff] }
 0x5b9   : > { %v4690_v6 = vsel %vm8854_vm9, %v4473_v62, %v4689_v36  ;;  %v6149_v40 = vpack.i.b16 %v4314_v15, %v4314_v15  ;;  %v4357_v53 = vunpack.i.h.s16 %v4314_v15  ;;  %v4480_v0 = vrot.slane %v6146_v3, %v7650_v25 }
 0x5ba   : > { %4691 = vst [vmem:[%s7023_s28 + $0x24] sm:$0x4] %v4690_v6  ;;  %v4383_v1 = vpack.i.b16 %v4351_v47, %v4351_v47  ;;  %v4699_v9 = vsel %vm8854_vm9, %v4494_v22, %v4698_v63  ;;  %v4501_v55 = vrot.slane %v4385_v5, %v7650_v25  ;;  %v6148_v2 = vpack.i.b16 %v4290_v8, %v4290_v8  ;;  %v4728_v63 = vld [vmem:[%s7023_s28 + $0x58] sm:$0x4]  ;;  %v4731_v6 = vld [vmem:[%s7023_s28 + $0x5c] sm:$0x4] }
 0x5bb   : > { %4700 = vst [vmem:[%s7023_s28 + $0x30] sm:$0x4] %v4699_v9  ;;  %v4355_v10 = vunpack.i.h.s16 %v4290_v8  ;;  %v4522_v57 = vrot.slane %v6149_v40, %v7650_v25  ;;  %v4389_v45 = vpack.i.b16 %v4357_v53, %v4357_v53  ;;  %v4693_v58 = vsel %vm8854_vm9, %v4480_v0, %v4692_v39 }
 0x5bc   : > { %v4487_v35 = vrot.slane %v4383_v1, %v7650_v25  ;;  %v4702_v60 = vsel %vm8854_vm9, %v4501_v55, %v4701_v54  ;;  %v4328_v51 = vrot.slane %v4306_v34, %v7646_v59  ;;  %4694 = vst [vmem:[%s7023_s28 + $0x28] sm:$0x4] %v4693_v58  ;;  %v4508_v7 = vrot.slane %v6148_v2, %v7650_v25  ;;  %v4734_v1 = vld [vmem:[%s7023_s28 + $0x60] sm:$0x4] }
 0x5bd   : > { %4703 = vst [vmem:[%s7023_s28 + $0x34] sm:$0x4] %v4702_v60  ;;  %v4387_v32 = vpack.i.b16 %v4355_v10, %v4355_v10  ;;  %v4711_v48 = vsel %vm8854_vm9, %v4522_v57, %v4710_v11  ;;  %v4529_v24 = vrot.slane %v4389_v45, %v7650_v25  ;;  %v4336_v27 = vcombine.high %v4314_v15, %v4314_v15  ;;  %v4725_v15 = vld [vmem:[%s7023_s28 + $0x54] sm:$0x4]  ;;  %v4737_v45 = vld [vmem:[%s7023_s28 + $0x64] sm:$0x4] }
 0x5be   : > { %v4696_v21 = vsel %vm8854_vm9, %v4487_v35, %v4695_v18  ;;  %4712 = vst [vmem:[%s7023_s28 + $0x40] sm:$0x4] %v4711_v48  ;;  %v6150_v4 = vpack.i.b16 %v4328_v51, %v4328_v51  ;;  %v4359_v19 = vunpack.i.h.s16 %v4328_v51  ;;  %v4705_v44 = vsel %vm8854_vm9, %v4508_v7, %v4704_v13  ;;  %v4740_v7 = vld [vmem:[%s7023_s28 + $0x68] sm:$0x4] }
 0x5bf   : > { %4697 = vst [vmem:[%s7023_s28 + $0x2c] sm:$0x4] %v4696_v21  ;;  %v4515_v31 = vrot.slane %v4387_v32, %v7650_v25  ;;  %v4714_v23 = vsel %vm8854_vm9, %v4529_v24, %v4713_v52  ;;  %v4338_v49 = vcombine.high %v4328_v51, %v4328_v51  ;;  %4706 = vst [vmem:[%s7023_s28 + $0x38] sm:$0x4] %v4705_v44  ;;  %v4361_v56 = vunpack.i.h.s16 %v4336_v27  ;;  %v4746_v32 = vld [vmem:[%s7023_s28 + $0x70] sm:$0x4] }
 0x5c0   : > { %4715 = vst [vmem:[%s7023_s28 + $0x44] sm:$0x4] %v4714_v23  ;;  %v4536_v42 = vrot.slane %v6150_v4, %v7650_v25  ;;  %v4391_v43 = vpack.i.b16 %v4359_v19, %v4359_v19  ;;  %v6151_v20 = vpack.i.b16 %v4336_v27, %v4336_v27  ;;  %v4305_v36 = vrot.slane %v6140_v50, %v7646_v59  ;;  %v4743_v44 = vld [vmem:[%s7023_s28 + $0x6c] sm:$0x4] }
 0x5c1   : > { %v4708_v14 = vsel %vm8854_vm9, %v4515_v31, %v4707_v46  ;;  %v6152_v29 = vpack.i.b16 %v4338_v49, %v4338_v49  ;;  %v4363_v30 = vunpack.i.h.s16 %v4338_v49  ;;  %v4393_v62 = vpack.i.b16 %v4361_v56, %v4361_v56  ;;  %v4749_v31 = vld [vmem:[%s7023_s28 + $0x74] sm:$0x4] }
 0x5c2   : > { %4709 = vst [vmem:[%s7023_s28 + $0x3c] sm:$0x4] %v4708_v14  ;;  %v4717_v16 = vsel %vm8854_vm9, %v4536_v42, %v4716_v26  ;;  %v4543_v28 = vrot.slane %v4391_v43, %v7650_v25  ;;  %v4550_v61 = vrot.slane %v6151_v20, %v7650_v25  ;;  %v4321_v34 = vrot.slane %v4305_v36, %v7646_v59  ;;  %v4752_v14 = vld [vmem:[%s7023_s28 + $0x78] sm:$0x4] }
 0x5c3   : > { %4718 = vst [vmem:[%s7023_s28 + $0x48] sm:$0x4] %v4717_v16  ;;  %v4564_v33 = vrot.slane %v6152_v29, %v7650_v25  ;;  %v4395_v50 = vpack.i.b16 %v4363_v30, %v4363_v30  ;;  %v4307_v3 = vcombine.high %v4305_v36, %v4305_v36  ;;  %v4557_v5 = vrot.slane %v4393_v62, %v7650_v25 }
 0x5c4   : > { %v4720_v47 = vsel %vm8854_vm9, %v4543_v28, %v4719_v37  ;;  %v4723_v22 = vsel %vm8854_vm9, %v4550_v61, %v4722_v17  ;;  %v5289_v39 = vpack.c.bf16 %v8983_v41, %v5285_v12  ;;  %v6153_v40 = vpack.i.b16 %v4321_v34, %v4321_v34  ;;  %v5713_v37 = vld [vmem:[%s7023_s28] sm:$0x8]  ;;  %v4755_v28 = vld [vmem:[%s7023_s28 + $0x7c] sm:$0x4] }
 0x5c5   : > { %4721 = vst [vmem:[%s7023_s28 + $0x4c] sm:$0x4] %v4720_v47  ;;  %4724 = vst [vmem:[%s7023_s28 + $0x50] sm:$0x4] %v4723_v22  ;;  %v4729_v54 = vsel %vm8854_vm9, %v4564_v33, %v4728_v63  ;;  %v4571_v8 = vrot.slane %v4395_v50, %v7650_v25  ;;  %v4365_v53 = vunpack.i.h.s16 %v4321_v34  ;;  %v4726_v0 = vsel %vm8854_vm9, %v4557_v5, %v4725_v15  ;;  %v9058_v63 = vld [vmem:[#allocation4 + $0xf0] sm:$0xff]  ;;  %v9060_v15 = vld [vmem:[#allocation4 + $0xf8] sm:$0xff] }
 0x5c6   : > { %4730 = vst [vmem:[%s7023_s28 + $0x58] sm:$0x4] %v4729_v54  ;;  %v4335_v9 = vrot.slane %v4307_v3, %v7646_v59  ;;  %v4337_v55 = vcombine.high %v4321_v34, %v4321_v34  ;;  %v5300_v11 = vrot.slane %v5289_v39, %v7646_v59  ;;  %4727 = vst [vmem:[%s7023_s28 + $0x54] sm:$0x4] %v4726_v0  ;;  %v5716_v47 = vld [vmem:[%s7023_s28 + $0x4] sm:$0x8] }
 0x5c7   : > { %v4732_v18 = vsel %vm8854_vm9, %v4571_v8, %v4731_v6  ;;  %v4578_v2 = vrot.slane %v6153_v40, %v7650_v25  ;;  %v4397_v10 = vpack.i.b16 %v4365_v53, %v4365_v53  ;;  %v6175_v57 = vpack.c.bf16 %v8983_v41, %v8983_v41  ;;  %v5725_v40 = vld [vmem:[%s7023_s28 + $0x10] sm:$0x8] }
 0x5c8   : > { %4733 = vst [vmem:[%s7023_s28 + $0x5c] sm:$0x4] %v4732_v18  ;;  %v6154_v58 = vpack.i.b16 %v4335_v9, %v4335_v9  ;;  %v4367_v35 = vunpack.i.h.s16 %v4335_v9  ;;  %v6155_v60 = vpack.i.b16 %v4337_v55, %v4337_v55  ;;  %v4369_v13 = vunpack.i.h.s16 %v4337_v55  ;;  %v5719_v18 = vld [vmem:[%s7023_s28 + $0x8] sm:$0x8] }
 0x5c9   : > { %v4735_v52 = vsel %vm8854_vm9, %v4578_v2, %v4734_v1  ;;  %v4585_v51 = vrot.slane %v4397_v10, %v7650_v25  ;;  %v4339_v48 = vcombine.high %v4335_v9, %v4335_v9  ;;  %v5316_v24 = vrot.slane %v5300_v11, %v7646_v59  ;;  %v5728_v2 = vld [vmem:[%s7023_s28 + $0x14] sm:$0x8] }
 0x5ca   : > { %4736 = vst [vmem:[%s7023_s28 + $0x60] sm:$0x4] %v4735_v52  ;;  %v4592_v21 = vrot.slane %v6154_v58, %v7650_v25  ;;  %v4399_v46 = vpack.i.b16 %v4367_v35, %v4367_v35  ;;  %v4606_v4 = vrot.slane %v6155_v60, %v7650_v25  ;;  %v4401_v19 = vpack.i.b16 %v4369_v13, %v4369_v13  ;;  %v5722_v52 = vld [vmem:[%s7023_s28 + $0xc] sm:$0x8] }
 0x5cb   : > { %v4738_v27 = vsel %vm8854_vm9, %v4585_v51, %v4737_v45  ;;  %v6156_v23 = vpack.i.b16 %v4339_v48, %v4339_v48  ;;  %v4371_v26 = vunpack.i.h.s16 %v4339_v48  ;;  %v6177_v49 = vpack.i.b16 %v5316_v24, %v5316_v24 }
 0x5cc   : > { %4739 = vst [vmem:[%s7023_s28 + $0x64] sm:$0x4] %v4738_v27  ;;  %v4741_v43 = vsel %vm8854_vm9, %v4592_v21, %v4740_v7  ;;  %v4599_v20 = vrot.slane %v4399_v46, %v7650_v25  ;;  %v4747_v56 = vsel %vm8854_vm9, %v4606_v4, %v4746_v32  ;;  %v4613_v12 = vrot.slane %v4401_v19, %v7650_v25  ;;  %v5731_v4 = vld [vmem:[%s7023_s28 + $0x18] sm:$0x8]  ;;  %v5737_v19 = vld [vmem:[%s7023_s28 + $0x20] sm:$0x8] }
 0x5cd   : > { %4742 = vst [vmem:[%s7023_s28 + $0x68] sm:$0x4] %v4741_v43  ;;  %4748 = vst [vmem:[%s7023_s28 + $0x70] sm:$0x4] %v4747_v56  ;;  %v4620_v17 = vrot.slane %v6156_v23, %v7650_v25  ;;  %v4403_v29 = vpack.i.b16 %v4371_v26, %v4371_v26  ;;  %v5461_v30 = vrot.slane %v6177_v49, %v7650_v25  ;;  %v5392_v36 = vunpack.i.h.s16 %v5316_v24  ;;  %v5734_v43 = vld [vmem:[%s7023_s28 + $0x1c] sm:$0x8] }
 0x5ce   : > { %v4744_v41 = vsel %vm8854_vm9, %v4599_v20, %v4743_v44  ;;  %v4750_v16 = vsel %vm8854_vm9, %v4613_v12, %v4749_v31  ;;  %v5308_v61 = vcombine.high %v5300_v11, %v5300_v11  ;;  %v5338_v62 = vcombine.high %v5316_v24, %v5316_v24  ;;  %v5740_v20 = vld [vmem:[%s7023_s28 + $0x24] sm:$0x8] }
 0x5cf   : > { %4745 = vst [vmem:[%s7023_s28 + $0x6c] sm:$0x4] %v4744_v41  ;;  %4751 = vst [vmem:[%s7023_s28 + $0x74] sm:$0x4] %v4750_v16  ;;  %v4753_v33 = vsel %vm8854_vm9, %v4620_v17, %v4752_v14  ;;  %v4627_v50 = vrot.slane %v4403_v29, %v7650_v25  ;;  %v5714_v34 = vsel %vm9036_vm6, %v5461_v30, %v5713_v37 }
 0x5d0   : > { %v5424_v3 = vpack.i.b16 %v5392_v36, %v5392_v36  ;;  %4754 = vst [vmem:[%s7023_s28 + $0x78] sm:$0x4] %v4753_v33  ;;  %5715 = vst [vmem:[%s7023_s28] sm:$0x8] %v5714_v34  ;;  %v5330_v22 = vrot.slane %v5308_v61, %v7646_v59  ;;  %v6179_v5 = vpack.i.b16 %v5338_v62, %v5338_v62  ;;  %v5396_v6 = vunpack.i.h.s16 %v5338_v62  ;;  %v5743_v36 = vld [vmem:[%s7023_s28 + $0x28] sm:$0x8] }
 0x5d1   : > { %v5307_v39 = vrot.slane %v6175_v57, %v7646_v59  ;;  %v4756_v54 = vsel %vm8854_vm9, %v4627_v50, %v4755_v28  ;;  %v5290_v53 = vpack.c.bf16 %v9060_v15, %v9058_v63  ;;  %v6176_v0 = vpack.c.bf16 %v9060_v15, %v9060_v15  ;;  %v5746_v33 = vld [vmem:[%s7023_s28 + $0x2c] sm:$0x8]  ;;  %v5749_v50 = vld [vmem:[%s7023_s28 + $0x30] sm:$0x8] }
 0x5d2   : > { %v5468_v8 = vrot.slane %v5424_v3, %v7650_v25  ;;  %4757 = vst [vmem:[%s7023_s28 + $0x7c] sm:$0x4] %v4756_v54  ;;  %v6178_v1 = vpack.i.b16 %v5330_v22, %v5330_v22  ;;  %v5394_v9 = vunpack.i.h.s16 %v5330_v22  ;;  %v5489_v55 = vrot.slane %v6179_v5, %v7650_v25 }
 0x5d3   : > { %v5428_v11 = vpack.i.b16 %v5396_v6, %v5396_v6  ;;  %v5340_v10 = vcombine.high %v5330_v22, %v5330_v22  ;;  %v5323_v57 = vrot.slane %v5307_v39, %v7646_v59  ;;  %v5309_v45 = vcombine.high %v5307_v39, %v5307_v39  ;;  %v5752_v39 = vld [vmem:[%s7023_s28 + $0x34] sm:$0x8] }
 0x5d4   : > { %v5717_v38 = vsel %vm9036_vm6, %v5468_v8, %v5716_v47  ;;  %v5475_v58 = vrot.slane %v6178_v1, %v7650_v25  ;;  %v5426_v35 = vpack.i.b16 %v5394_v9, %v5394_v9  ;;  %v5726_v60 = vsel %vm9036_vm6, %v5489_v55, %v5725_v40 }
 0x5d5   : > { %5718 = vst [vmem:[%s7023_s28 + $0x4] sm:$0x8] %v5717_v38  ;;  %v5496_v13 = vrot.slane %v5428_v11, %v7650_v25  ;;  %5727 = vst [vmem:[%s7023_s28 + $0x10] sm:$0x8] %v5726_v60  ;;  %v6180_v51 = vpack.i.b16 %v5340_v10, %v5340_v10  ;;  %v5398_v7 = vunpack.i.h.s16 %v5340_v10  ;;  %v6181_v32 = vpack.i.b16 %v5323_v57, %v5323_v57  ;;  %v5755_v11 = vld [vmem:[%s7023_s28 + $0x38] sm:$0x8] }
 0x5d6   : > { %v5400_v48 = vunpack.i.h.s16 %v5323_v57  ;;  %v5720_v24 = vsel %vm9036_vm6, %v5475_v58, %v5719_v18  ;;  %v5482_v21 = vrot.slane %v5426_v35, %v7650_v25  ;;  %v5337_v27 = vrot.slane %v5309_v45, %v7646_v59  ;;  %v5758_v58 = vld [vmem:[%s7023_s28 + $0x3c] sm:$0x8]  ;;  %v5761_v35 = vld [vmem:[%s7023_s28 + $0x40] sm:$0x8] }
 0x5d7   : > { %v5729_v46 = vsel %vm9036_vm6, %v5496_v13, %v5728_v2  ;;  %5721 = vst [vmem:[%s7023_s28 + $0x8] sm:$0x8] %v5720_v24  ;;  %v5503_v44 = vrot.slane %v6180_v51, %v7650_v25  ;;  %v5430_v31 = vpack.i.b16 %v5398_v7, %v5398_v7  ;;  %v5517_v23 = vrot.slane %v6181_v32, %v7650_v25  ;;  %v5764_v32 = vld [vmem:[%s7023_s28 + $0x44] sm:$0x8] }
 0x5d8   : > { %5730 = vst [vmem:[%s7023_s28 + $0x14] sm:$0x8] %v5729_v46  ;;  %v5432_v26 = vpack.i.b16 %v5400_v48, %v5400_v48  ;;  %v5723_v49 = vsel %vm9036_vm6, %v5482_v21, %v5722_v52  ;;  %v6182_v56 = vpack.i.b16 %v5337_v27, %v5337_v27  ;;  %v5402_v12 = vunpack.i.h.s16 %v5337_v27 }
 0x5d9   : > { %v5339_v14 = vcombine.high %v5323_v57, %v5323_v57  ;;  %5724 = vst [vmem:[%s7023_s28 + $0xc] sm:$0x8] %v5723_v49  ;;  %v5732_v37 = vsel %vm9036_vm6, %v5503_v44, %v5731_v4  ;;  %v5510_v17 = vrot.slane %v5430_v31, %v7650_v25  ;;  %v5738_v29 = vsel %vm9036_vm6, %v5517_v23, %v5737_v19  ;;  %v5767_v44 = vld [vmem:[%s7023_s28 + $0x48] sm:$0x8]  ;;  %v5773_v31 = vld [vmem:[%s7023_s28 + $0x50] sm:$0x8] }
 0x5da   : > { %v5524_v30 = vrot.slane %v5432_v26, %v7650_v25  ;;  %5733 = vst [vmem:[%s7023_s28 + $0x18] sm:$0x8] %v5732_v37  ;;  %5739 = vst [vmem:[%s7023_s28 + $0x20] sm:$0x8] %v5738_v29  ;;  %v5531_v41 = vrot.slane %v6182_v56, %v7650_v25  ;;  %v5434_v16 = vpack.i.b16 %v5402_v12, %v5402_v12  ;;  %v5770_v12 = vld [vmem:[%s7023_s28 + $0x4c] sm:$0x8] }
 0x5db   : > { %v6183_v28 = vpack.i.b16 %v5339_v14, %v5339_v14  ;;  %v5404_v61 = vunpack.i.h.s16 %v5339_v14  ;;  %v5735_v62 = vsel %vm9036_vm6, %v5510_v17, %v5734_v43  ;;  %v5341_v34 = vcombine.high %v5337_v27, %v5337_v27  ;;  %v5776_v14 = vld [vmem:[%s7023_s28 + $0x54] sm:$0x8] }
 0x5dc   : > { %v5741_v63 = vsel %vm9036_vm6, %v5524_v30, %v5740_v20  ;;  %v5349_v3 = vrot.slane %v5290_v53, %v7646_v59  ;;  %5736 = vst [vmem:[%s7023_s28 + $0x1c] sm:$0x8] %v5735_v62  ;;  %v5744_v47 = vsel %vm9036_vm6, %v5531_v41, %v5743_v36  ;;  %v5538_v22 = vrot.slane %v5434_v16, %v7650_v25 }
 0x5dd   : > { %5742 = vst [vmem:[%s7023_s28 + $0x24] sm:$0x8] %v5741_v63  ;;  %v5545_v5 = vrot.slane %v6183_v28, %v7650_v25  ;;  %v5436_v6 = vpack.i.b16 %v5404_v61, %v5404_v61  ;;  %5745 = vst [vmem:[%s7023_s28 + $0x28] sm:$0x8] %v5744_v47  ;;  %v6184_v54 = vpack.i.b16 %v5341_v34, %v5341_v34  ;;  %v5406_v8 = vunpack.i.h.s16 %v5341_v34  ;;  %v5779_v28 = vld [vmem:[%s7023_s28 + $0x58] sm:$0x8] }
 0x5de   : > { %v5365_v40 = vrot.slane %v5349_v3, %v7646_v59  ;;  %v5357_v53 = vcombine.high %v5349_v3, %v5349_v3  ;;  %v5747_v1 = vsel %vm9036_vm6, %v5538_v22, %v5746_v33  ;;  %v9149_v38 = vrot.slane %v6176_v0, %v7646_v59  ;;  %v5785_v61 = vld [vmem:[%s7023_s28 + $0x60] sm:$0x8]  ;;  %v5782_v47 = vld [vmem:[%s7023_s28 + $0x5c] sm:$0x8] }
 0x5df   : > { %v5750_v9 = vsel %vm9036_vm6, %v5545_v5, %v5749_v50  ;;  %v5552_v55 = vrot.slane %v5436_v6, %v7650_v25  ;;  %5748 = vst [vmem:[%s7023_s28 + $0x2c] sm:$0x8] %v5747_v1  ;;  %v5559_v18 = vrot.slane %v6184_v54, %v7650_v25  ;;  %v5438_v2 = vpack.i.b16 %v5406_v8, %v5406_v8 }
 0x5e0   : > { %5751 = vst [vmem:[%s7023_s28 + $0x30] sm:$0x8] %v5750_v9  ;;  %v6185_v10 = vpack.i.b16 %v5365_v40, %v5365_v40  ;;  %v5408_v57 = vunpack.i.h.s16 %v5365_v40  ;;  %v5379_v60 = vrot.slane %v5357_v53, %v7646_v59  ;;  %v5387_v13 = vcombine.high %v5365_v40, %v5365_v40  ;;  %v5788_v40 = vld [vmem:[%s7023_s28 + $0x64] sm:$0x8] }
 0x5e1   : > { %v5753_v45 = vsel %vm9036_vm6, %v5552_v55, %v5752_v39  ;;  %v5372_v15 = vrot.slane %v9149_v38, %v7646_v59  ;;  %v5756_v0 = vsel %vm9036_vm6, %v5559_v18, %v5755_v11  ;;  %v5566_v52 = vrot.slane %v5438_v2, %v7650_v25 }
 0x5e2   : > { %5754 = vst [vmem:[%s7023_s28 + $0x34] sm:$0x8] %v5753_v45  ;;  %v5573_v51 = vrot.slane %v6185_v10, %v7650_v25  ;;  %v5440_v7 = vpack.i.b16 %v5408_v57, %v5408_v57  ;;  %5757 = vst [vmem:[%s7023_s28 + $0x38] sm:$0x8] %v5756_v0  ;;  %v6186_v48 = vpack.i.b16 %v5379_v60, %v5379_v60  ;;  %v5410_v24 = vunpack.i.h.s16 %v5379_v60  ;;  %v5791_v45 = vld [vmem:[%s7023_s28 + $0x68] sm:$0x8] }
 0x5e3   : > { %v6187_v21 = vpack.i.b16 %v5387_v13, %v5387_v13  ;;  %v5412_v46 = vunpack.i.h.s16 %v5387_v13  ;;  %v5759_v4 = vsel %vm9036_vm6, %v5566_v52, %v5758_v58  ;;  %v5389_v23 = vcombine.high %v5379_v60, %v5379_v60  ;;  %v5800_v58 = vld [vmem:[%s7023_s28 + $0x74] sm:$0x8]  ;;  %v5794_v52 = vld [vmem:[%s7023_s28 + $0x6c] sm:$0x8] }
 0x5e4   : > { %v5762_v19 = vsel %vm9036_vm6, %v5573_v51, %v5761_v35  ;;  %v5580_v27 = vrot.slane %v5440_v7, %v7650_v25  ;;  %5760 = vst [vmem:[%s7023_s28 + $0x3c] sm:$0x8] %v5759_v4  ;;  %v5587_v26 = vrot.slane %v6186_v48, %v7650_v25  ;;  %v5442_v49 = vpack.i.b16 %v5410_v24, %v5410_v24 }
 0x5e5   : > { %5763 = vst [vmem:[%s7023_s28 + $0x40] sm:$0x8] %v5762_v19  ;;  %v5601_v43 = vrot.slane %v6187_v21, %v7650_v25  ;;  %v5444_v20 = vpack.i.b16 %v5412_v46, %v5412_v46  ;;  %v6188_v37 = vpack.i.b16 %v5389_v23, %v5389_v23  ;;  %v5414_v17 = vunpack.i.h.s16 %v5389_v23  ;;  %v5803_v21 = vld [vmem:[%s7023_s28 + $0x78] sm:$0x8] }
 0x5e6   : > { %v5765_v56 = vsel %vm9036_vm6, %v5580_v27, %v5764_v32  ;;  %v6189_v29 = vpack.i.b16 %v5372_v15, %v5372_v15  ;;  %v5768_v30 = vsel %vm9036_vm6, %v5587_v26, %v5767_v44  ;;  %v5594_v36 = vrot.slane %v5442_v49, %v7650_v25  ;;  %v5806_v27 = vld [vmem:[%s7023_s28 + $0x7c] sm:$0x8] }
 0x5e7   : > { %5766 = vst [vmem:[%s7023_s28 + $0x44] sm:$0x8] %v5765_v56  ;;  %v5774_v41 = vsel %vm9036_vm6, %v5601_v43, %v5773_v31  ;;  %v5608_v16 = vrot.slane %v5444_v20, %v7650_v25  ;;  %5769 = vst [vmem:[%s7023_s28 + $0x48] sm:$0x8] %v5768_v30  ;;  %v5615_v62 = vrot.slane %v6188_v37, %v7650_v25  ;;  %v5416_v50 = vunpack.i.h.s16 %v5372_v15 }
 0x5e8   : > { %5775 = vst [vmem:[%s7023_s28 + $0x50] sm:$0x8] %v5774_v41  ;;  %v5446_v63 = vpack.i.b16 %v5414_v17, %v5414_v17  ;;  %v5629_v33 = vrot.slane %v6189_v29, %v7650_v25  ;;  %v5771_v34 = vsel %vm9036_vm6, %v5594_v36, %v5770_v12  ;;  %v5358_v22 = vcombine.high %v9149_v38, %v9149_v38  ;;  %v5797_v38 = vld [vmem:[%s7023_s28 + $0x70] sm:$0x8] }
 0x5e9   : > { %v5777_v3 = vsel %vm9036_vm6, %v5608_v16, %v5776_v14  ;;  %v5388_v5 = vcombine.high %v5372_v15, %v5372_v15  ;;  %5772 = vst [vmem:[%s7023_s28 + $0x4c] sm:$0x8] %v5771_v34  ;;  %v5780_v6 = vsel %vm9036_vm6, %v5615_v62, %v5779_v28  ;;  %v5448_v8 = vpack.i.b16 %v5416_v50, %v5416_v50 }
 0x5ea   : > { %5778 = vst [vmem:[%s7023_s28 + $0x54] sm:$0x8] %v5777_v3  ;;  %v5622_v39 = vrot.slane %v5446_v63, %v7650_v25  ;;  %v5786_v54 = vsel %vm9036_vm6, %v5629_v33, %v5785_v61  ;;  %5781 = vst [vmem:[%s7023_s28 + $0x58] sm:$0x8] %v5780_v6  ;;  %v5386_v53 = vrot.slane %v5358_v22, %v7646_v59 }
 0x5eb   : > { %5787 = vst [vmem:[%s7023_s28 + $0x60] sm:$0x8] %v5786_v54  ;;  %v6191_v1 = vpack.i.b16 %v5388_v5, %v5388_v5  ;;  %v5420_v9 = vunpack.i.h.s16 %v5388_v5  ;;  %v5636_v11 = vrot.slane %v5448_v8, %v7650_v25 }
 0x5ec   : > { %v5783_v55 = vsel %vm9036_vm6, %v5622_v39, %v5782_v47  ;;  %v6190_v18 = vpack.i.b16 %v5386_v53, %v5386_v53  ;;  %v5418_v2 = vunpack.i.h.s16 %v5386_v53  ;;  %v5390_v35 = vcombine.high %v5386_v53, %v5386_v53 }
 0x5ed   : > { %5784 = vst [vmem:[%s7023_s28 + $0x5c] sm:$0x8] %v5783_v55  ;;  %v5657_v10 = vrot.slane %v6191_v1, %v7650_v25  ;;  %v5452_v57 = vpack.i.b16 %v5420_v9, %v5420_v9  ;;  %v5789_v59 = vsel %vm9036_vm6, %v5636_v11, %v5788_v40 }
 0x5ee   : > { %5790 = vst [vmem:[%s7023_s28 + $0x64] sm:$0x8] %v5789_v59  ;;  %v5643_v60 = vrot.slane %v6190_v18, %v7650_v25  ;;  %v5450_v13 = vpack.i.b16 %v5418_v2, %v5418_v2  ;;  %v6192_v51 = vpack.i.b16 %v5390_v35, %v5390_v35  ;;  %v5422_v7 = vunpack.i.h.s16 %v5390_v35 }
 0x5ef   : > { %v5798_v15 = vsel %vm9036_vm6, %v5657_v10, %v5797_v38  ;;  %v5664_v0 = vrot.slane %v5452_v57, %v7650_v25 }
 0x5f0   : > { %5799 = vst [vmem:[%s7023_s28 + $0x70] sm:$0x8] %v5798_v15  ;;  %v5792_v32 = vsel %vm9036_vm6, %v5643_v60, %v5791_v45  ;;  %v5650_v48 = vrot.slane %v5450_v13, %v7650_v25  ;;  %v5671_v46 = vrot.slane %v6192_v51, %v7650_v25  ;;  %v5454_v4 = vpack.i.b16 %v5422_v7, %v5422_v7 }
 0x5f1   : > { %v5801_v24 = vsel %vm9036_vm6, %v5664_v0, %v5800_v58  ;;  %5793 = vst [vmem:[%s7023_s28 + $0x68] sm:$0x8] %v5792_v32 }
 0x5f2   : > { %5802 = vst [vmem:[%s7023_s28 + $0x74] sm:$0x8] %v5801_v24  ;;  %v5795_v19 = vsel %vm9036_vm6, %v5650_v48, %v5794_v52  ;;  %v5804_v44 = vsel %vm9036_vm6, %v5671_v46, %v5803_v21  ;;  %v5678_v31 = vrot.slane %v5454_v4, %v7650_v25 }
 0x5f3   : > { %5796 = vst [vmem:[%s7023_s28 + $0x6c] sm:$0x8] %v5795_v19  ;;  %5805 = vst [vmem:[%s7023_s28 + $0x78] sm:$0x8] %v5804_v44 }
 0x5f4   : > { %v5807_v23 = vsel %vm9036_vm6, %v5678_v31, %v5806_v27 }
 0x5f5   : > { %5808 = vst [vmem:[%s7023_s28 + $0x7c] sm:$0x8] %v5807_v23 }
 0x5f6   : > { %6516 = shalt.err (!%p6513_p9)
}
 0x5f7   : > { %s6517_s11 = scalar_lea.hbm %s9248_s18, 2048  ;;  %s6521_s12 = scalar_lea.hbm %s9314_s6, 6144 }
 0x5f8   : > { %p6518_p10 = scmp.ne.s32.totalorder %s9248_s18, %s6517_s11  ;;  %p6522_p13 = scmp.lt.u32.totalorder %s9248_s18, %s9314_s6 }
 0x5f9   : > { %p6523_p0 = scmp.lt.u32.totalorder %s6521_s12, %s6517_s11  ;;  %p6525_p2 = scmp.lt.u32.totalorder %s6517_s11, %s9248_s18 }
 0x5fa   : > { %p6519_p11 = pnand %p6518_p10, %p6808_p4 }
 0x5fb   : > { %p6524_p1 = por %p6523_p0, %p6522_p13 }
 0x5fc   : > { %p6520_p12 = pneg %p6519_p11 }
 0x5fd   : > { %p6526_p3 = por %p6525_p2, %p6524_p1 }
 0x5ff   : > { %p6527_p5 = pnand %p6526_p3, %p6520_p12 }
 0x601   : > { %6530 = shalt.err (!%p6527_p5)
}
 0x602   : > { %s6730_s24 = smov 64   ;;  %s6731_s15 = smov 192  }
 0x603   : > { %s6732_s20 = smov 4  }
 0x604   : > { %6231 = dma.vmem_to_hbm [thread:$0]  (%p6808_p4), %s9254_s14, 2048, %s9248_s18, %s9262_s19, %s6730_s24, %s6731_s15, %s6732_s20  }
 0x605 PF: > { %p6237_p6 = scmp.ge.s32.totalorder %s6649_s26, 2  ;;  %s5840_s27 = sand.u32 1, %s6629_s21  }
 0x606   : > { %s5841_s16 = scalar_lea.sflag [#allocation10], %s5840_s27 }
 0x607   : > { %p6234_p7 = pnand %p6237_p6, %p6815_p8 }
 0x609   : > { %6624 = dma.done.wait (!%p6234_p7), %s5841_s16, 2048  }
 0x60a   : > { %6626 = vsyncadd (!%p6234_p7), %s5841_s16, 4294965248  ;;  %s19_s26 = sadd.s32 1, %s6649_s26   ;;  %s9370_s21 = smov %s6633_s22 }
 0x60b   : > { %p16_p9 = scmp.ge.s32.totalorder %s19_s26, 5   ;;  %s9371_s22 = smov %s6637_s23 }
 0x60c   : > { %s9372_s23 = smov %s6821_s10  ;;  %s9373_s24 = smov %s6645_s25 }
 0x60d   : > { %s9374_s25 = smov %s9376_s29  ;;  %18 = sbr.rel (!%p16_p9) target bundleno = 4 (0x4), region = 123 }
 0x614   :  { %5846 = vsyncpa [#allocation10], 1 }
 0x615   :  { %5848 = vsyncpa [#allocation10 + $0x1], 1 }

</bundles_post_ra>
